<compile_context>
chip_gen: v7x
topology: tpu7x:2x2x1
jax: 0.10.0
libtpu: 0.0.40
codegen_flags: <defaults>
</compile_context>

<pallas_src>
import functools
import math

import jax
import jax.numpy as jnp
from jax import lax
from jax.experimental import pallas as pl
from jax.experimental.pallas import tpu as pltpu

# ---- model hyper-parameters (small, consistent with the module) -------------
D_MODEL = 32
NHEAD = 4
HEAD_DIM = D_MODEL // NHEAD
DIM_FF = 64
NLAYERS = 2
LN_EPS = 1e-5


# ---------------------------- in-kernel helpers ------------------------------
def _layernorm(x, gamma, beta):
    # x: (M, D); gamma/beta: (1, D).  Var = E[x^2] - mu^2 -> the two lane reductions
    # are independent and can overlap on the XLU.
    mu = jnp.mean(x, axis=-1, keepdims=True)
    ms = jnp.mean(x * x, axis=-1, keepdims=True)
    var = ms - mu * mu
    return (x - mu) * lax.rsqrt(var + LN_EPS) * gamma + beta


def _attn_core(x_rows, wq, bq, k_exp, v_exp, wo, bo, seg, B, S_q):
    """All-heads attention via block-diagonal head expansion.

    x_rows: (B*S_q, D) query source rows (batch folded into M).
    wq/bq : Q projection, 1/sqrt(HEAD_DIM) already folded in host-side.
    k_exp/v_exp: (B, E, D) with E = NHEAD*S_kv; row e = h*S_kv + k holds token k's
                 key/value masked to head h's feature lanes (block-diagonal).
    seg   : (E, E) block-ones matrix (1 where rows belong to the same head).
    wo/bo : out-projection (weight pre-transposed to (in, out)).
    Returns (B*S_q, D).
    """
    D = D_MODEL
    E = k_exp.shape[1]
    q = jnp.dot(x_rows, wq, preferred_element_type=jnp.float32) + bq       # (B*S_q, D)
    q3 = q.reshape(B, S_q, D)
    # scores for all heads at once: lane e = (head, key) pair
    s = jnp.einsum('bqd,bed->bqe', q3, k_exp,
                   preferred_element_type=jnp.float32)                      # (B, S_q, E)
    # segmented softmax: subtracting the full-row max is a valid per-segment constant
    m = jnp.max(s, axis=-1, keepdims=True)
    p = jnp.exp(s - m).reshape(B * S_q, E)
    denom = jnp.dot(p, seg, preferred_element_type=jnp.float32)             # per-head sums
    attn = (p * pl.reciprocal(denom, approx=True)).reshape(B, S_q, E)
    # AV: output lanes already in PyTorch head-concat order
    av = jnp.einsum('bqe,bed->bqd', attn, v_exp,
                    preferred_element_type=jnp.float32)                     # (B, S_q, D)
    return jnp.dot(av.reshape(B * S_q, D), wo,
                   preferred_element_type=jnp.float32) + bo


# ------------------------------- the kernel ----------------------------------
def transformer_dec_kernel(x_ref, mem_rep_ref,
                           mask_s_ref, seg_s_ref, mask_c_ref, seg_c_ref,
                           sa_w_ref, sa_b_ref, ca_w_ref, ca_b_ref,
                           w1_ref, b1_ref, w2_ref, b2_ref,
                           lng_ref, lnb_ref,
                           out_ref, *, B, S_t, S_m):
    """All NLAYERS decoder layers for the whole batch in one invocation.

    x_ref: (B*S_t, D) residual stream (batch folded into M), resident in VMEM/vregs.
    mem_rep_ref: (B*NHEAD*S_m, D) memory rows, already head-tiled host-side.
    Weight refs are stacked with a single flat leading axis and indexed statically:
      sa_w/ca_w: (NLAYERS*4, D, D) ordered [wq(scaled), wk, wv, wo_t] per layer.
      sa_b/ca_b: (NLAYERS*4, 1, D);  lng/lnb: (NLAYERS*3, 1, D).
    """
    D = D_MODEL
    E_c = NHEAD * S_m
    x2 = x_ref[...]                       # (B*S_t, D)
    mem_rep = mem_rep_ref[...]            # (B*E_c, D)
    mask_s = mask_s_ref[...]              # (NHEAD*S_t, D) block-diagonal head mask
    seg_s = seg_s_ref[...]                # (NHEAD*S_t, NHEAD*S_t) block-ones
    mask_c = mask_c_ref[...]              # (NHEAD*S_m, D)
    seg_c = seg_c_ref[...]                # (NHEAD*S_m, NHEAD*S_m)

    for l in range(NLAYERS):              # static layer loop (fully unrolled)
        a = 4 * l
        n = 3 * l

        # --------- self attention + residual + LN1 ---------
        k = jnp.dot(x2, sa_w_ref[a + 1], preferred_element_type=jnp.float32) + sa_b_ref[a + 1]
        v = jnp.dot(x2, sa_w_ref[a + 2], preferred_element_type=jnp.float32) + sa_b_ref[a + 2]
        k3 = k.reshape(B, S_t, D)
        v3 = v.reshape(B, S_t, D)
        # head-expand along sublanes (S_t multiple of 8 -> aligned concat), then mask
        k_exp = jnp.concatenate([k3] * NHEAD, axis=1) * mask_s      # (B, NHEAD*S_t, D)
        v_exp = jnp.concatenate([v3] * NHEAD, axis=1) * mask_s
        sa = _attn_core(x2, sa_w_ref[a], sa_b_ref[a], k_exp, v_exp,
                        sa_w_ref[a + 3], sa_b_ref[a + 3], seg_s, B, S_t)
        x2 = _layernorm(x2 + sa, lng_ref[n], lnb_ref[n])

        # --------- cross attention (memory) + residual + LN2 ---------
        # K/V projections of the head-tiled memory: plain 2D matmuls, no in-kernel
        # broadcast or concat (memory was tiled once in the wrapper).
        kc = jnp.dot(mem_rep, ca_w_ref[a + 1], preferred_element_type=jnp.float32) + ca_b_ref[a + 1]
        vc = jnp.dot(mem_rep, ca_w_ref[a + 2], preferred_element_type=jnp.float32) + ca_b_ref[a + 2]
        kc_exp = kc.reshape(B, E_c, D) * mask_c
        vc_exp = vc.reshape(B, E_c, D) * mask_c
        ca = _attn_core(x2, ca_w_ref[a], ca_b_ref[a], kc_exp, vc_exp,
                        ca_w_ref[a + 3], ca_b_ref[a + 3], seg_c, B, S_t)
        x2 = _layernorm(x2 + ca, lng_ref[n + 1], lnb_ref[n + 1])

        # --------- feed-forward (relu) + residual + LN3 ---------
        h = jnp.maximum(
            jnp.dot(x2, w1_ref[l], preferred_element_type=jnp.float32) + b1_ref[l], 0.0)
        ff = jnp.dot(h, w2_ref[l], preferred_element_type=jnp.float32) + b2_ref[l]
        x2 = _layernorm(x2 + ff, lng_ref[n + 2], lnb_ref[n + 2])

    out_ref[...] = x2                      # single full-width store (tiny; fine as-is)


# ------------------------- host-side constant builders ------------------------
def _head_mask(s_kv):
    """(NHEAD*s_kv, D) mask: row e=h*s_kv+k is 1 on head h's feature lanes, else 0."""
    e = NHEAD * s_kv
    head_of_e = jnp.arange(e) // s_kv
    head_of_d = jnp.arange(D_MODEL) // HEAD_DIM
    return (head_of_e[:, None] == head_of_d[None, :]).astype(jnp.float32)


def _seg_matrix(s_kv):
    """(E, E) block-ones: 1 where the two expanded rows belong to the same head."""
    e = NHEAD * s_kv
    h = jnp.arange(e) // s_kv
    return (h[:, None] == h[None, :]).astype(jnp.float32)


# ------------------------------ wrapper / glue --------------------------------
def transformer_dec_forward(tgt, memory, params):
    """tgt: (B, S_t, D), memory: (B, S_m, D); applies NLAYERS decoder layers."""
    B, S_t, D = tgt.shape
    _, S_m, _ = memory.shape
    E_s, E_c = NHEAD * S_t, NHEAD * S_m
    M = B * S_t

    # Fold batch into the matmul M dimension and head-tile memory OUTSIDE the kernel
    # (cheap XLA reshapes/tiles on tiny arrays).
    x2 = tgt.reshape(M, D).astype(jnp.float32)
    mem_rep = jnp.tile(memory.astype(jnp.float32), (1, NHEAD, 1)).reshape(B * E_c, D)

    mask_s = _head_mask(S_t)
    seg_s = _seg_matrix(S_t)
    mask_c = _head_mask(S_m)
    seg_c = _seg_matrix(S_m)

    inputs = (x2, mem_rep, mask_s, seg_s, mask_c, seg_c) + tuple(params)
    vmem = pl.BlockSpec(memory_space=pltpu.MemorySpace.VMEM)

    # Advisory cost estimate for XLA's scheduler.
    flops_layer = (
        4 * 2 * M * D * D                                      # self q/k/v/out proj
        + 2 * M * E_s * D + 2 * M * E_s * E_s + 2 * M * E_s * D   # self scores/segsum/AV
        + 2 * 2 * M * D * D                                    # cross q/out proj
        + 2 * 2 * (B * E_c) * D * D                            # cross k/v proj (tiled rows)
        + 2 * M * E_c * D + 2 * M * E_c * E_c + 2 * M * E_c * D  # cross scores/segsum/AV
        + 2 * 2 * M * D * DIM_FF                               # FFN
    )
    transc_layer = 2 * M * (E_s + E_c) + 3 * M
    in_bytes = sum(int(a.size) * a.dtype.itemsize for a in inputs)
    cost = pl.CostEstimate(flops=NLAYERS * flops_layer,
                           transcendentals=NLAYERS * transc_layer,
                           bytes_accessed=in_bytes + 4 * M * D)

    kernel = functools.partial(transformer_dec_kernel, B=B, S_t=S_t, S_m=S_m)

    out2 = pl.pallas_call(
        kernel,
        out_shape=jax.ShapeDtypeStruct((M, D), jnp.float32),
        in_specs=[vmem] * len(inputs),
        out_specs=vmem,
        cost_estimate=cost,
    )(*inputs)
    return out2.reshape(B, S_t, D)


def init_params(key):
    """Deterministic synthetic parameters, stacked with a flat leading layer axis.

    Linear weights are stored pre-transposed (in_features, out_features) so the kernel
    computes x @ W directly.  The 1/sqrt(HEAD_DIM) attention scale is folded into the
    Q projection weights (and would be folded into the Q biases if they were nonzero).
    """
    D, F = D_MODEL, DIM_FF
    scale = 1.0 / math.sqrt(HEAD_DIM)
    layer_keys = jax.random.split(key, NLAYERS)

    def w(k, shape):
        return (jax.random.normal(k, shape, jnp.float32) * 0.02).astype(jnp.float32)

    sa_w, sa_b, ca_w, ca_b = [], [], [], []
    w1, b1, w2, b2, lng, lnb = [], [], [], [], [], []
    for lk in layer_keys:
        ks = jax.random.split(lk, 10)
        zero_d = jnp.zeros((1, D), jnp.float32)
        # self-attention: [wq*scale, wk, wv, wo_t]
        sa_w += [w(ks[0], (D, D)) * scale, w(ks[1], (D, D)), w(ks[2], (D, D)), w(ks[3], (D, D))]
        sa_b += [zero_d, zero_d, zero_d, zero_d]   # bq would also carry *scale if nonzero
        # cross-attention: [wq*scale, wk, wv, wo_t]
        ca_w += [w(ks[4], (D, D)) * scale, w(ks[5], (D, D)), w(ks[6], (D, D)), w(ks[7], (D, D))]
        ca_b += [zero_d, zero_d, zero_d, zero_d]
        # FFN
        w1.append(w(ks[8], (D, F)))
        b1.append(jnp.zeros((1, F), jnp.float32))
        w2.append(w(ks[9], (F, D)))
        b2.append(zero_d)
        # LayerNorms 1/2/3
        lng += [jnp.ones((1, D), jnp.float32)] * 3
        lnb += [zero_d] * 3

    return (jnp.stack(sa_w), jnp.stack(sa_b),          # (L*4, D, D), (L*4, 1, D)
            jnp.stack(ca_w), jnp.stack(ca_b),          # (L*4, D, D), (L*4, 1, D)
            jnp.stack(w1), jnp.stack(b1),              # (L, D, F),  (L, 1, F)
            jnp.stack(w2), jnp.stack(b2),              # (L, F, D),  (L, 1, D)
            jnp.stack(lng), jnp.stack(lnb))            # (L*3, 1, D), (L*3, 1, D)


if __name__ == "__main__":
    key = jax.random.PRNGKey(0)
    k_tgt, k_mem, k_par = jax.random.split(key, 3)

    B, S_T, S_M = 2, 8, 12
    tgt = jax.random.normal(k_tgt, (B, S_T, D_MODEL), jnp.float32)
    enc_memory = jax.random.normal(k_mem, (B, S_M, D_MODEL), jnp.float32)

    params = init_params(k_par)

    out = transformer_dec_forward(tgt, enc_memory, params)
    out = jax.block_until_ready(out)

    assert out.shape == (B, S_T, D_MODEL)
    assert bool(jnp.all(jnp.isfinite(out)))
    print("KERNEL_OK")
</pallas_src>

<mosaic_0001>
module attributes {stable_mosaic.version = 11 : i64} {
  func.func @transformer_dec_kernel(%arg0: memref<16x32xf32, #tpu.memory_space<vmem>>, %arg1: memref<96x32xf32, #tpu.memory_space<vmem>>, %arg2: memref<32x32xf32, #tpu.memory_space<vmem>>, %arg3: memref<32x32xf32, #tpu.memory_space<vmem>>, %arg4: memref<48x32xf32, #tpu.memory_space<vmem>>, %arg5: memref<48x48xf32, #tpu.memory_space<vmem>>, %arg6: memref<8x32x32xf32, #tpu.memory_space<vmem>>, %arg7: memref<8x1x32xf32, #tpu.memory_space<vmem>>, %arg8: memref<8x32x32xf32, #tpu.memory_space<vmem>>, %arg9: memref<8x1x32xf32, #tpu.memory_space<vmem>>, %arg10: memref<2x32x64xf32, #tpu.memory_space<vmem>>, %arg11: memref<2x1x64xf32, #tpu.memory_space<vmem>>, %arg12: memref<2x64x32xf32, #tpu.memory_space<vmem>>, %arg13: memref<2x1x32xf32, #tpu.memory_space<vmem>>, %arg14: memref<6x1x32xf32, #tpu.memory_space<vmem>>, %arg15: memref<6x1x32xf32, #tpu.memory_space<vmem>>, %arg16: memref<16x32xf32, #tpu.memory_space<vmem>>) attributes {dimension_semantics = [], scalar_prefetch = 0 : i64, scratch_operands = 0 : i64, tpu.core_type = #tpu.core_type<tc>} {
    %c0 = arith.constant 0 : index
    %c0_0 = arith.constant 0 : index
    %0 = vector.load %arg0[%c0, %c0_0] : memref<16x32xf32, #tpu.memory_space<vmem>>, vector<16x32xf32>
    %c0_1 = arith.constant 0 : index
    %c0_2 = arith.constant 0 : index
    %1 = vector.load %arg1[%c0_1, %c0_2] : memref<96x32xf32, #tpu.memory_space<vmem>>, vector<96x32xf32>
    %c0_3 = arith.constant 0 : index
    %c0_4 = arith.constant 0 : index
    %2 = vector.load %arg2[%c0_3, %c0_4] : memref<32x32xf32, #tpu.memory_space<vmem>>, vector<32x32xf32>
    %c0_5 = arith.constant 0 : index
    %c0_6 = arith.constant 0 : index
    %3 = vector.load %arg3[%c0_5, %c0_6] : memref<32x32xf32, #tpu.memory_space<vmem>>, vector<32x32xf32>
    %c0_7 = arith.constant 0 : index
    %c0_8 = arith.constant 0 : index
    %4 = vector.load %arg4[%c0_7, %c0_8] : memref<48x32xf32, #tpu.memory_space<vmem>>, vector<48x32xf32>
    %c0_9 = arith.constant 0 : index
    %c0_10 = arith.constant 0 : index
    %5 = vector.load %arg5[%c0_9, %c0_10] : memref<48x48xf32, #tpu.memory_space<vmem>>, vector<48x48xf32>
    %c1 = arith.constant 1 : index
    %c0_11 = arith.constant 0 : index
    %c0_12 = arith.constant 0 : index
    %6 = vector.load %arg6[%c1, %c0_11, %c0_12] : memref<8x32x32xf32, #tpu.memory_space<vmem>>, vector<1x32x32xf32>
    %7 = vector.shape_cast %6 : vector<1x32x32xf32> to vector<32x32xf32>
    %cst = arith.constant dense<0.000000e+00> : vector<16x32xf32>
    %8 = tpu.matmul %0, %7, %cst {dimension_numbers = #tpu.dot_dimension_numbers<[1], [0], [0], [1], [0, 0, 1, 1], [], []>} : vector<16x32xf32>, vector<32x32xf32>, vector<16x32xf32> -> vector<16x32xf32>
    %c1_13 = arith.constant 1 : index
    %c0_14 = arith.constant 0 : index
    %c0_15 = arith.constant 0 : index
    %9 = vector.load %arg7[%c1_13, %c0_14, %c0_15] : memref<8x1x32xf32, #tpu.memory_space<vmem>>, vector<1x1x32xf32>
    %10 = vector.shape_cast %9 : vector<1x1x32xf32> to vector<1x32xf32>
    %11 = vector.broadcast %10 : vector<1x32xf32> to vector<16x32xf32>
    %12 = arith.addf %8, %11 : vector<16x32xf32>
    %c2 = arith.constant 2 : index
    %c0_16 = arith.constant 0 : index
    %c0_17 = arith.constant 0 : index
    %13 = vector.load %arg6[%c2, %c0_16, %c0_17] : memref<8x32x32xf32, #tpu.memory_space<vmem>>, vector<1x32x32xf32>
    %14 = vector.shape_cast %13 : vector<1x32x32xf32> to vector<32x32xf32>
    %cst_18 = arith.constant dense<0.000000e+00> : vector<16x32xf32>
    %15 = tpu.matmul %0, %14, %cst_18 {dimension_numbers = #tpu.dot_dimension_numbers<[1], [0], [0], [1], [0, 0, 1, 1], [], []>} : vector<16x32xf32>, vector<32x32xf32>, vector<16x32xf32> -> vector<16x32xf32>
    %c2_19 = arith.constant 2 : index
    %c0_20 = arith.constant 0 : index
    %c0_21 = arith.constant 0 : index
    %16 = vector.load %arg7[%c2_19, %c0_20, %c0_21] : memref<8x1x32xf32, #tpu.memory_space<vmem>>, vector<1x1x32xf32>
    %17 = vector.shape_cast %16 : vector<1x1x32xf32> to vector<1x32xf32>
    %18 = vector.broadcast %17 : vector<1x32xf32> to vector<16x32xf32>
    %19 = arith.addf %15, %18 : vector<16x32xf32>
    %20 = vector.shape_cast %12 : vector<16x32xf32> to vector<2x8x32xf32>
    %21 = vector.shape_cast %19 : vector<16x32xf32> to vector<2x8x32xf32>
    %22 = tpu.concatenate %20, %20, %20, %20 in 1 : vector<2x8x32xf32>, vector<2x8x32xf32>, vector<2x8x32xf32>, vector<2x8x32xf32> -> vector<2x32x32xf32>
    %23 = vector.shape_cast %2 : vector<32x32xf32> to vector<1x32x32xf32>
    %24 = vector.broadcast %23 : vector<1x32x32xf32> to vector<2x32x32xf32>
    %25 = arith.mulf %22, %24 : vector<2x32x32xf32>
    %26 = tpu.concatenate %21, %21, %21, %21 in 1 : vector<2x8x32xf32>, vector<2x8x32xf32>, vector<2x8x32xf32>, vector<2x8x32xf32> -> vector<2x32x32xf32>
    %27 = vector.shape_cast %2 : vector<32x32xf32> to vector<1x32x32xf32>
    %28 = vector.broadcast %27 : vector<1x32x32xf32> to vector<2x32x32xf32>
    %29 = arith.mulf %26, %28 : vector<2x32x32xf32>
    %c0_22 = arith.constant 0 : index
    %c0_23 = arith.constant 0 : index
    %c0_24 = arith.constant 0 : index
    %30 = vector.load %arg6[%c0_22, %c0_23, %c0_24] : memref<8x32x32xf32, #tpu.memory_space<vmem>>, vector<1x32x32xf32>
    %31 = vector.shape_cast %30 : vector<1x32x32xf32> to vector<32x32xf32>
    %c0_25 = arith.constant 0 : index
    %c0_26 = arith.constant 0 : index
    %c0_27 = arith.constant 0 : index
    %32 = vector.load %arg7[%c0_25, %c0_26, %c0_27] : memref<8x1x32xf32, #tpu.memory_space<vmem>>, vector<1x1x32xf32>
    %33 = vector.shape_cast %32 : vector<1x1x32xf32> to vector<1x32xf32>
    %c3 = arith.constant 3 : index
    %c0_28 = arith.constant 0 : index
    %c0_29 = arith.constant 0 : index
    %34 = vector.load %arg6[%c3, %c0_28, %c0_29] : memref<8x32x32xf32, #tpu.memory_space<vmem>>, vector<1x32x32xf32>
    %35 = vector.shape_cast %34 : vector<1x32x32xf32> to vector<32x32xf32>
    %c3_30 = arith.constant 3 : index
    %c0_31 = arith.constant 0 : index
    %c0_32 = arith.constant 0 : index
    %36 = vector.load %arg7[%c3_30, %c0_31, %c0_32] : memref<8x1x32xf32, #tpu.memory_space<vmem>>, vector<1x1x32xf32>
    %37 = vector.shape_cast %36 : vector<1x1x32xf32> to vector<1x32xf32>
    %cst_33 = arith.constant dense<0.000000e+00> : vector<16x32xf32>
    %38 = tpu.matmul %0, %31, %cst_33 {dimension_numbers = #tpu.dot_dimension_numbers<[1], [0], [0], [1], [0, 0, 1, 1], [], []>} : vector<16x32xf32>, vector<32x32xf32>, vector<16x32xf32> -> vector<16x32xf32>
    %39 = vector.broadcast %33 : vector<1x32xf32> to vector<16x32xf32>
    %40 = arith.addf %38, %39 : vector<16x32xf32>
    %41 = vector.shape_cast %40 : vector<16x32xf32> to vector<2x8x32xf32>
    "tpu.trace_start"() <{level = 10 : i32, message = "bqd,bed->bqe"}> : () -> ()
    %cst_34 = arith.constant dense<0.000000e+00> : vector<2x8x32xf32>
    %42 = tpu.matmul %41, %25, %cst_34 {dimension_numbers = #tpu.dot_dimension_numbers<[2], [2], [1], [1], [0, 0, 0, 1, 1, 1], [0], [0]>} : vector<2x8x32xf32>, vector<2x32x32xf32>, vector<2x8x32xf32> -> vector<2x8x32xf32>
    "tpu.trace_stop"() : () -> ()
    %cst_35 = arith.constant dense<0xFF800000> : vector<2x8xf32>
    %43 = vector.multi_reduction <maximumf>, %42, %cst_35 [2] : vector<2x8x32xf32> to vector<2x8xf32>
    %44 = vector.shape_cast %43 : vector<2x8xf32> to vector<2x8x1xf32>
    %45 = vector.broadcast %44 : vector<2x8x1xf32> to vector<2x8x32xf32>
    %46 = arith.subf %42, %45 : vector<2x8x32xf32>
    %47 = math.exp %46 : vector<2x8x32xf32>
    %48 = vector.shape_cast %47 : vector<2x8x32xf32> to vector<16x32xf32>
    %cst_36 = arith.constant dense<0.000000e+00> : vector<16x32xf32>
    %49 = tpu.matmul %48, %3, %cst_36 {dimension_numbers = #tpu.dot_dimension_numbers<[1], [0], [0], [1], [0, 0, 1, 1], [], []>} : vector<16x32xf32>, vector<32x32xf32>, vector<16x32xf32> -> vector<16x32xf32>
    %50 = tpu.reciprocal %49 {approx = true} : vector<16x32xf32> -> vector<16x32xf32>
    %51 = arith.mulf %48, %50 : vector<16x32xf32>
    %52 = vector.shape_cast %51 : vector<16x32xf32> to vector<2x8x32xf32>
    "tpu.trace_start"() <{level = 10 : i32, message = "bqe,bed->bqd"}> : () -> ()
    %cst_37 = arith.constant dense<0.000000e+00> : vector<2x8x32xf32>
    %53 = tpu.matmul %52, %29, %cst_37 {dimension_numbers = #tpu.dot_dimension_numbers<[2], [1], [1], [2], [0, 0, 0, 1, 1, 2], [0], [0]>} : vector<2x8x32xf32>, vector<2x32x32xf32>, vector<2x8x32xf32> -> vector<2x8x32xf32>
    "tpu.trace_stop"() : () -> ()
    %54 = vector.shape_cast %53 : vector<2x8x32xf32> to vector<16x32xf32>
    %cst_38 = arith.constant dense<0.000000e+00> : vector<16x32xf32>
    %55 = tpu.matmul %54, %35, %cst_38 {dimension_numbers = #tpu.dot_dimension_numbers<[1], [0], [0], [1], [0, 0, 1, 1], [], []>} : vector<16x32xf32>, vector<32x32xf32>, vector<16x32xf32> -> vector<16x32xf32>
    %56 = vector.broadcast %37 : vector<1x32xf32> to vector<16x32xf32>
    %57 = arith.addf %55, %56 : vector<16x32xf32>
    %58 = arith.addf %0, %57 : vector<16x32xf32>
    %c0_39 = arith.constant 0 : index
    %c0_40 = arith.constant 0 : index
    %c0_41 = arith.constant 0 : index
    %59 = vector.load %arg14[%c0_39, %c0_40, %c0_41] : memref<6x1x32xf32, #tpu.memory_space<vmem>>, vector<1x1x32xf32>
    %60 = vector.shape_cast %59 : vector<1x1x32xf32> to vector<1x32xf32>
    %c0_42 = arith.constant 0 : index
    %c0_43 = arith.constant 0 : index
    %c0_44 = arith.constant 0 : index
    %61 = vector.load %arg15[%c0_42, %c0_43, %c0_44] : memref<6x1x32xf32, #tpu.memory_space<vmem>>, vector<1x1x32xf32>
    %62 = vector.shape_cast %61 : vector<1x1x32xf32> to vector<1x32xf32>
    %cst_45 = arith.constant dense<0.000000e+00> : vector<16xf32>
    %63 = vector.multi_reduction <add>, %58, %cst_45 [1] : vector<16x32xf32> to vector<16xf32>
    %64 = vector.shape_cast %63 : vector<16xf32> to vector<16x1xf32>
    %cst_46 = arith.constant 3.200000e+01 : f32
    %65 = vector.broadcast %cst_46 : f32 to vector<16x1xf32>
    %66 = arith.divf %64, %65 : vector<16x1xf32>
    %67 = arith.mulf %58, %58 : vector<16x32xf32>
    %cst_47 = arith.constant dense<0.000000e+00> : vector<16xf32>
    %68 = vector.multi_reduction <add>, %67, %cst_47 [1] : vector<16x32xf32> to vector<16xf32>
    %69 = vector.shape_cast %68 : vector<16xf32> to vector<16x1xf32>
    %cst_48 = arith.constant 3.200000e+01 : f32
    %70 = vector.broadcast %cst_48 : f32 to vector<16x1xf32>
    %71 = arith.divf %69, %70 : vector<16x1xf32>
    %72 = arith.mulf %66, %66 : vector<16x1xf32>
    %73 = arith.subf %71, %72 : vector<16x1xf32>
    %74 = vector.broadcast %66 : vector<16x1xf32> to vector<16x32xf32>
    %75 = arith.subf %58, %74 : vector<16x32xf32>
    %cst_49 = arith.constant 9.99999974E-6 : f32
    %76 = vector.broadcast %cst_49 : f32 to vector<16x1xf32>
    %77 = arith.addf %73, %76 : vector<16x1xf32>
    %78 = math.rsqrt %77 : vector<16x1xf32>
    %79 = vector.broadcast %78 : vector<16x1xf32> to vector<16x32xf32>
    %80 = arith.mulf %75, %79 : vector<16x32xf32>
    %81 = vector.broadcast %60 : vector<1x32xf32> to vector<16x32xf32>
    %82 = arith.mulf %80, %81 : vector<16x32xf32>
    %83 = vector.broadcast %62 : vector<1x32xf32> to vector<16x32xf32>
    %84 = arith.addf %82, %83 : vector<16x32xf32>
    %c1_50 = arith.constant 1 : index
    %c0_51 = arith.constant 0 : index
    %c0_52 = arith.constant 0 : index
    %85 = vector.load %arg8[%c1_50, %c0_51, %c0_52] : memref<8x32x32xf32, #tpu.memory_space<vmem>>, vector<1x32x32xf32>
    %86 = vector.shape_cast %85 : vector<1x32x32xf32> to vector<32x32xf32>
    %cst_53 = arith.constant dense<0.000000e+00> : vector<96x32xf32>
    %87 = tpu.matmul %1, %86, %cst_53 {dimension_numbers = #tpu.dot_dimension_numbers<[1], [0], [0], [1], [0, 0, 1, 1], [], []>} : vector<96x32xf32>, vector<32x32xf32>, vector<96x32xf32> -> vector<96x32xf32>
    %c1_54 = arith.constant 1 : index
    %c0_55 = arith.constant 0 : index
    %c0_56 = arith.constant 0 : index
    %88 = vector.load %arg9[%c1_54, %c0_55, %c0_56] : memref<8x1x32xf32, #tpu.memory_space<vmem>>, vector<1x1x32xf32>
    %89 = vector.shape_cast %88 : vector<1x1x32xf32> to vector<1x32xf32>
    %90 = vector.broadcast %89 : vector<1x32xf32> to vector<96x32xf32>
    %91 = arith.addf %87, %90 : vector<96x32xf32>
    %c2_57 = arith.constant 2 : index
    %c0_58 = arith.constant 0 : index
    %c0_59 = arith.constant 0 : index
    %92 = vector.load %arg8[%c2_57, %c0_58, %c0_59] : memref<8x32x32xf32, #tpu.memory_space<vmem>>, vector<1x32x32xf32>
    %93 = vector.shape_cast %92 : vector<1x32x32xf32> to vector<32x32xf32>
    %cst_60 = arith.constant dense<0.000000e+00> : vector<96x32xf32>
    %94 = tpu.matmul %1, %93, %cst_60 {dimension_numbers = #tpu.dot_dimension_numbers<[1], [0], [0], [1], [0, 0, 1, 1], [], []>} : vector<96x32xf32>, vector<32x32xf32>, vector<96x32xf32> -> vector<96x32xf32>
    %c2_61 = arith.constant 2 : index
    %c0_62 = arith.constant 0 : index
    %c0_63 = arith.constant 0 : index
    %95 = vector.load %arg9[%c2_61, %c0_62, %c0_63] : memref<8x1x32xf32, #tpu.memory_space<vmem>>, vector<1x1x32xf32>
    %96 = vector.shape_cast %95 : vector<1x1x32xf32> to vector<1x32xf32>
    %97 = vector.broadcast %96 : vector<1x32xf32> to vector<96x32xf32>
    %98 = arith.addf %94, %97 : vector<96x32xf32>
    %99 = vector.shape_cast %91 : vector<96x32xf32> to vector<2x48x32xf32>
    %100 = vector.shape_cast %4 : vector<48x32xf32> to vector<1x48x32xf32>
    %101 = vector.broadcast %100 : vector<1x48x32xf32> to vector<2x48x32xf32>
    %102 = arith.mulf %99, %101 : vector<2x48x32xf32>
    %103 = vector.shape_cast %98 : vector<96x32xf32> to vector<2x48x32xf32>
    %104 = vector.shape_cast %4 : vector<48x32xf32> to vector<1x48x32xf32>
    %105 = vector.broadcast %104 : vector<1x48x32xf32> to vector<2x48x32xf32>
    %106 = arith.mulf %103, %105 : vector<2x48x32xf32>
    %c0_64 = arith.constant 0 : index
    %c0_65 = arith.constant 0 : index
    %c0_66 = arith.constant 0 : index
    %107 = vector.load %arg8[%c0_64, %c0_65, %c0_66] : memref<8x32x32xf32, #tpu.memory_space<vmem>>, vector<1x32x32xf32>
    %108 = vector.shape_cast %107 : vector<1x32x32xf32> to vector<32x32xf32>
    %c0_67 = arith.constant 0 : index
    %c0_68 = arith.constant 0 : index
    %c0_69 = arith.constant 0 : index
    %109 = vector.load %arg9[%c0_67, %c0_68, %c0_69] : memref<8x1x32xf32, #tpu.memory_space<vmem>>, vector<1x1x32xf32>
    %110 = vector.shape_cast %109 : vector<1x1x32xf32> to vector<1x32xf32>
    %c3_70 = arith.constant 3 : index
    %c0_71 = arith.constant 0 : index
    %c0_72 = arith.constant 0 : index
    %111 = vector.load %arg8[%c3_70, %c0_71, %c0_72] : memref<8x32x32xf32, #tpu.memory_space<vmem>>, vector<1x32x32xf32>
    %112 = vector.shape_cast %111 : vector<1x32x32xf32> to vector<32x32xf32>
    %c3_73 = arith.constant 3 : index
    %c0_74 = arith.constant 0 : index
    %c0_75 = arith.constant 0 : index
    %113 = vector.load %arg9[%c3_73, %c0_74, %c0_75] : memref<8x1x32xf32, #tpu.memory_space<vmem>>, vector<1x1x32xf32>
    %114 = vector.shape_cast %113 : vector<1x1x32xf32> to vector<1x32xf32>
    %cst_76 = arith.constant dense<0.000000e+00> : vector<16x32xf32>
    %115 = tpu.matmul %84, %108, %cst_76 {dimension_numbers = #tpu.dot_dimension_numbers<[1], [0], [0], [1], [0, 0, 1, 1], [], []>} : vector<16x32xf32>, vector<32x32xf32>, vector<16x32xf32> -> vector<16x32xf32>
    %116 = vector.broadcast %110 : vector<1x32xf32> to vector<16x32xf32>
    %117 = arith.addf %115, %116 : vector<16x32xf32>
    %118 = vector.shape_cast %117 : vector<16x32xf32> to vector<2x8x32xf32>
    "tpu.trace_start"() <{level = 10 : i32, message = "bqd,bed->bqe"}> : () -> ()
    %cst_77 = arith.constant dense<0.000000e+00> : vector<2x8x48xf32>
    %119 = tpu.matmul %118, %102, %cst_77 {dimension_numbers = #tpu.dot_dimension_numbers<[2], [2], [1], [1], [0, 0, 0, 1, 1, 1], [0], [0]>} : vector<2x8x32xf32>, vector<2x48x32xf32>, vector<2x8x48xf32> -> vector<2x8x48xf32>
    "tpu.trace_stop"() : () -> ()
    %cst_78 = arith.constant dense<0xFF800000> : vector<2x8xf32>
    %120 = vector.multi_reduction <maximumf>, %119, %cst_78 [2] : vector<2x8x48xf32> to vector<2x8xf32>
    %121 = vector.shape_cast %120 : vector<2x8xf32> to vector<2x8x1xf32>
    %122 = vector.broadcast %121 : vector<2x8x1xf32> to vector<2x8x48xf32>
    %123 = arith.subf %119, %122 : vector<2x8x48xf32>
    %124 = math.exp %123 : vector<2x8x48xf32>
    %125 = vector.shape_cast %124 : vector<2x8x48xf32> to vector<16x48xf32>
    %cst_79 = arith.constant dense<0.000000e+00> : vector<16x48xf32>
    %126 = tpu.matmul %125, %5, %cst_79 {dimension_numbers = #tpu.dot_dimension_numbers<[1], [0], [0], [1], [0, 0, 1, 1], [], []>} : vector<16x48xf32>, vector<48x48xf32>, vector<16x48xf32> -> vector<16x48xf32>
    %127 = tpu.reciprocal %126 {approx = true} : vector<16x48xf32> -> vector<16x48xf32>
    %128 = arith.mulf %125, %127 : vector<16x48xf32>
    %129 = vector.shape_cast %128 : vector<16x48xf32> to vector<2x8x48xf32>
    "tpu.trace_start"() <{level = 10 : i32, message = "bqe,bed->bqd"}> : () -> ()
    %cst_80 = arith.constant dense<0.000000e+00> : vector<2x8x32xf32>
    %130 = tpu.matmul %129, %106, %cst_80 {dimension_numbers = #tpu.dot_dimension_numbers<[2], [1], [1], [2], [0, 0, 0, 1, 1, 2], [0], [0]>} : vector<2x8x48xf32>, vector<2x48x32xf32>, vector<2x8x32xf32> -> vector<2x8x32xf32>
    "tpu.trace_stop"() : () -> ()
    %131 = vector.shape_cast %130 : vector<2x8x32xf32> to vector<16x32xf32>
    %cst_81 = arith.constant dense<0.000000e+00> : vector<16x32xf32>
    %132 = tpu.matmul %131, %112, %cst_81 {dimension_numbers = #tpu.dot_dimension_numbers<[1], [0], [0], [1], [0, 0, 1, 1], [], []>} : vector<16x32xf32>, vector<32x32xf32>, vector<16x32xf32> -> vector<16x32xf32>
    %133 = vector.broadcast %114 : vector<1x32xf32> to vector<16x32xf32>
    %134 = arith.addf %132, %133 : vector<16x32xf32>
    %135 = arith.addf %84, %134 : vector<16x32xf32>
    %c1_82 = arith.constant 1 : index
    %c0_83 = arith.constant 0 : index
    %c0_84 = arith.constant 0 : index
    %136 = vector.load %arg14[%c1_82, %c0_83, %c0_84] : memref<6x1x32xf32, #tpu.memory_space<vmem>>, vector<1x1x32xf32>
    %137 = vector.shape_cast %136 : vector<1x1x32xf32> to vector<1x32xf32>
    %c1_85 = arith.constant 1 : index
    %c0_86 = arith.constant 0 : index
    %c0_87 = arith.constant 0 : index
    %138 = vector.load %arg15[%c1_85, %c0_86, %c0_87] : memref<6x1x32xf32, #tpu.memory_space<vmem>>, vector<1x1x32xf32>
    %139 = vector.shape_cast %138 : vector<1x1x32xf32> to vector<1x32xf32>
    %cst_88 = arith.constant dense<0.000000e+00> : vector<16xf32>
    %140 = vector.multi_reduction <add>, %135, %cst_88 [1] : vector<16x32xf32> to vector<16xf32>
    %141 = vector.shape_cast %140 : vector<16xf32> to vector<16x1xf32>
    %cst_89 = arith.constant 3.200000e+01 : f32
    %142 = vector.broadcast %cst_89 : f32 to vector<16x1xf32>
    %143 = arith.divf %141, %142 : vector<16x1xf32>
    %144 = arith.mulf %135, %135 : vector<16x32xf32>
    %cst_90 = arith.constant dense<0.000000e+00> : vector<16xf32>
    %145 = vector.multi_reduction <add>, %144, %cst_90 [1] : vector<16x32xf32> to vector<16xf32>
    %146 = vector.shape_cast %145 : vector<16xf32> to vector<16x1xf32>
    %cst_91 = arith.constant 3.200000e+01 : f32
    %147 = vector.broadcast %cst_91 : f32 to vector<16x1xf32>
    %148 = arith.divf %146, %147 : vector<16x1xf32>
    %149 = arith.mulf %143, %143 : vector<16x1xf32>
    %150 = arith.subf %148, %149 : vector<16x1xf32>
    %151 = vector.broadcast %143 : vector<16x1xf32> to vector<16x32xf32>
    %152 = arith.subf %135, %151 : vector<16x32xf32>
    %cst_92 = arith.constant 9.99999974E-6 : f32
    %153 = vector.broadcast %cst_92 : f32 to vector<16x1xf32>
    %154 = arith.addf %150, %153 : vector<16x1xf32>
    %155 = math.rsqrt %154 : vector<16x1xf32>
    %156 = vector.broadcast %155 : vector<16x1xf32> to vector<16x32xf32>
    %157 = arith.mulf %152, %156 : vector<16x32xf32>
    %158 = vector.broadcast %137 : vector<1x32xf32> to vector<16x32xf32>
    %159 = arith.mulf %157, %158 : vector<16x32xf32>
    %160 = vector.broadcast %139 : vector<1x32xf32> to vector<16x32xf32>
    %161 = arith.addf %159, %160 : vector<16x32xf32>
    %c0_93 = arith.constant 0 : index
    %c0_94 = arith.constant 0 : index
    %c0_95 = arith.constant 0 : index
    %162 = vector.load %arg10[%c0_93, %c0_94, %c0_95] : memref<2x32x64xf32, #tpu.memory_space<vmem>>, vector<1x32x64xf32>
    %163 = vector.shape_cast %162 : vector<1x32x64xf32> to vector<32x64xf32>
    %cst_96 = arith.constant dense<0.000000e+00> : vector<16x64xf32>
    %164 = tpu.matmul %161, %163, %cst_96 {dimension_numbers = #tpu.dot_dimension_numbers<[1], [0], [0], [1], [0, 0, 1, 1], [], []>} : vector<16x32xf32>, vector<32x64xf32>, vector<16x64xf32> -> vector<16x64xf32>
    %c0_97 = arith.constant 0 : index
    %c0_98 = arith.constant 0 : index
    %c0_99 = arith.constant 0 : index
    %165 = vector.load %arg11[%c0_97, %c0_98, %c0_99] : memref<2x1x64xf32, #tpu.memory_space<vmem>>, vector<1x1x64xf32>
    %166 = vector.shape_cast %165 : vector<1x1x64xf32> to vector<1x64xf32>
    %167 = vector.broadcast %166 : vector<1x64xf32> to vector<16x64xf32>
    %168 = arith.addf %164, %167 : vector<16x64xf32>
    %cst_100 = arith.constant 0.000000e+00 : f32
    %169 = vector.broadcast %cst_100 : f32 to vector<16x64xf32>
    %170 = arith.maximumf %168, %169 : vector<16x64xf32>
    %c0_101 = arith.constant 0 : index
    %c0_102 = arith.constant 0 : index
    %c0_103 = arith.constant 0 : index
    %171 = vector.load %arg12[%c0_101, %c0_102, %c0_103] : memref<2x64x32xf32, #tpu.memory_space<vmem>>, vector<1x64x32xf32>
    %172 = vector.shape_cast %171 : vector<1x64x32xf32> to vector<64x32xf32>
    %cst_104 = arith.constant dense<0.000000e+00> : vector<16x32xf32>
    %173 = tpu.matmul %170, %172, %cst_104 {dimension_numbers = #tpu.dot_dimension_numbers<[1], [0], [0], [1], [0, 0, 1, 1], [], []>} : vector<16x64xf32>, vector<64x32xf32>, vector<16x32xf32> -> vector<16x32xf32>
    %c0_105 = arith.constant 0 : index
    %c0_106 = arith.constant 0 : index
    %c0_107 = arith.constant 0 : index
    %174 = vector.load %arg13[%c0_105, %c0_106, %c0_107] : memref<2x1x32xf32, #tpu.memory_space<vmem>>, vector<1x1x32xf32>
    %175 = vector.shape_cast %174 : vector<1x1x32xf32> to vector<1x32xf32>
    %176 = vector.broadcast %175 : vector<1x32xf32> to vector<16x32xf32>
    %177 = arith.addf %173, %176 : vector<16x32xf32>
    %178 = arith.addf %161, %177 : vector<16x32xf32>
    %c2_108 = arith.constant 2 : index
    %c0_109 = arith.constant 0 : index
    %c0_110 = arith.constant 0 : index
    %179 = vector.load %arg14[%c2_108, %c0_109, %c0_110] : memref<6x1x32xf32, #tpu.memory_space<vmem>>, vector<1x1x32xf32>
    %180 = vector.shape_cast %179 : vector<1x1x32xf32> to vector<1x32xf32>
    %c2_111 = arith.constant 2 : index
    %c0_112 = arith.constant 0 : index
    %c0_113 = arith.constant 0 : index
    %181 = vector.load %arg15[%c2_111, %c0_112, %c0_113] : memref<6x1x32xf32, #tpu.memory_space<vmem>>, vector<1x1x32xf32>
    %182 = vector.shape_cast %181 : vector<1x1x32xf32> to vector<1x32xf32>
    %cst_114 = arith.constant dense<0.000000e+00> : vector<16xf32>
    %183 = vector.multi_reduction <add>, %178, %cst_114 [1] : vector<16x32xf32> to vector<16xf32>
    %184 = vector.shape_cast %183 : vector<16xf32> to vector<16x1xf32>
    %cst_115 = arith.constant 3.200000e+01 : f32
    %185 = vector.broadcast %cst_115 : f32 to vector<16x1xf32>
    %186 = arith.divf %184, %185 : vector<16x1xf32>
    %187 = arith.mulf %178, %178 : vector<16x32xf32>
    %cst_116 = arith.constant dense<0.000000e+00> : vector<16xf32>
    %188 = vector.multi_reduction <add>, %187, %cst_116 [1] : vector<16x32xf32> to vector<16xf32>
    %189 = vector.shape_cast %188 : vector<16xf32> to vector<16x1xf32>
    %cst_117 = arith.constant 3.200000e+01 : f32
    %190 = vector.broadcast %cst_117 : f32 to vector<16x1xf32>
    %191 = arith.divf %189, %190 : vector<16x1xf32>
    %192 = arith.mulf %186, %186 : vector<16x1xf32>
    %193 = arith.subf %191, %192 : vector<16x1xf32>
    %194 = vector.broadcast %186 : vector<16x1xf32> to vector<16x32xf32>
    %195 = arith.subf %178, %194 : vector<16x32xf32>
    %cst_118 = arith.constant 9.99999974E-6 : f32
    %196 = vector.broadcast %cst_118 : f32 to vector<16x1xf32>
    %197 = arith.addf %193, %196 : vector<16x1xf32>
    %198 = math.rsqrt %197 : vector<16x1xf32>
    %199 = vector.broadcast %198 : vector<16x1xf32> to vector<16x32xf32>
    %200 = arith.mulf %195, %199 : vector<16x32xf32>
    %201 = vector.broadcast %180 : vector<1x32xf32> to vector<16x32xf32>
    %202 = arith.mulf %200, %201 : vector<16x32xf32>
    %203 = vector.broadcast %182 : vector<1x32xf32> to vector<16x32xf32>
    %204 = arith.addf %202, %203 : vector<16x32xf32>
    %c5 = arith.constant 5 : index
    %c0_119 = arith.constant 0 : index
    %c0_120 = arith.constant 0 : index
    %205 = vector.load %arg6[%c5, %c0_119, %c0_120] : memref<8x32x32xf32, #tpu.memory_space<vmem>>, vector<1x32x32xf32>
    %206 = vector.shape_cast %205 : vector<1x32x32xf32> to vector<32x32xf32>
    %cst_121 = arith.constant dense<0.000000e+00> : vector<16x32xf32>
    %207 = tpu.matmul %204, %206, %cst_121 {dimension_numbers = #tpu.dot_dimension_numbers<[1], [0], [0], [1], [0, 0, 1, 1], [], []>} : vector<16x32xf32>, vector<32x32xf32>, vector<16x32xf32> -> vector<16x32xf32>
    %c5_122 = arith.constant 5 : index
    %c0_123 = arith.constant 0 : index
    %c0_124 = arith.constant 0 : index
    %208 = vector.load %arg7[%c5_122, %c0_123, %c0_124] : memref<8x1x32xf32, #tpu.memory_space<vmem>>, vector<1x1x32xf32>
    %209 = vector.shape_cast %208 : vector<1x1x32xf32> to vector<1x32xf32>
    %210 = vector.broadcast %209 : vector<1x32xf32> to vector<16x32xf32>
    %211 = arith.addf %207, %210 : vector<16x32xf32>
    %c6 = arith.constant 6 : index
    %c0_125 = arith.constant 0 : index
    %c0_126 = arith.constant 0 : index
    %212 = vector.load %arg6[%c6, %c0_125, %c0_126] : memref<8x32x32xf32, #tpu.memory_space<vmem>>, vector<1x32x32xf32>
    %213 = vector.shape_cast %212 : vector<1x32x32xf32> to vector<32x32xf32>
    %cst_127 = arith.constant dense<0.000000e+00> : vector<16x32xf32>
    %214 = tpu.matmul %204, %213, %cst_127 {dimension_numbers = #tpu.dot_dimension_numbers<[1], [0], [0], [1], [0, 0, 1, 1], [], []>} : vector<16x32xf32>, vector<32x32xf32>, vector<16x32xf32> -> vector<16x32xf32>
    %c6_128 = arith.constant 6 : index
    %c0_129 = arith.constant 0 : index
    %c0_130 = arith.constant 0 : index
    %215 = vector.load %arg7[%c6_128, %c0_129, %c0_130] : memref<8x1x32xf32, #tpu.memory_space<vmem>>, vector<1x1x32xf32>
    %216 = vector.shape_cast %215 : vector<1x1x32xf32> to vector<1x32xf32>
    %217 = vector.broadcast %216 : vector<1x32xf32> to vector<16x32xf32>
    %218 = arith.addf %214, %217 : vector<16x32xf32>
    %219 = vector.shape_cast %211 : vector<16x32xf32> to vector<2x8x32xf32>
    %220 = vector.shape_cast %218 : vector<16x32xf32> to vector<2x8x32xf32>
    %221 = tpu.concatenate %219, %219, %219, %219 in 1 : vector<2x8x32xf32>, vector<2x8x32xf32>, vector<2x8x32xf32>, vector<2x8x32xf32> -> vector<2x32x32xf32>
    %222 = vector.shape_cast %2 : vector<32x32xf32> to vector<1x32x32xf32>
    %223 = vector.broadcast %222 : vector<1x32x32xf32> to vector<2x32x32xf32>
    %224 = arith.mulf %221, %223 : vector<2x32x32xf32>
    %225 = tpu.concatenate %220, %220, %220, %220 in 1 : vector<2x8x32xf32>, vector<2x8x32xf32>, vector<2x8x32xf32>, vector<2x8x32xf32> -> vector<2x32x32xf32>
    %226 = vector.shape_cast %2 : vector<32x32xf32> to vector<1x32x32xf32>
    %227 = vector.broadcast %226 : vector<1x32x32xf32> to vector<2x32x32xf32>
    %228 = arith.mulf %225, %227 : vector<2x32x32xf32>
    %c4 = arith.constant 4 : index
    %c0_131 = arith.constant 0 : index
    %c0_132 = arith.constant 0 : index
    %229 = vector.load %arg6[%c4, %c0_131, %c0_132] : memref<8x32x32xf32, #tpu.memory_space<vmem>>, vector<1x32x32xf32>
    %230 = vector.shape_cast %229 : vector<1x32x32xf32> to vector<32x32xf32>
    %c4_133 = arith.constant 4 : index
    %c0_134 = arith.constant 0 : index
    %c0_135 = arith.constant 0 : index
    %231 = vector.load %arg7[%c4_133, %c0_134, %c0_135] : memref<8x1x32xf32, #tpu.memory_space<vmem>>, vector<1x1x32xf32>
    %232 = vector.shape_cast %231 : vector<1x1x32xf32> to vector<1x32xf32>
    %c7 = arith.constant 7 : index
    %c0_136 = arith.constant 0 : index
    %c0_137 = arith.constant 0 : index
    %233 = vector.load %arg6[%c7, %c0_136, %c0_137] : memref<8x32x32xf32, #tpu.memory_space<vmem>>, vector<1x32x32xf32>
    %234 = vector.shape_cast %233 : vector<1x32x32xf32> to vector<32x32xf32>
    %c7_138 = arith.constant 7 : index
    %c0_139 = arith.constant 0 : index
    %c0_140 = arith.constant 0 : index
    %235 = vector.load %arg7[%c7_138, %c0_139, %c0_140] : memref<8x1x32xf32, #tpu.memory_space<vmem>>, vector<1x1x32xf32>
    %236 = vector.shape_cast %235 : vector<1x1x32xf32> to vector<1x32xf32>
    %cst_141 = arith.constant dense<0.000000e+00> : vector<16x32xf32>
    %237 = tpu.matmul %204, %230, %cst_141 {dimension_numbers = #tpu.dot_dimension_numbers<[1], [0], [0], [1], [0, 0, 1, 1], [], []>} : vector<16x32xf32>, vector<32x32xf32>, vector<16x32xf32> -> vector<16x32xf32>
    %238 = vector.broadcast %232 : vector<1x32xf32> to vector<16x32xf32>
    %239 = arith.addf %237, %238 : vector<16x32xf32>
    %240 = vector.shape_cast %239 : vector<16x32xf32> to vector<2x8x32xf32>
    "tpu.trace_start"() <{level = 10 : i32, message = "bqd,bed->bqe"}> : () -> ()
    %cst_142 = arith.constant dense<0.000000e+00> : vector<2x8x32xf32>
    %241 = tpu.matmul %240, %224, %cst_142 {dimension_numbers = #tpu.dot_dimension_numbers<[2], [2], [1], [1], [0, 0, 0, 1, 1, 1], [0], [0]>} : vector<2x8x32xf32>, vector<2x32x32xf32>, vector<2x8x32xf32> -> vector<2x8x32xf32>
    "tpu.trace_stop"() : () -> ()
    %cst_143 = arith.constant dense<0xFF800000> : vector<2x8xf32>
    %242 = vector.multi_reduction <maximumf>, %241, %cst_143 [2] : vector<2x8x32xf32> to vector<2x8xf32>
    %243 = vector.shape_cast %242 : vector<2x8xf32> to vector<2x8x1xf32>
    %244 = vector.broadcast %243 : vector<2x8x1xf32> to vector<2x8x32xf32>
    %245 = arith.subf %241, %244 : vector<2x8x32xf32>
    %246 = math.exp %245 : vector<2x8x32xf32>
    %247 = vector.shape_cast %246 : vector<2x8x32xf32> to vector<16x32xf32>
    %cst_144 = arith.constant dense<0.000000e+00> : vector<16x32xf32>
    %248 = tpu.matmul %247, %3, %cst_144 {dimension_numbers = #tpu.dot_dimension_numbers<[1], [0], [0], [1], [0, 0, 1, 1], [], []>} : vector<16x32xf32>, vector<32x32xf32>, vector<16x32xf32> -> vector<16x32xf32>
    %249 = tpu.reciprocal %248 {approx = true} : vector<16x32xf32> -> vector<16x32xf32>
    %250 = arith.mulf %247, %249 : vector<16x32xf32>
    %251 = vector.shape_cast %250 : vector<16x32xf32> to vector<2x8x32xf32>
    "tpu.trace_start"() <{level = 10 : i32, message = "bqe,bed->bqd"}> : () -> ()
    %cst_145 = arith.constant dense<0.000000e+00> : vector<2x8x32xf32>
    %252 = tpu.matmul %251, %228, %cst_145 {dimension_numbers = #tpu.dot_dimension_numbers<[2], [1], [1], [2], [0, 0, 0, 1, 1, 2], [0], [0]>} : vector<2x8x32xf32>, vector<2x32x32xf32>, vector<2x8x32xf32> -> vector<2x8x32xf32>
    "tpu.trace_stop"() : () -> ()
    %253 = vector.shape_cast %252 : vector<2x8x32xf32> to vector<16x32xf32>
    %cst_146 = arith.constant dense<0.000000e+00> : vector<16x32xf32>
    %254 = tpu.matmul %253, %234, %cst_146 {dimension_numbers = #tpu.dot_dimension_numbers<[1], [0], [0], [1], [0, 0, 1, 1], [], []>} : vector<16x32xf32>, vector<32x32xf32>, vector<16x32xf32> -> vector<16x32xf32>
    %255 = vector.broadcast %236 : vector<1x32xf32> to vector<16x32xf32>
    %256 = arith.addf %254, %255 : vector<16x32xf32>
    %257 = arith.addf %204, %256 : vector<16x32xf32>
    %c3_147 = arith.constant 3 : index
    %c0_148 = arith.constant 0 : index
    %c0_149 = arith.constant 0 : index
    %258 = vector.load %arg14[%c3_147, %c0_148, %c0_149] : memref<6x1x32xf32, #tpu.memory_space<vmem>>, vector<1x1x32xf32>
    %259 = vector.shape_cast %258 : vector<1x1x32xf32> to vector<1x32xf32>
    %c3_150 = arith.constant 3 : index
    %c0_151 = arith.constant 0 : index
    %c0_152 = arith.constant 0 : index
    %260 = vector.load %arg15[%c3_150, %c0_151, %c0_152] : memref<6x1x32xf32, #tpu.memory_space<vmem>>, vector<1x1x32xf32>
    %261 = vector.shape_cast %260 : vector<1x1x32xf32> to vector<1x32xf32>
    %cst_153 = arith.constant dense<0.000000e+00> : vector<16xf32>
    %262 = vector.multi_reduction <add>, %257, %cst_153 [1] : vector<16x32xf32> to vector<16xf32>
    %263 = vector.shape_cast %262 : vector<16xf32> to vector<16x1xf32>
    %cst_154 = arith.constant 3.200000e+01 : f32
    %264 = vector.broadcast %cst_154 : f32 to vector<16x1xf32>
    %265 = arith.divf %263, %264 : vector<16x1xf32>
    %266 = arith.mulf %257, %257 : vector<16x32xf32>
    %cst_155 = arith.constant dense<0.000000e+00> : vector<16xf32>
    %267 = vector.multi_reduction <add>, %266, %cst_155 [1] : vector<16x32xf32> to vector<16xf32>
    %268 = vector.shape_cast %267 : vector<16xf32> to vector<16x1xf32>
    %cst_156 = arith.constant 3.200000e+01 : f32
    %269 = vector.broadcast %cst_156 : f32 to vector<16x1xf32>
    %270 = arith.divf %268, %269 : vector<16x1xf32>
    %271 = arith.mulf %265, %265 : vector<16x1xf32>
    %272 = arith.subf %270, %271 : vector<16x1xf32>
    %273 = vector.broadcast %265 : vector<16x1xf32> to vector<16x32xf32>
    %274 = arith.subf %257, %273 : vector<16x32xf32>
    %cst_157 = arith.constant 9.99999974E-6 : f32
    %275 = vector.broadcast %cst_157 : f32 to vector<16x1xf32>
    %276 = arith.addf %272, %275 : vector<16x1xf32>
    %277 = math.rsqrt %276 : vector<16x1xf32>
    %278 = vector.broadcast %277 : vector<16x1xf32> to vector<16x32xf32>
    %279 = arith.mulf %274, %278 : vector<16x32xf32>
    %280 = vector.broadcast %259 : vector<1x32xf32> to vector<16x32xf32>
    %281 = arith.mulf %279, %280 : vector<16x32xf32>
    %282 = vector.broadcast %261 : vector<1x32xf32> to vector<16x32xf32>
    %283 = arith.addf %281, %282 : vector<16x32xf32>
    %c5_158 = arith.constant 5 : index
    %c0_159 = arith.constant 0 : index
    %c0_160 = arith.constant 0 : index
    %284 = vector.load %arg8[%c5_158, %c0_159, %c0_160] : memref<8x32x32xf32, #tpu.memory_space<vmem>>, vector<1x32x32xf32>
    %285 = vector.shape_cast %284 : vector<1x32x32xf32> to vector<32x32xf32>
    %cst_161 = arith.constant dense<0.000000e+00> : vector<96x32xf32>
    %286 = tpu.matmul %1, %285, %cst_161 {dimension_numbers = #tpu.dot_dimension_numbers<[1], [0], [0], [1], [0, 0, 1, 1], [], []>} : vector<96x32xf32>, vector<32x32xf32>, vector<96x32xf32> -> vector<96x32xf32>
    %c5_162 = arith.constant 5 : index
    %c0_163 = arith.constant 0 : index
    %c0_164 = arith.constant 0 : index
    %287 = vector.load %arg9[%c5_162, %c0_163, %c0_164] : memref<8x1x32xf32, #tpu.memory_space<vmem>>, vector<1x1x32xf32>
    %288 = vector.shape_cast %287 : vector<1x1x32xf32> to vector<1x32xf32>
    %289 = vector.broadcast %288 : vector<1x32xf32> to vector<96x32xf32>
    %290 = arith.addf %286, %289 : vector<96x32xf32>
    %c6_165 = arith.constant 6 : index
    %c0_166 = arith.constant 0 : index
    %c0_167 = arith.constant 0 : index
    %291 = vector.load %arg8[%c6_165, %c0_166, %c0_167] : memref<8x32x32xf32, #tpu.memory_space<vmem>>, vector<1x32x32xf32>
    %292 = vector.shape_cast %291 : vector<1x32x32xf32> to vector<32x32xf32>
    %cst_168 = arith.constant dense<0.000000e+00> : vector<96x32xf32>
    %293 = tpu.matmul %1, %292, %cst_168 {dimension_numbers = #tpu.dot_dimension_numbers<[1], [0], [0], [1], [0, 0, 1, 1], [], []>} : vector<96x32xf32>, vector<32x32xf32>, vector<96x32xf32> -> vector<96x32xf32>
    %c6_169 = arith.constant 6 : index
    %c0_170 = arith.constant 0 : index
    %c0_171 = arith.constant 0 : index
    %294 = vector.load %arg9[%c6_169, %c0_170, %c0_171] : memref<8x1x32xf32, #tpu.memory_space<vmem>>, vector<1x1x32xf32>
    %295 = vector.shape_cast %294 : vector<1x1x32xf32> to vector<1x32xf32>
    %296 = vector.broadcast %295 : vector<1x32xf32> to vector<96x32xf32>
    %297 = arith.addf %293, %296 : vector<96x32xf32>
    %298 = vector.shape_cast %290 : vector<96x32xf32> to vector<2x48x32xf32>
    %299 = vector.shape_cast %4 : vector<48x32xf32> to vector<1x48x32xf32>
    %300 = vector.broadcast %299 : vector<1x48x32xf32> to vector<2x48x32xf32>
    %301 = arith.mulf %298, %300 : vector<2x48x32xf32>
    %302 = vector.shape_cast %297 : vector<96x32xf32> to vector<2x48x32xf32>
    %303 = vector.shape_cast %4 : vector<48x32xf32> to vector<1x48x32xf32>
    %304 = vector.broadcast %303 : vector<1x48x32xf32> to vector<2x48x32xf32>
    %305 = arith.mulf %302, %304 : vector<2x48x32xf32>
    %c4_172 = arith.constant 4 : index
    %c0_173 = arith.constant 0 : index
    %c0_174 = arith.constant 0 : index
    %306 = vector.load %arg8[%c4_172, %c0_173, %c0_174] : memref<8x32x32xf32, #tpu.memory_space<vmem>>, vector<1x32x32xf32>
    %307 = vector.shape_cast %306 : vector<1x32x32xf32> to vector<32x32xf32>
    %c4_175 = arith.constant 4 : index
    %c0_176 = arith.constant 0 : index
    %c0_177 = arith.constant 0 : index
    %308 = vector.load %arg9[%c4_175, %c0_176, %c0_177] : memref<8x1x32xf32, #tpu.memory_space<vmem>>, vector<1x1x32xf32>
    %309 = vector.shape_cast %308 : vector<1x1x32xf32> to vector<1x32xf32>
    %c7_178 = arith.constant 7 : index
    %c0_179 = arith.constant 0 : index
    %c0_180 = arith.constant 0 : index
    %310 = vector.load %arg8[%c7_178, %c0_179, %c0_180] : memref<8x32x32xf32, #tpu.memory_space<vmem>>, vector<1x32x32xf32>
    %311 = vector.shape_cast %310 : vector<1x32x32xf32> to vector<32x32xf32>
    %c7_181 = arith.constant 7 : index
    %c0_182 = arith.constant 0 : index
    %c0_183 = arith.constant 0 : index
    %312 = vector.load %arg9[%c7_181, %c0_182, %c0_183] : memref<8x1x32xf32, #tpu.memory_space<vmem>>, vector<1x1x32xf32>
    %313 = vector.shape_cast %312 : vector<1x1x32xf32> to vector<1x32xf32>
    %cst_184 = arith.constant dense<0.000000e+00> : vector<16x32xf32>
    %314 = tpu.matmul %283, %307, %cst_184 {dimension_numbers = #tpu.dot_dimension_numbers<[1], [0], [0], [1], [0, 0, 1, 1], [], []>} : vector<16x32xf32>, vector<32x32xf32>, vector<16x32xf32> -> vector<16x32xf32>
    %315 = vector.broadcast %309 : vector<1x32xf32> to vector<16x32xf32>
    %316 = arith.addf %314, %315 : vector<16x32xf32>
    %317 = vector.shape_cast %316 : vector<16x32xf32> to vector<2x8x32xf32>
    "tpu.trace_start"() <{level = 10 : i32, message = "bqd,bed->bqe"}> : () -> ()
    %cst_185 = arith.constant dense<0.000000e+00> : vector<2x8x48xf32>
    %318 = tpu.matmul %317, %301, %cst_185 {dimension_numbers = #tpu.dot_dimension_numbers<[2], [2], [1], [1], [0, 0, 0, 1, 1, 1], [0], [0]>} : vector<2x8x32xf32>, vector<2x48x32xf32>, vector<2x8x48xf32> -> vector<2x8x48xf32>
    "tpu.trace_stop"() : () -> ()
    %cst_186 = arith.constant dense<0xFF800000> : vector<2x8xf32>
    %319 = vector.multi_reduction <maximumf>, %318, %cst_186 [2] : vector<2x8x48xf32> to vector<2x8xf32>
    %320 = vector.shape_cast %319 : vector<2x8xf32> to vector<2x8x1xf32>
    %321 = vector.broadcast %320 : vector<2x8x1xf32> to vector<2x8x48xf32>
    %322 = arith.subf %318, %321 : vector<2x8x48xf32>
    %323 = math.exp %322 : vector<2x8x48xf32>
    %324 = vector.shape_cast %323 : vector<2x8x48xf32> to vector<16x48xf32>
    %cst_187 = arith.constant dense<0.000000e+00> : vector<16x48xf32>
    %325 = tpu.matmul %324, %5, %cst_187 {dimension_numbers = #tpu.dot_dimension_numbers<[1], [0], [0], [1], [0, 0, 1, 1], [], []>} : vector<16x48xf32>, vector<48x48xf32>, vector<16x48xf32> -> vector<16x48xf32>
    %326 = tpu.reciprocal %325 {approx = true} : vector<16x48xf32> -> vector<16x48xf32>
    %327 = arith.mulf %324, %326 : vector<16x48xf32>
    %328 = vector.shape_cast %327 : vector<16x48xf32> to vector<2x8x48xf32>
    "tpu.trace_start"() <{level = 10 : i32, message = "bqe,bed->bqd"}> : () -> ()
    %cst_188 = arith.constant dense<0.000000e+00> : vector<2x8x32xf32>
    %329 = tpu.matmul %328, %305, %cst_188 {dimension_numbers = #tpu.dot_dimension_numbers<[2], [1], [1], [2], [0, 0, 0, 1, 1, 2], [0], [0]>} : vector<2x8x48xf32>, vector<2x48x32xf32>, vector<2x8x32xf32> -> vector<2x8x32xf32>
    "tpu.trace_stop"() : () -> ()
    %330 = vector.shape_cast %329 : vector<2x8x32xf32> to vector<16x32xf32>
    %cst_189 = arith.constant dense<0.000000e+00> : vector<16x32xf32>
    %331 = tpu.matmul %330, %311, %cst_189 {dimension_numbers = #tpu.dot_dimension_numbers<[1], [0], [0], [1], [0, 0, 1, 1], [], []>} : vector<16x32xf32>, vector<32x32xf32>, vector<16x32xf32> -> vector<16x32xf32>
    %332 = vector.broadcast %313 : vector<1x32xf32> to vector<16x32xf32>
    %333 = arith.addf %331, %332 : vector<16x32xf32>
    %334 = arith.addf %283, %333 : vector<16x32xf32>
    %c4_190 = arith.constant 4 : index
    %c0_191 = arith.constant 0 : index
    %c0_192 = arith.constant 0 : index
    %335 = vector.load %arg14[%c4_190, %c0_191, %c0_192] : memref<6x1x32xf32, #tpu.memory_space<vmem>>, vector<1x1x32xf32>
    %336 = vector.shape_cast %335 : vector<1x1x32xf32> to vector<1x32xf32>
    %c4_193 = arith.constant 4 : index
    %c0_194 = arith.constant 0 : index
    %c0_195 = arith.constant 0 : index
    %337 = vector.load %arg15[%c4_193, %c0_194, %c0_195] : memref<6x1x32xf32, #tpu.memory_space<vmem>>, vector<1x1x32xf32>
    %338 = vector.shape_cast %337 : vector<1x1x32xf32> to vector<1x32xf32>
    %cst_196 = arith.constant dense<0.000000e+00> : vector<16xf32>
    %339 = vector.multi_reduction <add>, %334, %cst_196 [1] : vector<16x32xf32> to vector<16xf32>
    %340 = vector.shape_cast %339 : vector<16xf32> to vector<16x1xf32>
    %cst_197 = arith.constant 3.200000e+01 : f32
    %341 = vector.broadcast %cst_197 : f32 to vector<16x1xf32>
    %342 = arith.divf %340, %341 : vector<16x1xf32>
    %343 = arith.mulf %334, %334 : vector<16x32xf32>
    %cst_198 = arith.constant dense<0.000000e+00> : vector<16xf32>
    %344 = vector.multi_reduction <add>, %343, %cst_198 [1] : vector<16x32xf32> to vector<16xf32>
    %345 = vector.shape_cast %344 : vector<16xf32> to vector<16x1xf32>
    %cst_199 = arith.constant 3.200000e+01 : f32
    %346 = vector.broadcast %cst_199 : f32 to vector<16x1xf32>
    %347 = arith.divf %345, %346 : vector<16x1xf32>
    %348 = arith.mulf %342, %342 : vector<16x1xf32>
    %349 = arith.subf %347, %348 : vector<16x1xf32>
    %350 = vector.broadcast %342 : vector<16x1xf32> to vector<16x32xf32>
    %351 = arith.subf %334, %350 : vector<16x32xf32>
    %cst_200 = arith.constant 9.99999974E-6 : f32
    %352 = vector.broadcast %cst_200 : f32 to vector<16x1xf32>
    %353 = arith.addf %349, %352 : vector<16x1xf32>
    %354 = math.rsqrt %353 : vector<16x1xf32>
    %355 = vector.broadcast %354 : vector<16x1xf32> to vector<16x32xf32>
    %356 = arith.mulf %351, %355 : vector<16x32xf32>
    %357 = vector.broadcast %336 : vector<1x32xf32> to vector<16x32xf32>
    %358 = arith.mulf %356, %357 : vector<16x32xf32>
    %359 = vector.broadcast %338 : vector<1x32xf32> to vector<16x32xf32>
    %360 = arith.addf %358, %359 : vector<16x32xf32>
    %c1_201 = arith.constant 1 : index
    %c0_202 = arith.constant 0 : index
    %c0_203 = arith.constant 0 : index
    %361 = vector.load %arg10[%c1_201, %c0_202, %c0_203] : memref<2x32x64xf32, #tpu.memory_space<vmem>>, vector<1x32x64xf32>
    %362 = vector.shape_cast %361 : vector<1x32x64xf32> to vector<32x64xf32>
    %cst_204 = arith.constant dense<0.000000e+00> : vector<16x64xf32>
    %363 = tpu.matmul %360, %362, %cst_204 {dimension_numbers = #tpu.dot_dimension_numbers<[1], [0], [0], [1], [0, 0, 1, 1], [], []>} : vector<16x32xf32>, vector<32x64xf32>, vector<16x64xf32> -> vector<16x64xf32>
    %c1_205 = arith.constant 1 : index
    %c0_206 = arith.constant 0 : index
    %c0_207 = arith.constant 0 : index
    %364 = vector.load %arg11[%c1_205, %c0_206, %c0_207] : memref<2x1x64xf32, #tpu.memory_space<vmem>>, vector<1x1x64xf32>
    %365 = vector.shape_cast %364 : vector<1x1x64xf32> to vector<1x64xf32>
    %366 = vector.broadcast %365 : vector<1x64xf32> to vector<16x64xf32>
    %367 = arith.addf %363, %366 : vector<16x64xf32>
    %cst_208 = arith.constant 0.000000e+00 : f32
    %368 = vector.broadcast %cst_208 : f32 to vector<16x64xf32>
    %369 = arith.maximumf %367, %368 : vector<16x64xf32>
    %c1_209 = arith.constant 1 : index
    %c0_210 = arith.constant 0 : index
    %c0_211 = arith.constant 0 : index
    %370 = vector.load %arg12[%c1_209, %c0_210, %c0_211] : memref<2x64x32xf32, #tpu.memory_space<vmem>>, vector<1x64x32xf32>
    %371 = vector.shape_cast %370 : vector<1x64x32xf32> to vector<64x32xf32>
    %cst_212 = arith.constant dense<0.000000e+00> : vector<16x32xf32>
    %372 = tpu.matmul %369, %371, %cst_212 {dimension_numbers = #tpu.dot_dimension_numbers<[1], [0], [0], [1], [0, 0, 1, 1], [], []>} : vector<16x64xf32>, vector<64x32xf32>, vector<16x32xf32> -> vector<16x32xf32>
    %c1_213 = arith.constant 1 : index
    %c0_214 = arith.constant 0 : index
    %c0_215 = arith.constant 0 : index
    %373 = vector.load %arg13[%c1_213, %c0_214, %c0_215] : memref<2x1x32xf32, #tpu.memory_space<vmem>>, vector<1x1x32xf32>
    %374 = vector.shape_cast %373 : vector<1x1x32xf32> to vector<1x32xf32>
    %375 = vector.broadcast %374 : vector<1x32xf32> to vector<16x32xf32>
    %376 = arith.addf %372, %375 : vector<16x32xf32>
    %377 = arith.addf %360, %376 : vector<16x32xf32>
    %c5_216 = arith.constant 5 : index
    %c0_217 = arith.constant 0 : index
    %c0_218 = arith.constant 0 : index
    %378 = vector.load %arg14[%c5_216, %c0_217, %c0_218] : memref<6x1x32xf32, #tpu.memory_space<vmem>>, vector<1x1x32xf32>
    %379 = vector.shape_cast %378 : vector<1x1x32xf32> to vector<1x32xf32>
    %c5_219 = arith.constant 5 : index
    %c0_220 = arith.constant 0 : index
    %c0_221 = arith.constant 0 : index
    %380 = vector.load %arg15[%c5_219, %c0_220, %c0_221] : memref<6x1x32xf32, #tpu.memory_space<vmem>>, vector<1x1x32xf32>
    %381 = vector.shape_cast %380 : vector<1x1x32xf32> to vector<1x32xf32>
    %cst_222 = arith.constant dense<0.000000e+00> : vector<16xf32>
    %382 = vector.multi_reduction <add>, %377, %cst_222 [1] : vector<16x32xf32> to vector<16xf32>
    %383 = vector.shape_cast %382 : vector<16xf32> to vector<16x1xf32>
    %cst_223 = arith.constant 3.200000e+01 : f32
    %384 = vector.broadcast %cst_223 : f32 to vector<16x1xf32>
    %385 = arith.divf %383, %384 : vector<16x1xf32>
    %386 = arith.mulf %377, %377 : vector<16x32xf32>
    %cst_224 = arith.constant dense<0.000000e+00> : vector<16xf32>
    %387 = vector.multi_reduction <add>, %386, %cst_224 [1] : vector<16x32xf32> to vector<16xf32>
    %388 = vector.shape_cast %387 : vector<16xf32> to vector<16x1xf32>
    %cst_225 = arith.constant 3.200000e+01 : f32
    %389 = vector.broadcast %cst_225 : f32 to vector<16x1xf32>
    %390 = arith.divf %388, %389 : vector<16x1xf32>
    %391 = arith.mulf %385, %385 : vector<16x1xf32>
    %392 = arith.subf %390, %391 : vector<16x1xf32>
    %393 = vector.broadcast %385 : vector<16x1xf32> to vector<16x32xf32>
    %394 = arith.subf %377, %393 : vector<16x32xf32>
    %cst_226 = arith.constant 9.99999974E-6 : f32
    %395 = vector.broadcast %cst_226 : f32 to vector<16x1xf32>
    %396 = arith.addf %392, %395 : vector<16x1xf32>
    %397 = math.rsqrt %396 : vector<16x1xf32>
    %398 = vector.broadcast %397 : vector<16x1xf32> to vector<16x32xf32>
    %399 = arith.mulf %394, %398 : vector<16x32xf32>
    %400 = vector.broadcast %379 : vector<1x32xf32> to vector<16x32xf32>
    %401 = arith.mulf %399, %400 : vector<16x32xf32>
    %402 = vector.broadcast %381 : vector<1x32xf32> to vector<16x32xf32>
    %403 = arith.addf %401, %402 : vector<16x32xf32>
    %c0_227 = arith.constant 0 : index
    %c0_228 = arith.constant 0 : index
    %404 = vector.load %arg16[%c0_227, %c0_228] : memref<16x32xf32, #tpu.memory_space<vmem>>, vector<16x32xf32>
    tpu.vector_store %arg16[%c0_227, %c0_228], %403 {strides = array<i32>} : memref<16x32xf32, #tpu.memory_space<vmem>>, vector<16x32xf32>,
    return
  }
}

</mosaic_0001>

<bundles_post_ra>
// kernel: tpu_custom_call.1
= control target key start
LH: loop header
LB: loop body
LE: loop exit
PB: predicated region body
PF: predicated region fallthrough
CT: control target
= control target key end

     0   :  { %s7135_s0 = inlined_call_operand.hbm [shape: f32[16,32], index: 0, kind: input, shape index: {}]   ;;  %s7136_s1 = inlined_call_operand.vmem [shape: f32[96,32], index: 1, kind: input, shape index: {}]   ;;  %s7137_s2 = inlined_call_operand.vmem [shape: f32[32,32], index: 2, kind: input, shape index: {}]   ;;  %s7138_s3 = inlined_call_operand.hbm [shape: f32[32,32], index: 3, kind: input, shape index: {}]   ;;  %s7139_s4 = inlined_call_operand.vmem [shape: f32[48,32], index: 4, kind: input, shape index: {}]   ;;  %s7140_s5 = inlined_call_operand.hbm [shape: f32[48,48], index: 5, kind: input, shape index: {}]   ;;  %s7141_s6 = inlined_call_operand.vmem [shape: f32[8,32,32], index: 6, kind: input, shape index: {}]   ;;  %s7142_s7 = inlined_call_operand.vmem [shape: f32[8,1,32], index: 7, kind: input, shape index: {}]   ;;  %s7143_s8 = inlined_call_operand.hbm [shape: f32[8,32,32], index: 8, kind: input, shape index: {}]   ;;  %s7144_s9 = inlined_call_operand.hbm [shape: f32[8,1,32], index: 9, kind: input, shape index: {}]   ;;  %s7145_s10 = inlined_call_operand.vmem [shape: f32[2,32,64], index: 10, kind: input, shape index: {}]   ;;  %s7146_s11 = inlined_call_operand.hbm [shape: f32[2,1,64], index: 11, kind: input, shape index: {}]   ;;  %s7147_s12 = inlined_call_operand.vmem [shape: f32[2,64,32], index: 12, kind: input, shape index: {}]   ;;  %s7148_s13 = inlined_call_operand.vmem [shape: f32[2,1,32], index: 13, kind: input, shape index: {}]   ;;  %s7149_s14 = inlined_call_operand.vmem [shape: f32[6,1,32], index: 14, kind: input, shape index: {}]   ;;  %s7150_s15 = inlined_call_operand.vmem [shape: f32[6,1,32], index: 15, kind: input, shape index: {}]   ;;  %s7151_s16 = inlined_call_operand.hbm [shape: f32[16,32], index: 16, kind: output, shape index: {}]  }
   0x1   :  { %7154 = sst [smem:[#allocation19_spill]] %s7135_s0 }
   0x2   :  { %7155 = sst [smem:[#allocation20_spill]] %s7151_s16 }
   0x3   :  { %21 = vsyncpa [#allocation3], 0 }
   0x4   :  { %22 = vsyncpa [#allocation6], 0 }
   0x5   :  { %23 = vsyncpa [#allocation9], 0 }
   0x6   :  { %24 = vsyncpa [#allocation12], 0 }
   0x7   :  { %25 = vsyncpa [#allocation4], 0  ;;  %s6028_s21 = smov [#allocation5]   ;;  %s6029_s23 = smov [#allocation8]  }
   0x8   :  { %s47_s22 = sshll.u32 %s6028_s21, 4  ;;  %s77_s24 = sshll.u32 %s6029_s23, 4  ;;  %s48_s22 = int_to_ptr.vmem [resolvable:$true] %s47_s22  ;;  %s6127_s24 = int_to_ptr.vmem [resolvable:$true] %s77_s24 }
   0x9   :  { %s5864_s27 = scalar_lea.hbm %s7138_s3, 512 }
   0xa   :  { %p5865_p0 = scmp.ne.s32.totalorder %s7138_s3, %s5864_s27  ;;  %p5868_p1 = scmp.lt.u32.totalorder %s5864_s27, %s7138_s3 }
   0xc   :  { %p5870_p2 = pnand %p5868_p1, %p5865_p0 }
   0xe   :  { %5873 = shalt.err (!%p5870_p2)
}
   0xf   :  { %s5874_s17 = scalar_lea.vmem %s48_s22, 512  ;;  %p5879_p4 = scmp.lt.s32.totalorder %s48_s22, %s48_s22 }
  0x10   :  { %p5875_p3 = scmp.ne.s32.totalorder %s48_s22, %s5874_s17  ;;  %p5880_p5 = scmp.lt.s32.totalorder %s5874_s17, %s5874_s17 }
  0x12   :  { %p5881_p6 = por %p5880_p5, %p5879_p4 }
  0x14   :  { %p5882_p7 = pnand %p5881_p6, %p5875_p3 }
  0x16   :  { %5885 = shalt.err (!%p5882_p7)
}
  0x17   :  { %s6030_s18 = smov 128   ;;  %s6031_s19 = smov 8  }
  0x18   :  { %53 = dma.hbm_to_vmem [thread:$0]  %s7138_s3, 512, %s48_s22, [#allocation6], %s6030_s18, %s6030_s18, %s6031_s19  }
  0x19   :  { %s5886_s26 = scalar_lea.hbm %s7143_s8, 4096 }
  0x1a   :  { %p5887_p8 = scmp.ne.s32.totalorder %s7143_s8, %s5886_s26  ;;  %p5890_p9 = scmp.lt.u32.totalorder %s5886_s26, %s7143_s8 }
  0x1c   :  { %p5892_p10 = pnand %p5890_p9, %p5887_p8 }
  0x1e   :  { %5895 = shalt.err (!%p5892_p10)
}
  0x1f   :  { %s5896_s0 = scalar_lea.vmem %s6127_s24, 4096  ;;  %p5901_p12 = scmp.lt.s32.totalorder %s6127_s24, %s6127_s24 }
  0x20   :  { %p5897_p11 = scmp.ne.s32.totalorder %s6127_s24, %s5896_s0  ;;  %p5902_p13 = scmp.lt.s32.totalorder %s5896_s0, %s5896_s0 }
  0x22   :  { %p5903_p0 = por %p5902_p13, %p5901_p12 }
  0x24   :  { %p5904_p1 = pnand %p5903_p0, %p5897_p11 }
  0x26   :  { %5907 = shalt.err (!%p5904_p1)
}
  0x27   :  { %83 = dma.hbm_to_vmem [thread:$0]  %s7143_s8, 4096, %s6127_s24, [#allocation9], %s6030_s18, %s6030_s18, %s6031_s19  }
  0x28   :  { %s6032_s17 = smov [#allocation2]   ;;  %s6033_s21 = smov [#allocation7]  }
  0x29   :  { %s31_s20 = sshll.u32 %s6032_s17, 4  ;;  %s61_s23 = sshll.u32 %s6033_s21, 4  ;;  %s32_s20 = int_to_ptr.vmem [resolvable:$true] %s31_s20  ;;  %s6164_s23 = int_to_ptr.vmem [resolvable:$true] %s61_s23 }
  0x2a   :  { %s7156_s27 = sld [smem:[#allocation19_spill]] }
  0x30   :  { %s5908_s28 = scalar_lea.hbm %s7156_s27, 256 }
  0x31   :  { %p5909_p2 = scmp.ne.s32.totalorder %s7156_s27, %s5908_s28  ;;  %p5912_p3 = scmp.lt.u32.totalorder %s5908_s28, %s7156_s27 }
  0x33   :  { %p5914_p4 = pnand %p5912_p3, %p5909_p2 }
  0x35   :  { %5917 = shalt.err (!%p5914_p4)
}
  0x36   :  { %s5918_s8 = scalar_lea.vmem %s32_s20, 256  ;;  %p5923_p6 = scmp.lt.s32.totalorder %s32_s20, %s32_s20 }
  0x37   :  { %p5919_p5 = scmp.ne.s32.totalorder %s32_s20, %s5918_s8  ;;  %p5924_p7 = scmp.lt.s32.totalorder %s5918_s8, %s5918_s8 }
  0x39   :  { %p5925_p8 = por %p5924_p7, %p5923_p6 }
  0x3b   :  { %p5926_p9 = pnand %p5925_p8, %p5919_p5 }
  0x3d   :  { %5929 = shalt.err (!%p5926_p9)
}
  0x3e   :  { %37 = dma.hbm_to_vmem [thread:$0]  %s7156_s27, 256, %s32_s20, [#allocation3], %s6030_s18, %s6030_s18, %s6031_s19  }
  0x3f   :  { %s5930_s16 = scalar_lea.hbm %s7140_s5, 768 }
  0x40   :  { %p5931_p10 = scmp.ne.s32.totalorder %s7140_s5, %s5930_s16  ;;  %p5934_p11 = scmp.lt.u32.totalorder %s5930_s16, %s7140_s5 }
  0x42   :  { %p5936_p12 = pnand %p5934_p11, %p5931_p10 }
  0x44   :  { %5939 = shalt.err (!%p5936_p12)
}
  0x45   :  { %s5940_s29 = scalar_lea.vmem %s6164_s23, 768  ;;  %p5945_p0 = scmp.lt.s32.totalorder %s6164_s23, %s6164_s23 }
  0x46   :  { %p5941_p13 = scmp.ne.s32.totalorder %s6164_s23, %s5940_s29  ;;  %p5946_p1 = scmp.lt.s32.totalorder %s5940_s29, %s5940_s29 }
  0x48   :  { %p5947_p2 = por %p5946_p1, %p5945_p0 }
  0x4a   :  { %p5948_p3 = pnand %p5947_p2, %p5941_p13 }
  0x4c   :  { %5951 = shalt.err (!%p5948_p3)
}
  0x4d   :  { %67 = dma.hbm_to_vmem [thread:$0]  %s7140_s5, 768, %s6164_s23, [#allocation6], %s6030_s18, %s6030_s18, %s6031_s19  }
  0x4e   :  { %s6034_s30 = smov [#allocation10]   ;;  %s5952_s3 = scalar_lea.hbm %s7144_s9, 128 }
  0x4f   :  { %s89_s0 = sshll.u32 %s6034_s30, 4  ;;  %p5953_p4 = scmp.ne.s32.totalorder %s7144_s9, %s5952_s3  ;;  %s90_s0 = int_to_ptr.vmem [resolvable:$true] %s89_s0 }
  0x50   :  { %p5956_p5 = scmp.lt.u32.totalorder %s5952_s3, %s7144_s9 }
  0x52   :  { %p5958_p6 = pnand %p5956_p5, %p5953_p4 }
  0x54   :  { %5961 = shalt.err (!%p5958_p6)
}
  0x55   :  { %s5962_s25 = scalar_lea.vmem %s90_s0, 128  ;;  %p5967_p8 = scmp.lt.s32.totalorder %s90_s0, %s90_s0 }
  0x56   :  { %p5963_p7 = scmp.ne.s32.totalorder %s90_s0, %s5962_s25  ;;  %p5968_p9 = scmp.lt.s32.totalorder %s5962_s25, %s5962_s25 }
  0x58   :  { %p5969_p10 = por %p5968_p9, %p5967_p8 }
  0x5a   :  { %p5970_p11 = pnand %p5969_p10, %p5963_p7 }
  0x5c   :  { %5973 = shalt.err (!%p5970_p11)
}
  0x5d   :  { %s6035_s5 = smov 16   ;;  %s6036_s23 = smov 1  }
  0x5e   :  { %95 = dma.hbm_to_vmem [thread:$0]  %s7144_s9, 128, %s90_s0, [#allocation9], %s6035_s5, %s6035_s5, %s6036_s23  }
  0x5f   :  { %s6037_s29 = smov [#allocation11]   ;;  %s5974_s8 = scalar_lea.hbm %s7146_s11, 32 }
  0x60   :  { %s103_s20 = sshll.u32 %s6037_s29, 4  ;;  %p5975_p12 = scmp.ne.s32.totalorder %s7146_s11, %s5974_s8  ;;  %s104_s20 = int_to_ptr.vmem [resolvable:$true] %s103_s20 }
  0x61   :  { %p5978_p13 = scmp.lt.u32.totalorder %s5974_s8, %s7146_s11 }
  0x63   :  { %p5980_p0 = pnand %p5978_p13, %p5975_p12 }
  0x65   :  { %5983 = shalt.err (!%p5980_p0)
}
  0x66   :  { %s5984_s16 = scalar_lea.vmem %s104_s20, 32  ;;  %p5989_p2 = scmp.lt.s32.totalorder %s104_s20, %s104_s20 }
  0x67   :  { %p5985_p1 = scmp.ne.s32.totalorder %s104_s20, %s5984_s16  ;;  %p5990_p3 = scmp.lt.s32.totalorder %s5984_s16, %s5984_s16 }
  0x69   :  { %p5991_p4 = por %p5990_p3, %p5989_p2 }
  0x6b   :  { %p5992_p5 = pnand %p5991_p4, %p5985_p1 }
  0x6d   :  { %5995 = shalt.err (!%p5992_p5)
}
  0x6e   :  { %109 = dma.hbm_to_vmem [thread:$0]  %s7146_s11, 32, %s104_s20, [#allocation12], %s6035_s5, %s6035_s5, %s6036_s23  }
  0x6f   :  { %6018 = dma.done.wait [#allocation3], 256  }
  0x70   :  { %6019 = vsyncadd [#allocation3], 4294967040 }
  0x71   :  { %6020 = dma.done.wait [#allocation6], 1280  }
  0x72   :  { %6021 = vsyncadd [#allocation6], 4294966016 }
  0x73   :  { %6022 = dma.done.wait [#allocation9], 4224  }
  0x74   :  { %6023 = vsyncadd [#allocation9], 4294963072 }
  0x75   :  { %6024 = dma.done.wait [#allocation12], 32  }
  0x76   :  { %6025 = vsyncadd [#allocation12], 4294967264  ;;  %vm183_vm0 = vcmask 261120   ;;  %v4334_v0 = vld [vmem:[%s7141_s6 + $0x20] sm:$0xff]  ;;  %v4335_v1 = vld [vmem:[%s7141_s6 + $0x28] sm:$0xff]  ;;  %v6038_v20 = vmov 0.0|0.0  }
  0x77   :  { %v4336_v2 = vld [vmem:[%s7141_s6 + $0x30] sm:$0xff]  ;;  %v5416_v3 = vpack.c.bf16 %v4335_v1, %v4334_v0  ;;  %v4337_v4 = vld [vmem:[%s7141_s6 + $0x38] sm:$0xff]  ;;  %v6237_v5 = vld [vmem:[#allocation2] sm:$0xff]  ;;  %vm6039_vm1 = vmmov 0   ;;  %v6040_v21 = vmov 0.0   ;;  %vm1630_vm3 = vcmask 392192  }
  0x78   :  { %v5420_v6 = vpack.c.bf16 %v4337_v4, %v4336_v2  ;;  %4868 = vmatprep.mubr.msk.f32.mxu0 %vm183_vm0, %v6237_v5  ;;  %v369_v7 = vld [vmem:[%s7141_s6] sm:$0xff]  ;;  %v370_v8 = vld [vmem:[%s7141_s6 + $0x8] sm:$0xff]  ;;  %4879 = vmatprep.mubr.msk.f32.mxu1 %vm183_vm0, %v6237_v5  ;;  %v4344_v12 = vld [vmem:[%s7141_s6 + $0x50] sm:$0xff]  ;;  %vm2122_vm4 = vcmask 523264   ;;  %s6041_s0 = smov [#allocation13]  }
  0x79   :  { %5417 = vmatprep.subr.bf16.mxu0 %v5416_v3  ;;  %v4342_v9 = vld [vmem:[%s7141_s6 + $0x40] sm:$0xff]  ;;  %v4343_v10 = vld [vmem:[%s7141_s6 + $0x48] sm:$0xff]  ;;  %v4345_v13 = vld [vmem:[%s7141_s6 + $0x58] sm:$0xff]  ;;  %v5432_v14 = vpack.c.bf16 %v370_v8, %v369_v7 }
  0x7a   :  { %5419 = vmatpush3.bf16.msra.mxu0 %v5416_v3  ;;  %v5424_v11 = vpack.c.bf16 %v4343_v10, %v4342_v9  ;;  %v5428_v15 = vpack.c.bf16 %v4345_v13, %v4344_v12  ;;  %v371_v16 = vld [vmem:[%s7141_s6 + $0x10] sm:$0xff]  ;;  %v372_v17 = vld [vmem:[%s7141_s6 + $0x18] sm:$0xff]  ;;  %v6267_v18 = vld [vmem:[#allocation2 + $0x8] sm:$0xff] }
  0x7b   :  { %5421 = vmatprep.subr.bf16.mxu0 %v5420_v6  ;;  %v5436_v19 = vpack.c.bf16 %v372_v17, %v371_v16  ;;  %v4339_v22 = vld [vmem:[%s7142_s7 + $0x1] ss:$0 sm:$0xff]  ;;  %v6294_v24 = vld [vmem:[%s7137_s2 + $0x8] sm:$0xff]  ;;  %vm6302_vm2 = vmpackc.low %vm183_vm0, %vm183_vm0 }
  0x7c   :  { %5425 = vmatprep.subr.bf16.mxu1 %v5424_v11  ;;  %v6289_v23 = vld [vmem:[%s7137_s2] sm:$0xff]  ;;  %v6314_v39 = vld [vmem:[%s7137_s2 + $0x10] sm:$0xff]  ;;  %v6319_v40 = vld [vmem:[%s7137_s2 + $0x18] sm:$0xff] }
  0x7d   :  { %5427 = vmatpush3.bf16.msra.mxu1 %v5424_v11  ;;  %v4347_v35 = vld [vmem:[%s7142_s7 + $0x2] ss:$0 sm:$0xff]  ;;  %v4355_v51 = vld [vmem:[%s7142_s7] ss:$0 sm:$0xff]  ;;  %v154_v2 = vld [vmem:[#allocation5] sm:$0xff] }
  0x7e   :  { %5423 = vmatpush3.bf16.msra.mxu0 %v5420_v6  ;;  %5429 = vmatprep.subr.bf16.mxu1 %v5428_v15  ;;  %v155_v3 = vld [vmem:[#allocation5 + $0x8] sm:$0xff]  ;;  %v156_v6 = vld [vmem:[#allocation5 + $0x10] sm:$0xff]  ;;  %v157_v7 = vld [vmem:[#allocation5 + $0x18] sm:$0xff] }
  0x7f   :  { %5433 = vmatprep.subr.bf16.mxu0 %v5432_v14  ;;  %v6350_v4 = vpack.c.bf16 %v155_v3, %v154_v2  ;;  %v6352_v8 = vpack.c.bf16 %v157_v7, %v156_v6  ;;  %v144_v2 = vld [vmem:[%s7136_s1 + $0x30] sm:$0xff]  ;;  %v145_v3 = vld [vmem:[%s7136_s1 + $0x38] sm:$0xff]  ;;  %v146_v6 = vld [vmem:[%s7136_s1 + $0x40] sm:$0xff] }
  0x80   :  { %v147_v7 = vld [vmem:[%s7136_s1 + $0x48] sm:$0xff] }
  0x81   :  { %4869 = vmatmul.mubr.msk.f32.vlgmr.msra.gmra.mrb[0].mxu0 %vm183_vm0, %v6267_v18  ;;  %5431 = vmatpush3.bf16.msra.mxu1 %v5428_v15 }
  0x82   :  { %5435 = vmatpush3.bf16.msra.mxu0 %v5432_v14  ;;  %4890 = vmatprep.mubr.msk.f32.mxu0 %vm183_vm0, %v6237_v5 }
  0x83   :  { %5437 = vmatprep.subr.bf16.mxu0 %v5436_v19  ;;  %5440 = vmatprep.subr.bf16.mxu1 %v6038_v20 }
  0x84   :  { %4880 = vmatmul.mubr.msk.f32.vlgmr.msra.gmra.mrb[0].mxu1 %vm183_vm0, %v6267_v18 }
  0x85   :  { %4901 = vmatprep.mubr.msk.f32.mxu1 %vm6039_vm1, %v6040_v21 }
  0x86   :  { %5439 = vmatpush3.bf16.msra.mxu0 %v5436_v19 }
  0x87   :  { %5448 = vmatprep.subr.bf16.mxu0 %v6038_v20 }
  0x89   :  { %4891 = vmatmul.mubr.msk.f32.vlgmr.msra.gmra.mrb[2].mxu0 %vm183_vm0, %v6267_v18 }
  0x8a   :  { %4912 = vmatprep.mubr.msk.f32.mxu0 %vm6039_vm1, %v6040_v21 }
 0x154   :  { %v4870_v25 = vpop.f32.mrb[0].mxu0 }
 0x155   :  { %v262_v26 = vadd.f32 %v4870_v25, %v4339_v22  ;;  %v256_v27 = vpop.f32.mrb[1].mxu0 }
 0x156   :  { %v257_v28 = vadd.f32 %v4339_v22, %v256_v27  ;;  %v4351_v27 = vld [vmem:[%s7141_s6 + $0x68] sm:$0xff] }
 0x157   :  { %v357_v29 = vmul.f32 %v262_v26, %v6289_v23  ;;  %v358_v30 = vmul.f32 %v262_v26, %v6294_v24  ;;  %v4881_v31 = vpop.f32.mrb[0].mxu1  ;;  %v359_v43 = vmul.f32 %v262_v26, %v6314_v39  ;;  %v360_v44 = vmul.f32 %v262_v26, %v6319_v40 }
 0x158   :  { %v353_v32 = vmul.f32 %v257_v28, %v6289_v23  ;;  %v354_v33 = vmul.f32 %v257_v28, %v6294_v24  ;;  %v344_v36 = vpop.f32.mrb[1].mxu1  ;;  %v6309_v38 = vadd.f32 %v4881_v31, %v4347_v35  ;;  %v355_v46 = vmul.f32 %v257_v28, %v6314_v39  ;;  %v4352_v31 = vld [vmem:[%s7141_s6 + $0x70] sm:$0xff] }
 0x159   :  { %v5449_v37 = vpack.c.bf16 %v358_v30, %v357_v29  ;;  %v356_v47 = vmul.f32 %v257_v28, %v6319_v40  ;;  %v345_v48 = vadd.f32 %v4347_v35, %v344_v36  ;;  %v5453_v49 = vpack.c.bf16 %v360_v44, %v359_v43  ;;  %v1014_v43 = vld [vmem:[#allocation8 + $0x20] sm:$0xff]  ;;  %v1015_v44 = vld [vmem:[#allocation8 + $0x28] sm:$0xff] }
 0x15a   :  { %v5441_v41 = vpack.c.bf16 %v354_v33, %v353_v32  ;;  %v365_v16 = vmul.f32 %v6309_v38, %v6289_v23  ;;  %v366_v17 = vmul.f32 %v6309_v38, %v6294_v24  ;;  %v367_v22 = vmul.f32 %v6309_v38, %v6314_v39  ;;  %v4353_v32 = vld [vmem:[%s7141_s6 + $0x78] sm:$0xff] }
 0x15b   :  { %5451 = vmatpush3.bf16.xpose.msk.msra.mxu0 %vm6302_vm2, %v5449_v37  ;;  %v5445_v50 = vpack.c.bf16 %v356_v47, %v355_v46  ;;  %v361_v52 = vmul.f32 %v345_v48, %v6289_v23  ;;  %v362_v53 = vmul.f32 %v345_v48, %v6294_v24  ;;  %v363_v56 = vmul.f32 %v345_v48, %v6314_v39  ;;  %v4350_v24 = vld [vmem:[%s7141_s6 + $0x60] sm:$0xff]  ;;  %v1017_v47 = vld [vmem:[#allocation8 + $0x38] sm:$0xff] }
 0x15c   :  { %5443 = vmatpush3.bf16.xpose.msk.msra.mxu1 %vm6302_vm2, %v5441_v41  ;;  %5452 = vmatprep.subr.bf16.mxu0 %v6038_v20  ;;  %v4892_v42 = vpop.f32.mrb[2].mxu0  ;;  %v364_v57 = vmul.f32 %v345_v48, %v6319_v40  ;;  %v368_v25 = vmul.f32 %v6309_v38, %v6319_v40  ;;  %v5471_v26 = vpack.c.bf16 %v366_v17, %v365_v16  ;;  %v138_v48 = vld [vmem:[%s7136_s1] sm:$0xff] }
 0x15d   :  { %5444 = vmatprep.subr.bf16.mxu1 %v6038_v20  ;;  %v453_v45 = vpop.f32.mrb[3].mxu0  ;;  %v459_v54 = vadd.f32 %v4892_v42, %v4355_v51  ;;  %v5465_v58 = vpack.c.bf16 %v362_v53, %v361_v52  ;;  %v5476_v28 = vpack.c.bf16 %v4351_v27, %v4350_v24  ;;  %v5480_v38 = vpack.c.bf16 %v4353_v32, %v4352_v31  ;;  %v141_v52 = vld [vmem:[%s7136_s1 + $0x18] sm:$0xff]  ;;  %v142_v53 = vld [vmem:[%s7136_s1 + $0x20] sm:$0xff]  ;;  %v6476_v27 = vld [vmem:[%s7139_s4 + $0x8] sm:$0xff] }
 0x15e   :  { %v454_v55 = vadd.f32 %v4355_v51, %v453_v45  ;;  %v5468_v59 = vpack.c.bf16 %v364_v57, %v363_v56  ;;  %v5474_v23 = vpack.c.bf16 %v368_v25, %v367_v22  ;;  %v1016_v45 = vld [vmem:[#allocation8 + $0x30] sm:$0xff]  ;;  %v5484_v46 = vpack.c.bf16 %v1015_v44, %v1014_v43  ;;  %v1188_v17 = vld [vmem:[#allocation8 + $0x40] sm:$0xff] }
 0x15f   :  { %v140_v51 = vld [vmem:[%s7136_s1 + $0x10] sm:$0xff]  ;;  %v6471_v24 = vld [vmem:[#allocation10 + $0x1] ss:$0 sm:$0xff] }
 0x160   :  { %v1190_v22 = vld [vmem:[#allocation8 + $0x50] sm:$0xff] }
 0x163   :  { %5455 = vmatpush3.bf16.xpose.msk.msra.mxu0 %vm6302_vm2, %v5453_v49  ;;  %v5488_v49 = vpack.c.bf16 %v1017_v47, %v1016_v45  ;;  %v6506_v45 = vld [vmem:[%s7139_s4 + $0x28] sm:$0xff] }
 0x164   :  { %5447 = vmatpush3.bf16.xpose.msk.msra.mxu1 %vm6302_vm2, %v5445_v50  ;;  %5464 = vmatprep.subr.bf16.mxu0 %v6038_v20  ;;  %v139_v50 = vld [vmem:[%s7136_s1 + $0x8] sm:$0xff] }
 0x165   :  { %5457 = vmatprep.subr.bf16.mxu1 %v6350_v4 }
 0x16a   :  { %4913 = vmatmul.mubr.msk.f32.vlgmr.msra.gmra.mrb[4].mxu0 %vm183_vm0, %v459_v54  ;;  %v143_v54 = vld [vmem:[%s7136_s1 + $0x28] sm:$0xff] }
 0x16b   :  { %4902 = vmatmul.mubr.msk.f32.vlgmr.msra.gmra.mrb[2].mxu1 %vm183_vm0, %v454_v55  ;;  %5466 = vmatpush3.bf16.msra.mxu0 %v5465_v58  ;;  %v4372_v55 = vld [vmem:[%s7142_s7 + $0x3] ss:$0 sm:$0xff] }
 0x16c   :  { %5467 = vmatprep.subr.bf16.mxu0 %v6038_v20  ;;  %4934 = vmatprep.mubr.msk.f32.mxu0 %vm6039_vm1, %v6040_v21 }
 0x16d   :  { %5459 = vmatpush3.bf16.msra.mxu1 %v6350_v4 }
 0x16e   :  { %5461 = vmatprep.subr.bf16.mxu1 %v6352_v8 }
 0x16f   :  { %5469 = vmatpush3.bf16.msra.mxu0 %v5468_v59 }
 0x170   :  { %5477 = vmatprep.subr.bf16.mxu0 %v5476_v28 }
 0x171   :  { %5463 = vmatpush3.bf16.msra.mxu1 %v6352_v8 }
 0x172   :  { %5470 = vmatprep.subr.bf16.mxu1 %v6038_v20 }
 0x23d   :  { %v628_v60 = vpop.f32.mrb[4].mxu0 }
 0x23e   :  { %v543_v61 = vpop.f32.mrb[2].mxu1  ;;  %v4914_v62 = vpop.f32.mrb[5].mxu0  ;;  %v635_v1 = vsel %vm183_vm0, %v628_v60, -inf }
 0x23f   :  { %v4903_v63 = vpop.f32.mrb[3].mxu1  ;;  %v632_v0 = vsel %vm183_vm0, %v543_v61, -inf }
 0x240   :  { %633 = vmax.xlane.f32.xlu0 %v632_v0 }
 0x244   :  { %636 = vmax.xlane.f32.xlu0 %v635_v1 }
 0x2cd   :  { %v634_v9 = vpop.xlane.xlu0 %633 }
 0x2ce   :  { %v638_v10 = vsub.f32 %v543_v61, %v634_v9  ;;  %v148_v9 = vld [vmem:[%s7136_s1 + $0x50] sm:$0xff] }
 0x2d0   :  { %v640_v11 = vmul.f32 1.442695, %v638_v10  ;;  %v149_v10 = vld [vmem:[%s7136_s1 + $0x58] sm:$0xff] }
 0x2d1   :  { %v637_v12 = vpop.xlane.xlu0 %636 }
 0x2d2   :  { %5786 = vpow2.f32 %v640_v11  ;;  %v639_v13 = vsub.f32 %v628_v60, %v637_v12  ;;  %v1349_v11 = vld [vmem:[#allocation8] sm:$0xff]  ;;  %v1350_v12 = vld [vmem:[#allocation8 + $0x8] sm:$0xff] }
 0x2d4   :  { %v642_v14 = vmul.f32 1.442695, %v639_v13  ;;  %v5500_v13 = vpack.c.bf16 %v1350_v12, %v1349_v11 }
 0x2d6   :  { %5788 = vpow2.f32 %v642_v14  ;;  %v1351_v14 = vld [vmem:[#allocation8 + $0x10] sm:$0xff] }
 0x2dc   :  { %v5787_v15 = vpop.eup %5786 }
 0x2dd   :  { %4923 = vmatprep.mubr.msk.f32.mxu1 %vm183_vm0, %v5787_v15 }
 0x2e0   :  { %v5789_v19 = vpop.eup %5788 }
 0x2e1   :  { %4924 = vmatmul.mubr.msk.f32.vlgmr.msra.gmra.mrb[4].mxu1 %vm183_vm0, %v5789_v19 }
 0x2e2   :  { %5472 = vmatpush3.bf16.msra.mxu1 %v5471_v26  ;;  %4945 = vmatprep.mubr.msk.f32.mxu1 %vm6039_vm1, %v6040_v21  ;;  %v1191_v26 = vld [vmem:[#allocation8 + $0x58] sm:$0xff] }
 0x2e3   :  { %5473 = vmatprep.subr.bf16.mxu1 %v6038_v20 }
 0x2e6   :  { %5475 = vmatpush3.bf16.msra.mxu1 %v5474_v23  ;;  %v5496_v23 = vpack.c.bf16 %v1191_v26, %v1190_v22 }
 0x2e7   :  { %5485 = vmatprep.subr.bf16.mxu1 %v5484_v46 }
 0x3b4   :  { %v4925_v29 = vpop.f32.mrb[4].mxu1 }
 0x3b5   :  { %5790 = vrcp.f32 %v4925_v29  ;;  %v716_v30 = vpop.f32.mrb[5].mxu1 }
 0x3b6   :  { %5792 = vrcp.f32 %v716_v30  ;;  %v6482_v30 = vld [vmem:[%s7139_s4] sm:$0xff] }
 0x3bf   :  { %v5791_v33 = vpop.eup %5790 }
 0x3c0   :  { %v5793_v35 = vpop.eup %5792  ;;  %v728_v36 = vmul.f32 %v5791_v33, %v5789_v19  ;;  %v1189_v19 = vld [vmem:[#allocation8 + $0x48] sm:$0xff] }
 0x3c1   :  { %v727_v37 = vmul.f32 %v5793_v35, %v5787_v15  ;;  %v1352_v15 = vld [vmem:[#allocation8 + $0x18] sm:$0xff]  ;;  %v5492_v25 = vpack.c.bf16 %v1189_v19, %v1188_v17 }
 0x3c2   :  { %4946 = vmatmul.mubr.msk.f32.vlgmr.msra.gmra.mrb[6].mxu1 %vm183_vm0, %v728_v36  ;;  %v5504_v16 = vpack.c.bf16 %v1352_v15, %v1351_v14  ;;  %v6490_v36 = vld [vmem:[%s7139_s4 + $0x18] sm:$0xff]  ;;  %v4376_v14 = vld [vmem:[%s7150_s15] ss:$0 sm:$0xff] }
 0x3c3   :  { %4935 = vmatmul.mubr.msk.f32.vlgmr.msra.gmra.mrb[6].mxu0 %vm183_vm0, %v727_v37  ;;  %4967 = vmatprep.mubr.msk.f32.mxu1 %vm183_vm0, %v138_v48 }
 0x3c4   :  { %5479 = vmatpush3.bf16.msra.mxu0 %v5476_v28  ;;  %5487 = vmatpush3.bf16.msra.mxu1 %v5484_v46 }
 0x3c5   :  { %5481 = vmatprep.subr.bf16.mxu0 %v5480_v38  ;;  %5489 = vmatprep.subr.bf16.mxu1 %v5488_v49 }
 0x3c8   :  { %5483 = vmatpush3.bf16.msra.mxu0 %v5480_v38  ;;  %5491 = vmatpush3.bf16.msra.mxu1 %v5488_v49 }
 0x3c9   :  { %5501 = vmatprep.subr.bf16.mxu1 %v5500_v13  ;;  %5493 = vmatprep.subr.bf16.mxu0 %v5492_v25 }
 0x3cb   :  { %4968 = vmatmul.mubr.msk.f32.vlgmr.msra.gmra.mrb[8].mxu1 %vm183_vm0, %v139_v50 }
 0x3cc   :  { %4970 = vmatprep.mubr.msk.f32.mxu1 %vm183_vm0, %v140_v51  ;;  %5503 = vmatpush3.bf16.msra.mxu1 %v5500_v13 }
 0x3cd   :  { %5505 = vmatprep.subr.bf16.mxu1 %v5504_v16 }
 0x3cf   :  { %4971 = vmatmul.mubr.msk.f32.gmra.mrb[10].mxu1 %vm183_vm0, %v141_v52 }
 0x3d0   :  { %4973 = vmatprep.mubr.msk.f32.mxu1 %vm183_vm0, %v142_v53  ;;  %5507 = vmatpush3.bf16.msra.mxu1 %v5504_v16 }
 0x3d1   :  { %5520 = vmatprep.subr.bf16.mxu1 %v6038_v20 }
 0x3d3   :  { %4974 = vmatmul.mubr.msk.f32.gmra.mrb[12].mxu1 %vm183_vm0, %v143_v54 }
 0x3d4   :  { %4976 = vmatprep.mubr.msk.f32.mxu1 %vm183_vm0, %v144_v2 }
 0x3d7   :  { %4977 = vmatmul.mubr.msk.f32.gmra.mrb[14].mxu1 %vm183_vm0, %v145_v3 }
 0x3d8   :  { %4979 = vmatprep.mubr.msk.f32.mxu1 %vm183_vm0, %v146_v6 }
 0x3db   :  { %4980 = vmatmul.mubr.msk.f32.gmra.mrb[16].mxu1 %vm183_vm0, %v147_v7 }
 0x3dc   :  { %4982 = vmatprep.mubr.msk.f32.mxu1 %vm183_vm0, %v148_v9 }
 0x3df   :  { %4983 = vmatmul.mubr.msk.f32.gmra.mrb[18].mxu1 %vm183_vm0, %v149_v10 }
 0x495   :  { %v871_v39 = vpop.f32.mrb[6].mxu1 }
 0x496   :  { %v798_v40 = vpop.f32.mrb[6].mxu0  ;;  %v4947_v41 = vpop.f32.mrb[7].mxu1 }
 0x497   :  { %v4936_v42 = vpop.f32.mrb[7].mxu0  ;;  %4956 = vmatprep.mubr.msk.f32.mxu0 %vm183_vm0, %v798_v40 }
 0x498   :  { %4957 = vmatmul.mubr.msk.f32.vlgmr.msra.gmra.mrb[8].mxu0 %vm183_vm0, %v871_v39  ;;  %v6496_v39 = vld [vmem:[%s7139_s4 + $0x10] sm:$0xff] }
 0x499   :  { %4993 = vmatprep.mubr.msk.f32.mxu0 %vm183_vm0, %v138_v48  ;;  %5495 = vmatpush3.bf16.msra.mxu0 %v5492_v25  ;;  %v6513_v48 = vld [vmem:[%s7139_s4 + $0x20] sm:$0xff] }
 0x49a   :  { %5497 = vmatprep.subr.bf16.mxu0 %v5496_v23 }
 0x49d   :  { %5499 = vmatpush3.bf16.msra.mxu0 %v5496_v23 }
 0x49e   :  { %5508 = vmatprep.subr.bf16.mxu0 %v6038_v20  ;;  %v4969_v28 = vpop.f32.mrb[8].mxu1 }
 0x49f   :  { %v1134_v29 = vadd.f32 %v4969_v28, %v6471_v24  ;;  %v1128_v31 = vpop.f32.mrb[9].mxu1 }
 0x4a0   :  { %4994 = vmatmul.mubr.msk.f32.vlgmr.msra.gmra.mrb[10].mxu0 %vm183_vm0, %v139_v50  ;;  %v1129_v32 = vadd.f32 %v6471_v24, %v1128_v31 }
 0x4a1   :  { %4996 = vmatprep.mubr.msk.f32.mxu0 %vm183_vm0, %v140_v51  ;;  %v1326_v33 = vmul.f32 %v1134_v29, %v6476_v27 }
 0x4a2   :  { %v1325_v35 = vmul.f32 %v1129_v32, %v6482_v30  ;;  %v4972_v37 = vpop.f32.mrb[10].mxu1 }
 0x4a3   :  { %v1144_v38 = vadd.f32 %v4972_v37, %v6471_v24  ;;  %v1138_v40 = vpop.f32.mrb[11].mxu1 }
 0x4a4   :  { %4997 = vmatmul.mubr.msk.f32.gmra.mrb[12].mxu0 %vm183_vm0, %v141_v52  ;;  %v5509_v41 = vpack.c.bf16 %v1326_v33, %v1325_v35  ;;  %v1139_v42 = vadd.f32 %v6471_v24, %v1138_v40 }
 0x4a5   :  { %4999 = vmatprep.mubr.msk.f32.mxu0 %vm183_vm0, %v142_v53  ;;  %v1328_v43 = vmul.f32 %v1144_v38, %v6490_v36 }
 0x4a6   :  { %5511 = vmatpush3.bf16.xpose.msk.msra.mxu0 %vm6302_vm2, %v5509_v41  ;;  %v1327_v44 = vmul.f32 %v1139_v42, %v6496_v39  ;;  %v4975_v46 = vpop.f32.mrb[12].mxu1 }
 0x4a7   :  { %5512 = vmatprep.subr.bf16.mxu0 %v6038_v20  ;;  %v1154_v47 = vadd.f32 %v4975_v46, %v6471_v24  ;;  %v1148_v49 = vpop.f32.mrb[13].mxu1 }
 0x4a8   :  { %5000 = vmatmul.mubr.msk.f32.gmra.mrb[14].mxu0 %vm183_vm0, %v143_v54  ;;  %v5513_v50 = vpack.c.bf16 %v1328_v43, %v1327_v44  ;;  %v1149_v51 = vadd.f32 %v6471_v24, %v1148_v49 }
 0x4a9   :  { %5002 = vmatprep.mubr.msk.f32.mxu0 %vm183_vm0, %v144_v2  ;;  %v1330_v52 = vmul.f32 %v1154_v47, %v6506_v45 }
 0x4aa   :  { %v1329_v53 = vmul.f32 %v1149_v51, %v6513_v48 }
 0x4ac   :  { %5003 = vmatmul.mubr.msk.f32.gmra.mrb[16].mxu0 %vm183_vm0, %v145_v3  ;;  %v5517_v54 = vpack.c.bf16 %v1330_v52, %v1329_v53 }
 0x4ad   :  { %5005 = vmatprep.mubr.msk.f32.mxu0 %vm183_vm0, %v146_v6 }
 0x4ae   :  { %5515 = vmatpush3.bf16.xpose.msk.msra.mxu0 %vm6302_vm2, %v5513_v50  ;;  %v4390_v50 = vld [vmem:[#allocation10 + $0x2] ss:$0 sm:$0xff] }
 0x4af   :  { %5516 = vmatprep.subr.bf16.mxu0 %v6038_v20 }
 0x4b0   :  { %5006 = vmatmul.mubr.msk.f32.gmra.mrb[18].mxu0 %vm183_vm0, %v147_v7 }
 0x4b1   :  { %5008 = vmatprep.mubr.msk.f32.mxu0 %vm183_vm0, %v148_v9 }
 0x4b4   :  { %5009 = vmatmul.mubr.msk.f32.gmra.mrb[20].mxu0 %vm183_vm0, %v149_v10  ;;  %v4375_v10 = vld [vmem:[%s7149_s14] ss:$0 sm:$0xff] }
 0x4b5   :  { %5034 = vmatprep.mubr.msk.f32.mxu0 %vm6039_vm1, %v6040_v21 }
 0x4b6   :  { %5519 = vmatpush3.bf16.xpose.msk.msra.mxu0 %vm6302_vm2, %v5517_v54 }
 0x56b   :  { %v4958_v56 = vpop.f32.mrb[8].mxu0 }
 0x56c   :  { %v959_v57 = vadd.f32 %v4958_v56, %v4372_v55  ;;  %v953_v58 = vpop.f32.mrb[9].mxu0 }
 0x56d   :  { %v954_v59 = vadd.f32 %v4372_v55, %v953_v58 }
 0x56e   :  { %v6417_v60 = vadd.f32 %v959_v57, %v6267_v18 }
 0x56f   :  { %v6420_v61 = vadd.f32 %v954_v59, %v6237_v5 }
 0x570   :  { %v969_v62 = vsel %vm183_vm0, %v6417_v60, 0.0  ;;  %v976_v18 = vmul.f32 %v6417_v60, %v6417_v60 }
 0x571   :  { %970 = vadd.xlane.f32.xlu1 %v969_v62  ;;  %v975_v63 = vmul.f32 %v6420_v61, %v6420_v61  ;;  %v966_v1 = vsel %vm183_vm0, %v6420_v61, 0.0 }
 0x572   :  { %v980_v5 = vsel %vm183_vm0, %v976_v18, 0.0 }
 0x573   :  { %v977_v0 = vsel %vm183_vm0, %v975_v63, 0.0  ;;  %v4995_v51 = vpop.f32.mrb[10].mxu0 }
 0x574   :  { %978 = vadd.xlane.f32.xlu0 %v977_v0  ;;  %v1272_v52 = vadd.f32 %v4995_v51, %v4390_v50  ;;  %v1266_v53 = vpop.f32.mrb[11].mxu0  ;;  %v167_v51 = vld [vmem:[#allocation7 + $0x18] sm:$0xff] }
 0x575   :  { %967 = vadd.xlane.f32.xlu1 %v966_v1  ;;  %v1267_v54 = vadd.f32 %v4390_v50, %v1266_v53 }
 0x579   :  { %981 = vadd.xlane.f32.xlu1 %v980_v5 }
 0x5fe   :  { %v971_v55 = vpop.xlane.xlu1 %970 }
 0x5ff   :  { %v974_v58 = vmul.f32 0.03125, %v971_v55  ;;  %v6563_v55 = vmul.f32 %v1272_v52, %v6476_v27  ;;  %v168_v52 = vld [vmem:[#allocation7 + $0x20] sm:$0xff] }
 0x601   :  { %v979_v56 = vpop.xlane.xlu0 %978  ;;  %v986_v1 = vmul.f32 %v974_v58, %v974_v58  ;;  %v990_v11 = vsub.f32 %v6417_v60, %v974_v58  ;;  %v4978_v60 = vpop.f32.mrb[14].mxu1 }
 0x602   :  { %v968_v57 = vpop.xlane.xlu1 %967  ;;  %v983_v62 = vmul.f32 0.03125, %v979_v56  ;;  %v1158_v25 = vpop.f32.mrb[15].mxu1 }
 0x603   :  { %v973_v59 = vmul.f32 0.03125, %v968_v57  ;;  %v1159_v26 = vadd.f32 %v6471_v24, %v1158_v25  ;;  %v4981_v31 = vpop.f32.mrb[16].mxu1  ;;  %v4998_v56 = vpop.f32.mrb[12].mxu0 }
 0x604   :  { %v1174_v32 = vadd.f32 %v4981_v31, %v6471_v24  ;;  %v1168_v33 = vpop.f32.mrb[17].mxu1  ;;  %v1282_v57 = vadd.f32 %v4998_v56, %v4390_v50  ;;  %v1276_v58 = vpop.f32.mrb[13].mxu0 }
 0x605   :  { %v985_v63 = vmul.f32 %v973_v59, %v973_v59  ;;  %v989_v7 = vsub.f32 %v6420_v61, %v973_v59  ;;  %v1164_v61 = vadd.f32 %v4978_v60, %v6471_v24  ;;  %v1331_v28 = vmul.f32 %v1159_v26, %v6482_v30  ;;  %v4984_v41 = vpop.f32.mrb[18].mxu1 }
 0x606   :  { %v982_v0 = vpop.xlane.xlu1 %981  ;;  %v1169_v35 = vadd.f32 %v6471_v24, %v1168_v33  ;;  %v1334_v37 = vmul.f32 %v1174_v32, %v6490_v36  ;;  %v1184_v42 = vadd.f32 %v4984_v41, %v6471_v24  ;;  %v1178_v43 = vpop.f32.mrb[19].mxu1 }
 0x607   :  { %v987_v18 = vsub.f32 %v983_v62, %v985_v63  ;;  %v984_v5 = vmul.f32 0.03125, %v982_v0  ;;  %v1332_v23 = vmul.f32 %v1164_v61, %v6476_v27  ;;  %v1179_v44 = vadd.f32 %v6471_v24, %v1178_v43 }
 0x608   :  { %v1333_v38 = vmul.f32 %v1169_v35, %v6496_v39  ;;  %v1336_v46 = vmul.f32 %v1184_v42, %v6506_v45  ;;  %v6566_v24 = vmul.f32 %v1267_v54, %v6482_v30  ;;  %v1277_v62 = vadd.f32 %v4390_v50, %v1276_v58  ;;  %v169_v54 = vld [vmem:[#allocation7 + $0x28] sm:$0xff] }
 0x609   :  { %v991_v2 = vadd.f32 1e-05, %v987_v18  ;;  %v988_v3 = vsub.f32 %v984_v5, %v986_v1  ;;  %v5521_v29 = vpack.c.bf16 %v1332_v23, %v1331_v28  ;;  %v1335_v47 = vmul.f32 %v1179_v44, %v6513_v48  ;;  %v5001_v1 = vpop.f32.mrb[14].mxu0 }
 0x60a   :  { %v5525_v40 = vpack.c.bf16 %v1334_v37, %v1333_v38  ;;  %v5545_v59 = vpack.c.bf16 %v6563_v55, %v6566_v24  ;;  %v6571_v63 = vmul.f32 %v1282_v57, %v6490_v36  ;;  %v6574_v0 = vmul.f32 %v1277_v62, %v6496_v39  ;;  %v1286_v5 = vpop.f32.mrb[15].mxu0 }
 0x60b   :  { %5794 = vrsqrt.f32 %v991_v2  ;;  %v992_v6 = vadd.f32 1e-05, %v988_v3  ;;  %v5529_v49 = vpack.c.bf16 %v1336_v46, %v1335_v47  ;;  %v1292_v18 = vadd.f32 %v5001_v1, %v4390_v50  ;;  %v164_v46 = vld [vmem:[#allocation7] sm:$0xff]  ;;  %v165_v47 = vld [vmem:[#allocation7 + $0x8] sm:$0xff] }
 0x60c   :  { %v5548_v2 = vpack.c.bf16 %v6571_v63, %v6574_v0  ;;  %v1287_v3 = vadd.f32 %v4390_v50, %v1286_v5  ;;  %v6606_v56 = vpack.c.bf16 %v169_v54, %v168_v52 }
 0x60d   :  { %5796 = vrsqrt.f32 %v992_v6  ;;  %v6579_v6 = vmul.f32 %v1292_v18, %v6506_v45 }
 0x615   :  { %v5795_v9 = vpop.eup %5794 }
 0x616   :  { %v995_v12 = vmul.f32 %v5795_v9, %v989_v7  ;;  %v6582_v7 = vmul.f32 %v1287_v3, %v6513_v48  ;;  %v5004_v9 = vpop.f32.mrb[16].mxu0 }
 0x617   :  { %v5797_v13 = vpop.eup %5796 }
 0x618   :  { %v1003_v15 = vmul.f32 %v4375_v10, %v995_v12  ;;  %v996_v16 = vmul.f32 %v5797_v13, %v990_v11  ;;  %v1296_v11 = vpop.f32.mrb[17].mxu0  ;;  %v5551_v12 = vpack.c.bf16 %v6579_v6, %v6582_v7 }
 0x619   :  { %v1297_v13 = vadd.f32 %v4390_v50, %v1296_v11  ;;  %v1356_v11 = vld [vmem:[#allocation8 + $0x68] sm:$0xff] }
 0x61a   :  { %v1004_v17 = vmul.f32 %v4375_v10, %v996_v16  ;;  %v6531_v19 = vadd.f32 %v4376_v14, %v1003_v15  ;;  %v1302_v10 = vadd.f32 %v5004_v9, %v4390_v50  ;;  %v5007_v16 = vpop.f32.mrb[18].mxu0 }
 0x61b   :  { %v1343_v15 = vmul.f32 %v1297_v13, %v6482_v30  ;;  %v1306_v60 = vpop.f32.mrb[19].mxu0  ;;  %v4403_v30 = vld [vmem:[#allocation10] ss:$0 sm:$0xff] }
 0x61c   :  { %v6533_v22 = vadd.f32 %v4376_v14, %v1004_v17  ;;  %5019 = vmatprep.mubr.msk.f32.mxu1 %vm183_vm0, %v6531_v19  ;;  %v1344_v14 = vmul.f32 %v1302_v10, %v6476_v27  ;;  %v1312_v17 = vadd.f32 %v5007_v16, %v4390_v50  ;;  %v1307_v25 = vadd.f32 %v4390_v50, %v1306_v60  ;;  %v5010_v28 = vpop.f32.mrb[20].mxu0  ;;  %v1355_v10 = vld [vmem:[#allocation8 + $0x60] sm:$0xff] }
 0x61d   :  { %v1316_v31 = vpop.f32.mrb[21].mxu0  ;;  %v5562_v13 = vpack.c.bf16 %v1356_v11, %v1355_v10  ;;  %v4424_v60 = vld [vmem:[#allocation10 + $0x3] ss:$0 sm:$0xff] }
 0x61e   :  { %5020 = vmatmul.mubr.msk.f32.vlgmr.msra.gmra.mrb[20].mxu1 %vm183_vm0, %v6533_v22  ;;  %v5554_v61 = vpack.c.bf16 %v1344_v14, %v1343_v15  ;;  %v1346_v26 = vmul.f32 %v1312_v17, %v6490_v36  ;;  %v1345_v23 = vmul.f32 %v1307_v25, %v6496_v39  ;;  %v1317_v33 = vadd.f32 %v4390_v50, %v1316_v31  ;;  %v1358_v14 = vld [vmem:[#allocation8 + $0x78] sm:$0xff] }
 0x61f   :  { %5049 = vmatprep.mubr.msk.f32.mxu1 %vm6039_vm1, %v6040_v21  ;;  %5523 = vmatpush3.bf16.xpose.msk.msra.mxu1 %vm6302_vm2, %v5521_v29  ;;  %v1322_v29 = vadd.f32 %v5010_v28, %v4390_v50  ;;  %v166_v50 = vld [vmem:[#allocation7 + $0x10] sm:$0xff] }
 0x620   :  { %5524 = vmatprep.subr.bf16.mxu1 %v6038_v20  ;;  %v5557_v32 = vpack.c.bf16 %v1346_v26, %v1345_v23  ;;  %v1347_v27 = vmul.f32 %v1317_v33, %v6513_v48  ;;  %v6604_v53 = vpack.c.bf16 %v167_v51, %v166_v50 }
 0x621   :  { %v1348_v35 = vmul.f32 %v1322_v29, %v6506_v45 }
 0x623   :  { %v5560_v37 = vpack.c.bf16 %v1348_v35, %v1347_v27 }
 0x627   :  { %5527 = vmatpush3.bf16.xpose.msk.msra.mxu1 %vm6302_vm2, %v5525_v40 }
 0x628   :  { %5528 = vmatprep.subr.bf16.mxu1 %v6038_v20 }
 0x62f   :  { %5531 = vmatpush3.bf16.xpose.msk.msra.mxu1 %vm6302_vm2, %v5529_v49  ;;  %v6600_v49 = vpack.c.bf16 %v165_v47, %v164_v46  ;;  %v2112_v46 = vld [vmem:[%s7147_s12 + $0x28] sm:$0xff] }
 0x630   :  { %5553 = vmatprep.subr.bf16.mxu1 %v6038_v20 }
 0x631   :  { %5533 = vmatprep.subr.bf16.mxu0 %v6600_v49 }
 0x6f1   :  { %v5021_v38 = vpop.f32.mrb[20].mxu1 }
 0x6f2   :  { %v1445_v40 = vadd.f32 %v5021_v38, %v4403_v30  ;;  %v1439_v41 = vpop.f32.mrb[21].mxu1 }
 0x6f3   :  { %v1440_v42 = vadd.f32 %v4403_v30, %v1439_v41  ;;  %v2015_v30 = vld [vmem:[%s7145_s10 + $0x10] sm:$0xff] }
 0x6f4   :  { %5050 = vmatmul.mubr.msk.f32.vlgmr.msra.gmra.mrb[22].mxu1 %vm183_vm0, %v1445_v40  ;;  %v2016_v40 = vld [vmem:[%s7145_s10 + $0x18] sm:$0xff] }
 0x6f5   :  { %5035 = vmatmul.mubr.msk.f32.vlgmr.msra.gmra.mrb[22].mxu0 %vm183_vm0, %v1440_v42  ;;  %5555 = vmatpush3.bf16.msra.mxu1 %v5554_v61  ;;  %v5574_v41 = vpack.c.bf16 %v2016_v40, %v2015_v30  ;;  %v2107_v42 = vld [vmem:[%s7147_s12] sm:$0xff] }
 0x6f6   :  { %5556 = vmatprep.subr.bf16.mxu1 %v6038_v20  ;;  %5094 = vmatprep.mubr.msk.f32.mxu1 %vm6039_vm1, %v6040_v21 }
 0x6f7   :  { %5535 = vmatpush3.bf16.msra.mxu0 %v6600_v49 }
 0x6f8   :  { %5537 = vmatprep.subr.bf16.mxu0 %v6604_v53 }
 0x6f9   :  { %5558 = vmatpush3.bf16.msra.mxu1 %v5557_v32 }
 0x6fa   :  { %5559 = vmatprep.subr.bf16.mxu1 %v6038_v20 }
 0x6fb   :  { %5539 = vmatpush3.bf16.msra.mxu0 %v6604_v53 }
 0x6fc   :  { %5541 = vmatprep.subr.bf16.mxu0 %v6606_v56 }
 0x6fd   :  { %5561 = vmatpush3.bf16.msra.mxu1 %v5560_v37 }
 0x6ff   :  { %5543 = vmatpush3.bf16.msra.mxu0 %v6606_v56 }
 0x700   :  { %5544 = vmatprep.subr.bf16.mxu0 %v6038_v20 }
 0x7c7   :  { %v1626_v36 = vpop.f32.mrb[22].mxu1 }
 0x7c8   :  { %v1535_v39 = vpop.f32.mrb[22].mxu0  ;;  %v5051_v45 = vpop.f32.mrb[23].mxu1  ;;  %v1634_v48 = vsel %vm1630_vm3, %v1626_v36, -inf }
 0x7c9   :  { %1635 = vmax.xlane.f32.xlu1 %v1634_v48  ;;  %v5036_v43 = vpop.f32.mrb[23].mxu0  ;;  %v1631_v44 = vsel %vm1630_vm3, %v1535_v39, -inf  ;;  %v2110_v48 = vld [vmem:[%s7147_s12 + $0x18] sm:$0xff] }
 0x7ca   :  { %1632 = vmax.xlane.f32.xlu0 %v1631_v44  ;;  %v2111_v44 = vld [vmem:[%s7147_s12 + $0x20] sm:$0xff] }
 0x7cb   :  { %v5586_v47 = vpack.c.bf16 %v2112_v46, %v2111_v44  ;;  %v4458_v44 = vld [vmem:[%s7141_s6 + $0x88] sm:$0xff]  ;;  %v4443_v46 = vld [vmem:[%s7141_s6 + $0xb0] sm:$0xff] }
 0x856   :  { %v1636_v57 = vpop.xlane.xlu1 %1635 }
 0x857   :  { %v1638_v58 = vsub.f32 %v1626_v36, %v1636_v57  ;;  %v1633_v62 = vpop.xlane.xlu0 %1632  ;;  %v2108_v36 = vld [vmem:[%s7147_s12 + $0x8] sm:$0xff] }
 0x858   :  { %v1637_v1 = vsub.f32 %v1535_v39, %v1633_v62  ;;  %v2109_v39 = vld [vmem:[%s7147_s12 + $0x10] sm:$0xff]  ;;  %v5578_v45 = vpack.c.bf16 %v2108_v36, %v2107_v42 }
 0x859   :  { %v1641_v18 = vmul.f32 1.442695, %v1638_v58  ;;  %v5582_v43 = vpack.c.bf16 %v2110_v48, %v2109_v39  ;;  %v4441_v39 = vld [vmem:[%s7141_s6 + $0xa0] sm:$0xff] }
 0x85a   :  { %v1639_v5 = vmul.f32 1.442695, %v1637_v1  ;;  %v4457_v48 = vld [vmem:[%s7141_s6 + $0x80] sm:$0xff] }
 0x85c   :  { %5798 = vpow2.f32 %v1639_v5 }
 0x85d   :  { %5800 = vpow2.f32 %v1641_v18 }
 0x866   :  { %v5799_v3 = vpop.eup %5798 }
 0x867   :  { %v5801_v9 = vpop.eup %5800  ;;  %5064 = vmatprep.mubr.msk.f32.mxu0 %vm1630_vm3, %v5799_v3 }
 0x868   :  { %5065 = vmatmul.mubr.msk.f32.vlgmr.msra.gmra.mrb[24].mxu0 %vm1630_vm3, %v5801_v9 }
 0x869   :  { %5546 = vmatpush3.bf16.msra.mxu0 %v5545_v59  ;;  %5079 = vmatprep.mubr.msk.f32.mxu0 %vm6039_vm1, %v6040_v21  ;;  %v1357_v59 = vld [vmem:[#allocation8 + $0x70] sm:$0xff] }
 0x86a   :  { %5547 = vmatprep.subr.bf16.mxu0 %v6038_v20 }
 0x86d   :  { %5549 = vmatpush3.bf16.msra.mxu0 %v5548_v2  ;;  %v5566_v2 = vpack.c.bf16 %v1358_v14, %v1357_v59  ;;  %v4429_v59 = vld [vmem:[%s7149_s14 + $0x1] ss:$0 sm:$0xff] }
 0x86e   :  { %5550 = vmatprep.subr.bf16.mxu0 %v6038_v20 }
 0x871   :  { %5552 = vmatpush3.bf16.msra.mxu0 %v5551_v12 }
 0x872   :  { %5563 = vmatprep.subr.bf16.mxu0 %v5562_v13 }
 0x93b   :  { %v5066_v55 = vpop.f32.mrb[24].mxu0 }
 0x93c   :  { %5802 = vrcp.f32 %v5066_v55  ;;  %v1715_v24 = vpop.f32.mrb[25].mxu0 }
 0x93d   :  { %5804 = vrcp.f32 %v1715_v24 }
 0x946   :  { %v5803_v15 = vpop.eup %5802 }
 0x947   :  { %v5805_v16 = vpop.eup %5804  ;;  %v1727_v63 = vmul.f32 %v5803_v15, %v5801_v9 }
 0x948   :  { %v1726_v0 = vmul.f32 %v5805_v16, %v5799_v3 }
 0x949   :  { %5095 = vmatmul.mubr.msk.f32.vlgmr.msra.gmra.mrb[24].mxu1 %vm1630_vm3, %v1727_v63  ;;  %v4430_v63 = vld [vmem:[%s7150_s15 + $0x1] ss:$0 sm:$0xff] }
 0x94a   :  { %5080 = vmatmul.mubr.msk.f32.vlgmr.msra.gmra.mrb[26].mxu0 %vm1630_vm3, %v1726_v0 }
 0x94b   :  { %5565 = vmatpush3.bf16.msra.mxu0 %v5562_v13 }
 0x94c   :  { %5567 = vmatprep.subr.bf16.mxu0 %v5566_v2 }
 0x94f   :  { %5569 = vmatpush3.bf16.msra.mxu0 %v5566_v2 }
 0x950   :  { %5579 = vmatprep.subr.bf16.mxu0 %v5578_v45 }
 0xa1c   :  { %v1870_v6 = vpop.f32.mrb[24].mxu1 }
 0xa1d   :  { %v1797_v7 = vpop.f32.mrb[26].mxu0  ;;  %v5096_v12 = vpop.f32.mrb[25].mxu1 }
 0xa1e   :  { %v5081_v17 = vpop.f32.mrb[27].mxu0  ;;  %5105 = vmatprep.mubr.msk.f32.mxu0 %vm183_vm0, %v1797_v7  ;;  %v2113_v12 = vld [vmem:[%s7147_s12 + $0x30] sm:$0xff] }
 0xa1f   :  { %5106 = vmatmul.mubr.msk.f32.vlgmr.msra.gmra.mrb[28].mxu0 %vm183_vm0, %v1870_v6  ;;  %v2114_v17 = vld [vmem:[%s7147_s12 + $0x38] sm:$0xff] }
 0xa20   :  { %5581 = vmatpush3.bf16.msra.mxu0 %v5578_v45  ;;  %v4442_v45 = vld [vmem:[%s7141_s6 + $0xa8] sm:$0xff] }
 0xa21   :  { %5583 = vmatprep.subr.bf16.mxu0 %v5582_v43 }
 0xa24   :  { %5585 = vmatpush3.bf16.msra.mxu0 %v5582_v43  ;;  %v5594_v43 = vpack.c.bf16 %v4442_v45, %v4441_v39 }
 0xa25   :  { %5587 = vmatprep.subr.bf16.mxu0 %v5586_v47 }
 0xa28   :  { %5589 = vmatpush3.bf16.msra.mxu0 %v5586_v47  ;;  %v4444_v47 = vld [vmem:[%s7141_s6 + $0xb8] sm:$0xff] }
 0xaf2   :  { %v5107_v61 = vpop.f32.mrb[28].mxu0 }
 0xaf3   :  { %v1958_v25 = vadd.f32 %v5107_v61, %v4424_v60  ;;  %v1952_v26 = vpop.f32.mrb[29].mxu0  ;;  %v4431_v61 = vld [vmem:[#allocation11] ss:$0 sm:$0xff] }
 0xaf4   :  { %v1953_v23 = vadd.f32 %v4424_v60, %v1952_v26  ;;  %v5590_v60 = vpack.c.bf16 %v2114_v17, %v2113_v12 }
 0xaf5   :  { %v1962_v28 = vadd.f32 %v1958_v25, %v6533_v22  ;;  %v2013_v22 = vld [vmem:[%s7145_s10] sm:$0xff] }
 0xaf6   :  { %v1961_v29 = vadd.f32 %v1953_v23, %v6531_v19  ;;  %v2014_v19 = vld [vmem:[%s7145_s10 + $0x8] sm:$0xff]  ;;  %5591 = vmatprep.subr.bf16.mxu0 %v5590_v60 }
 0xaf7   :  { %v1970_v31 = vsel %vm183_vm0, %v1962_v28, 0.0  ;;  %v1976_v32 = vmul.f32 %v1962_v28, %v1962_v28  ;;  %v5570_v38 = vpack.c.bf16 %v2014_v19, %v2013_v22  ;;  %5593 = vmatpush3.bf16.msra.mxu0 %v5590_v60 }
 0xaf8   :  { %1971 = vadd.xlane.f32.xlu1 %v1970_v31  ;;  %v1967_v33 = vsel %vm183_vm0, %v1961_v29, 0.0  ;;  %v1975_v35 = vmul.f32 %v1961_v29, %v1961_v29 }
 0xaf9   :  { %1968 = vadd.xlane.f32.xlu0 %v1967_v33  ;;  %v1980_v27 = vsel %vm183_vm0, %v1976_v32, 0.0  ;;  %5571 = vmatprep.subr.bf16.mxu1 %v5570_v38  ;;  %v4434_v32 = vld [vmem:[%s7148_s13] ss:$0 sm:$0xff] }
 0xafa   :  { %v1977_v37 = vsel %vm183_vm0, %v1975_v35, 0.0  ;;  %5573 = vmatpush3.bf16.msra.mxu1 %v5570_v38 }
 0xafb   :  { %5575 = vmatprep.subr.bf16.mxu1 %v5574_v41 }
 0xafc   :  { %1981 = vadd.xlane.f32.xlu1 %v1980_v27 }
 0xafd   :  { %1978 = vadd.xlane.f32.xlu0 %v1977_v37 }
 0xafe   :  { %5577 = vmatpush3.bf16.msra.mxu1 %v5574_v41 }
 0xaff   :  { %5595 = vmatprep.subr.bf16.mxu1 %v5594_v43 }
 0xb85   :  { %v1972_v50 = vpop.xlane.xlu1 %1971 }
 0xb86   :  { %v1974_v51 = vmul.f32 0.03125, %v1972_v50  ;;  %v1969_v52 = vpop.xlane.xlu0 %1968  ;;  %v5610_v50 = vpack.c.bf16 %v4458_v44, %v4457_v48 }
 0xb87   :  { %v1973_v54 = vmul.f32 0.03125, %v1969_v52  ;;  %v4459_v52 = vld [vmem:[%s7141_s6 + $0x90] sm:$0xff] }
 0xb88   :  { %v1986_v58 = vmul.f32 %v1974_v51, %v1974_v51  ;;  %v1990_v13 = vsub.f32 %v1962_v28, %v1974_v51  ;;  %v5598_v51 = vpack.c.bf16 %v4444_v47, %v4443_v46  ;;  %5611 = vmatprep.subr.bf16.mxu0 %v5610_v50  ;;  %v5844_v46 = vld [vmem:[%s7137_s2 + $0x10] sm:$0xff] }
 0xb89   :  { %v1982_v57 = vpop.xlane.xlu1 %1981  ;;  %v1985_v18 = vmul.f32 %v1973_v54, %v1973_v54  ;;  %v1989_v24 = vsub.f32 %v1961_v29, %v1973_v54  ;;  %v4460_v54 = vld [vmem:[%s7141_s6 + $0x98] sm:$0xff] }
 0xb8a   :  { %v1984_v62 = vmul.f32 0.03125, %v1982_v57  ;;  %v1979_v1 = vpop.xlane.xlu0 %1978  ;;  %v5614_v57 = vpack.c.bf16 %v4460_v54, %v4459_v52 }
 0xb8b   :  { %v1983_v5 = vmul.f32 0.03125, %v1979_v1 }
 0xb8c   :  { %v1988_v3 = vsub.f32 %v1984_v62, %v1986_v58  ;;  %v4449_v58 = vld [vmem:[%s7141_s6 + $0xc0] sm:$0xff]  ;;  %v4450_v62 = vld [vmem:[%s7141_s6 + $0xc8] sm:$0xff] }
 0xb8d   :  { %v1987_v9 = vsub.f32 %v1983_v5, %v1985_v18  ;;  %v5602_v1 = vpack.c.bf16 %v4450_v62, %v4449_v58 }
 0xb8e   :  { %v1992_v10 = vadd.f32 1e-05, %v1988_v3 }
 0xb8f   :  { %v1991_v11 = vadd.f32 1e-05, %v1987_v9 }
 0xb90   :  { %5806 = vrsqrt.f32 %v1992_v10 }
 0xb91   :  { %5808 = vrsqrt.f32 %v1991_v11 }
 0xb9a   :  { %v5807_v55 = vpop.eup %5806 }
 0xb9b   :  { %v5809_v14 = vpop.eup %5808  ;;  %v1996_v15 = vmul.f32 %v5807_v55, %v1990_v13 }
 0xb9c   :  { %v1995_v16 = vmul.f32 %v5809_v14, %v1989_v24 }
 0xb9d   :  { %v2004_v0 = vmul.f32 %v4429_v59, %v1996_v15 }
 0xb9e   :  { %v2003_v2 = vmul.f32 %v4429_v59, %v1995_v16 }
 0xb9f   :  { %v2012_v7 = vadd.f32 %v4430_v63, %v2004_v0 }
 0xba0   :  { %v2011_v6 = vadd.f32 %v4430_v63, %v2003_v2 }
 0xba2   :  { %5116 = vmatprep.mubr.msk.f32.mxu1 %vm183_vm0, %v2011_v6 }
 0xba3   :  { %5117 = vmatmul.mubr.msk.f32.vlgmr.msra.gmra.mrb[26].mxu1 %vm183_vm0, %v2012_v7 }
 0xba4   :  { %5597 = vmatpush3.bf16.msra.mxu1 %v5594_v43  ;;  %v4454_v43 = vld [vmem:[%s7142_s7 + $0x6] ss:$0 sm:$0xff] }
 0xba5   :  { %5599 = vmatprep.subr.bf16.mxu1 %v5598_v51 }
 0xba8   :  { %5601 = vmatpush3.bf16.msra.mxu1 %v5598_v51 }
 0xba9   :  { %5603 = vmatprep.subr.bf16.mxu1 %v5602_v1 }
 0xc76   :  { %v5118_v25 = vpop.f32.mrb[26].mxu1 }
 0xc77   :  { %v2102_v26 = vadd.f32 %v5118_v25, %v4431_v61  ;;  %v2096_v23 = vpop.f32.mrb[27].mxu1 }
 0xc78   :  { %v2097_v28 = vadd.f32 %v4431_v61, %v2096_v23  ;;  %v4440_v61 = vld [vmem:[%s7150_s15 + $0x2] ss:$0 sm:$0xff]  ;;  %v4451_v23 = vld [vmem:[%s7141_s6 + $0xd0] sm:$0xff] }
 0xc79   :  { %v2106_v31 = vmax.f32 %v2102_v26, 0.0 }
 0xc7a   :  { %v2105_v29 = vmax.f32 %v2097_v28, 0.0  ;;  %v4452_v28 = vld [vmem:[%s7141_s6 + $0xd8] sm:$0xff] }
 0xc7c   :  { %5135 = vmatprep.mubr.msk.f32.mxu0 %vm2122_vm4, %v2105_v29 }
 0xc7d   :  { %5136 = vmatmul.mubr.msk.f32.vlgmr.msra.gmra.mrb[30].mxu0 %vm2122_vm4, %v2106_v31 }
 0xc7e   :  { %5613 = vmatpush3.bf16.msra.mxu0 %v5610_v50  ;;  %v5845_v50 = vld [vmem:[%s7137_s2 + $0x18] sm:$0xff] }
 0xc7f   :  { %5615 = vmatprep.subr.bf16.mxu0 %v5614_v57 }
 0xc82   :  { %5617 = vmatpush3.bf16.msra.mxu0 %v5614_v57 }
 0xc83   :  { %5626 = vmatprep.subr.bf16.mxu0 %v6038_v20 }
 0xd50   :  { %v5137_v33 = vpop.f32.mrb[30].mxu0 }
 0xd51   :  { %v2201_v35 = vadd.f32 %v5137_v33, %v4434_v32  ;;  %v2195_v27 = vpop.f32.mrb[31].mxu0  ;;  %v4446_v33 = vld [vmem:[%s7142_s7 + $0x5] ss:$0 sm:$0xff] }
 0xd52   :  { %v2196_v37 = vadd.f32 %v4434_v32, %v2195_v27  ;;  %v5606_v32 = vpack.c.bf16 %v4452_v28, %v4451_v23 }
 0xd53   :  { %v2205_v22 = vadd.f32 %v2201_v35, %v2012_v7  ;;  %v4439_v7 = vld [vmem:[%s7149_s14 + $0x2] ss:$0 sm:$0xff] }
 0xd54   :  { %v2204_v19 = vadd.f32 %v2196_v37, %v2011_v6 }
 0xd55   :  { %v2213_v30 = vsel %vm183_vm0, %v2205_v22, 0.0  ;;  %v2219_v38 = vmul.f32 %v2205_v22, %v2205_v22 }
 0xd56   :  { %2214 = vadd.xlane.f32.xlu1 %v2213_v30  ;;  %v2210_v40 = vsel %vm183_vm0, %v2204_v19, 0.0  ;;  %v2218_v41 = vmul.f32 %v2204_v19, %v2204_v19 }
 0xd57   :  { %2211 = vadd.xlane.f32.xlu0 %v2210_v40  ;;  %v2223_v42 = vsel %vm183_vm0, %v2219_v38, 0.0  ;;  %v6761_v38 = vld [vmem:[%s7137_s2] sm:$0xff] }
 0xd58   :  { %v2220_v36 = vsel %vm183_vm0, %v2218_v41, 0.0  ;;  %v6767_v41 = vld [vmem:[%s7137_s2 + $0x8] sm:$0xff] }
 0xd5a   :  { %2224 = vadd.xlane.f32.xlu1 %v2223_v42 }
 0xd5b   :  { %2221 = vadd.xlane.f32.xlu0 %v2220_v36 }
 0xde3   :  { %v2215_v18 = vpop.xlane.xlu1 %2214 }
 0xde4   :  { %v2217_v5 = vmul.f32 0.03125, %v2215_v18  ;;  %v2212_v3 = vpop.xlane.xlu0 %2211 }
 0xde5   :  { %v2216_v9 = vmul.f32 0.03125, %v2212_v3 }
 0xde6   :  { %v2229_v11 = vmul.f32 %v2217_v5, %v2217_v5  ;;  %v2233_v0 = vsub.f32 %v2205_v22, %v2217_v5  ;;  %v4467_v5 = vld [vmem:[%s7142_s7 + $0x4] ss:$0 sm:$0xff] }
 0xde7   :  { %v2225_v10 = vpop.xlane.xlu1 %2224  ;;  %v2228_v24 = vmul.f32 %v2216_v9, %v2216_v9  ;;  %v2232_v6 = vsub.f32 %v2204_v19, %v2216_v9 }
 0xde8   :  { %v2227_v13 = vmul.f32 0.03125, %v2225_v10  ;;  %v2222_v55 = vpop.xlane.xlu0 %2221 }
 0xde9   :  { %v2226_v59 = vmul.f32 0.03125, %v2222_v55 }
 0xdea   :  { %v2231_v14 = vsub.f32 %v2227_v13, %v2229_v11 }
 0xdeb   :  { %v2230_v15 = vsub.f32 %v2226_v59, %v2228_v24 }
 0xdec   :  { %v2235_v16 = vadd.f32 1e-05, %v2231_v14 }
 0xded   :  { %v2234_v63 = vadd.f32 1e-05, %v2230_v15 }
 0xdee   :  { %5810 = vrsqrt.f32 %v2235_v16 }
 0xdef   :  { %5812 = vrsqrt.f32 %v2234_v63 }
 0xdf8   :  { %v5811_v2 = vpop.eup %5810 }
 0xdf9   :  { %v5813_v12 = vpop.eup %5812  ;;  %v2239_v17 = vmul.f32 %v5811_v2, %v2233_v0 }
 0xdfa   :  { %v2238_v60 = vmul.f32 %v5813_v12, %v2232_v6 }
 0xdfb   :  { %v2247_v25 = vmul.f32 %v4439_v7, %v2239_v17 }
 0xdfc   :  { %v2246_v26 = vmul.f32 %v4439_v7, %v2238_v60 }
 0xdfd   :  { %v6736_v31 = vadd.f32 %v4440_v61, %v2247_v25 }
 0xdfe   :  { %v6734_v29 = vadd.f32 %v4440_v61, %v2246_v26 }
 0xe00   :  { %5146 = vmatprep.mubr.msk.f32.mxu1 %vm183_vm0, %v6734_v29  ;;  %5168 = vmatprep.mubr.msk.f32.mxu0 %vm183_vm0, %v6734_v29 }
 0xe01   :  { %5147 = vmatmul.mubr.msk.f32.vlgmr.msra.gmra.mrb[28].mxu1 %vm183_vm0, %v6736_v31  ;;  %5169 = vmatmul.mubr.msk.f32.vlgmr.msra.gmra.mrb[32].mxu0 %vm183_vm0, %v6736_v31 }
 0xe02   :  { %5605 = vmatpush3.bf16.msra.mxu1 %v5602_v1  ;;  %5157 = vmatprep.mubr.msk.f32.mxu1 %vm183_vm0, %v6734_v29 }
 0xe03   :  { %5607 = vmatprep.subr.bf16.mxu1 %v5606_v32  ;;  %5190 = vmatprep.mubr.msk.f32.mxu0 %vm6039_vm1, %v6040_v21 }
 0xe06   :  { %5609 = vmatpush3.bf16.msra.mxu1 %v5606_v32 }
 0xe07   :  { %5618 = vmatprep.subr.bf16.mxu1 %v6038_v20 }
 0xe09   :  { %5158 = vmatmul.mubr.msk.f32.vlgmr.msra.gmra.mrb[30].mxu1 %vm183_vm0, %v6736_v31 }
 0xe0a   :  { %5179 = vmatprep.mubr.msk.f32.mxu1 %vm6039_vm1, %v6040_v21 }
 0xed4   :  { %v5148_v35 = vpop.f32.mrb[28].mxu1  ;;  %v5170_v27 = vpop.f32.mrb[32].mxu0 }
 0xed5   :  { %v2347_v37 = vadd.f32 %v5148_v35, %v4446_v33  ;;  %v2341_v22 = vpop.f32.mrb[29].mxu1  ;;  %v2540_v19 = vpop.f32.mrb[33].mxu0  ;;  %v2546_v10 = vadd.f32 %v5170_v27, %v4467_v5  ;;  %v4462_v35 = vld [vmem:[%s7141_s6 + $0xe0] sm:$0xff]  ;;  %v4463_v27 = vld [vmem:[%s7141_s6 + $0xe8] sm:$0xff] }
 0xed6   :  { %v2342_v30 = vadd.f32 %v4446_v33, %v2341_v22  ;;  %v2541_v11 = vadd.f32 %v4467_v5, %v2540_v19  ;;  %v5851_v5 = vld [vmem:[%s7136_s1 + $0x28] sm:$0xff] }
 0xed7   :  { %v2442_v40 = vmul.f32 %v6761_v38, %v2347_v37  ;;  %v2443_v42 = vmul.f32 %v6767_v41, %v2347_v37  ;;  %v2444_v47 = vmul.f32 %v5844_v46, %v2347_v37  ;;  %v2445_v51 = vmul.f32 %v5845_v50, %v2347_v37 }
 0xed8   :  { %v2438_v36 = vmul.f32 %v6761_v38, %v2342_v30  ;;  %v2439_v39 = vmul.f32 %v6767_v41, %v2342_v30  ;;  %v2440_v57 = vmul.f32 %v5844_v46, %v2342_v30  ;;  %v2441_v58 = vmul.f32 %v5845_v50, %v2342_v30  ;;  %v4464_v30 = vld [vmem:[%s7141_s6 + $0xf0] sm:$0xff] }
 0xed9   :  { %v5627_v45 = vpack.c.bf16 %v2443_v42, %v2442_v40  ;;  %v5631_v62 = vpack.c.bf16 %v2445_v51, %v2444_v47  ;;  %v5654_v37 = vpack.c.bf16 %v4463_v27, %v4462_v35  ;;  %v3102_v47 = vld [vmem:[#allocation8 + $0xa0] sm:$0xff]  ;;  %v3104_v51 = vld [vmem:[#allocation8 + $0xb0] sm:$0xff] }
 0xeda   :  { %v5619_v48 = vpack.c.bf16 %v2439_v39, %v2438_v36  ;;  %v5623_v18 = vpack.c.bf16 %v2441_v58, %v2440_v57  ;;  %v5847_v58 = vld [vmem:[%s7136_s1 + $0x8] sm:$0xff]  ;;  %v4491_v27 = vld [vmem:[#allocation10 + $0x5] ss:$0 sm:$0xff] }
 0xedb   :  { %5629 = vmatpush3.bf16.xpose.msk.msra.mxu0 %vm6302_vm2, %v5627_v45  ;;  %v5846_v45 = vld [vmem:[%s7136_s1] sm:$0xff] }
 0xedc   :  { %v5159_v44 = vpop.f32.mrb[30].mxu1  ;;  %5621 = vmatpush3.bf16.xpose.msk.msra.mxu1 %vm6302_vm2, %v5619_v48  ;;  %5630 = vmatprep.subr.bf16.mxu0 %v6038_v20 }
 0xedd   :  { %v2435_v52 = vadd.f32 %v5159_v44, %v4454_v43  ;;  %v2429_v54 = vpop.f32.mrb[31].mxu1  ;;  %5622 = vmatprep.subr.bf16.mxu1 %v6038_v20 }
 0xede   :  { %v2430_v1 = vadd.f32 %v4454_v43, %v2429_v54  ;;  %v3105_v54 = vld [vmem:[#allocation8 + $0xb8] sm:$0xff] }
 0xedf   :  { %v2451_v61 = vmul.f32 %v6767_v41, %v2435_v52  ;;  %v2452_v23 = vmul.f32 %v5844_v46, %v2435_v52  ;;  %v2453_v28 = vmul.f32 %v5845_v50, %v2435_v52  ;;  %v5666_v57 = vpack.c.bf16 %v3105_v54, %v3104_v51 }
 0xee0   :  { %v2446_v3 = vmul.f32 %v6761_v38, %v2430_v1  ;;  %v2447_v9 = vmul.f32 %v6767_v41, %v2430_v1  ;;  %v2448_v13 = vmul.f32 %v5844_v46, %v2430_v1  ;;  %v2449_v55 = vmul.f32 %v5845_v50, %v2430_v1  ;;  %v3103_v50 = vld [vmem:[#allocation8 + $0xa8] sm:$0xff]  ;;  %v5849_v1 = vld [vmem:[%s7136_s1 + $0x18] sm:$0xff] }
 0xee1   :  { %v5652_v33 = vpack.c.bf16 %v2453_v28, %v2452_v23  ;;  %v3241_v23 = vld [vmem:[#allocation8 + $0xc8] sm:$0xff]  ;;  %v3242_v28 = vld [vmem:[#allocation8 + $0xd0] sm:$0xff] }
 0xee2   :  { %v5643_v24 = vpack.c.bf16 %v2447_v9, %v2446_v3  ;;  %v5646_v59 = vpack.c.bf16 %v2449_v55, %v2448_v13  ;;  %v5852_v3 = vld [vmem:[%s7136_s1 + $0x30] sm:$0xff]  ;;  %v5853_v9 = vld [vmem:[%s7136_s1 + $0x38] sm:$0xff] }
 0xee3   :  { %5633 = vmatpush3.bf16.xpose.msk.msra.mxu0 %vm6302_vm2, %v5631_v62  ;;  %v5848_v62 = vld [vmem:[%s7136_s1 + $0x10] sm:$0xff]  ;;  %v5857_v55 = vld [vmem:[%s7136_s1 + $0x58] sm:$0xff] }
 0xee4   :  { %5625 = vmatpush3.bf16.xpose.msk.msra.mxu1 %vm6302_vm2, %v5623_v18  ;;  %5642 = vmatprep.subr.bf16.mxu0 %v6038_v20  ;;  %v5850_v18 = vld [vmem:[%s7136_s1 + $0x20] sm:$0xff]  ;;  %v5856_v13 = vld [vmem:[%s7136_s1 + $0x50] sm:$0xff] }
 0xee5   :  { %5635 = vmatprep.subr.bf16.mxu1 %v6350_v4 }
 0xeea   :  { %5191 = vmatmul.mubr.msk.f32.vlgmr.msra.gmra.mrb[34].mxu0 %vm183_vm0, %v2546_v10  ;;  %v5854_v10 = vld [vmem:[%s7136_s1 + $0x40] sm:$0xff] }
 0xeeb   :  { %5180 = vmatmul.mubr.msk.f32.vlgmr.msra.gmra.mrb[32].mxu1 %vm183_vm0, %v2541_v11  ;;  %5644 = vmatpush3.bf16.msra.mxu0 %v5643_v24  ;;  %v5855_v11 = vld [vmem:[%s7136_s1 + $0x48] sm:$0xff]  ;;  %v4484_v24 = vld [vmem:[%s7142_s7 + $0x7] ss:$0 sm:$0xff]  ;;  %s4319_s1 = sshll.u32 %s6041_s0, 4  ;;  %s4320_s1 = int_to_ptr.vmem [resolvable:$true] %s4319_s1 }
 0xeec   :  { %5645 = vmatprep.subr.bf16.mxu0 %v6038_v20  ;;  %5637 = vmatpush3.bf16.msra.mxu1 %v6350_v4  ;;  %s5996_s7 = scalar_lea.vmem %s4320_s1, 256  ;;  %p6001_p7 = scmp.lt.s32.totalorder %s4320_s1, %s4320_s1 }
 0xeed   :  { %5639 = vmatprep.subr.bf16.mxu1 %v6352_v8  ;;  %5212 = vmatprep.mubr.msk.f32.mxu0 %vm6039_vm1, %v6040_v21  ;;  %p5997_p6 = scmp.ne.s32.totalorder %s4320_s1, %s5996_s7  ;;  %p6002_p8 = scmp.lt.s32.totalorder %s5996_s7, %s5996_s7 }
 0xeef   :  { %5647 = vmatpush3.bf16.msra.mxu0 %v5646_v59  ;;  %p6003_p9 = por %p6002_p8, %p6001_p7 }
 0xef0   :  { %5641 = vmatpush3.bf16.msra.mxu1 %v6352_v8  ;;  %v2450_v8 = vmul.f32 %v6761_v38, %v2435_v52  ;;  %5655 = vmatprep.subr.bf16.mxu0 %v5654_v37  ;;  %v4465_v38 = vld [vmem:[%s7141_s6 + $0xf8] sm:$0xff]  ;;  %v5662_v52 = vpack.c.bf16 %v3103_v50, %v3102_v47  ;;  %v6938_v47 = vld [vmem:[%s7139_s4 + $0x10] sm:$0xff] }
 0xef1   :  { %5648 = vmatprep.subr.bf16.mxu1 %v6038_v20  ;;  %v5658_v39 = vpack.c.bf16 %v4465_v38, %v4464_v30  ;;  %v6918_v38 = vld [vmem:[%s7139_s4 + $0x8] sm:$0xff]  ;;  %p6004_p10 = pnand %p6003_p9, %p5997_p6 }
 0xef2   :  { %v5649_v32 = vpack.c.bf16 %v2451_v61, %v2450_v8  ;;  %v3404_v8 = vld [vmem:[#allocation8 + $0x90] sm:$0xff]  ;;  %v3405_v61 = vld [vmem:[#allocation8 + $0x98] sm:$0xff] }
 0xfbd   :  { %v2715_v14 = vpop.f32.mrb[34].mxu0 }
 0xfbe   :  { %v2630_v15 = vpop.f32.mrb[32].mxu1  ;;  %v5192_v16 = vpop.f32.mrb[35].mxu0  ;;  %v2722_v63 = vsel %vm183_vm0, %v2715_v14, -inf }
 0xfbf   :  { %2723 = vmax.xlane.f32.xlu1 %v2722_v63  ;;  %v5181_v0 = vpop.f32.mrb[33].mxu1  ;;  %v2719_v4 = vsel %vm183_vm0, %v2630_v15, -inf }
 0xfc0   :  { %2720 = vmax.xlane.f32.xlu0 %v2719_v4 }
0x104c   :  { %v2724_v2 = vpop.xlane.xlu1 %2723 }
0x104d   :  { %v2726_v6 = vsub.f32 %v2715_v14, %v2724_v2  ;;  %v2721_v7 = vpop.xlane.xlu0 %2720 }
0x104e   :  { %v2725_v12 = vsub.f32 %v2630_v15, %v2721_v7 }
0x104f   :  { %v2729_v17 = vmul.f32 1.442695, %v2726_v6 }
0x1050   :  { %v2727_v60 = vmul.f32 1.442695, %v2725_v12  ;;  %v3402_v12 = vld [vmem:[#allocation8 + $0x80] sm:$0xff] }
0x1052   :  { %5814 = vpow2.f32 %v2727_v60 }
0x1053   :  { %5816 = vpow2.f32 %v2729_v17  ;;  %v3403_v17 = vld [vmem:[#allocation8 + $0x88] sm:$0xff] }
0x1054   :  { %v5678_v60 = vpack.c.bf16 %v3403_v17, %v3402_v12 }
0x105c   :  { %v5815_v25 = vpop.eup %5814 }
0x105d   :  { %v5817_v26 = vpop.eup %5816  ;;  %5201 = vmatprep.mubr.msk.f32.mxu1 %vm183_vm0, %v5815_v25 }
0x105e   :  { %5202 = vmatmul.mubr.msk.f32.vlgmr.msra.gmra.mrb[34].mxu1 %vm183_vm0, %v5817_v26 }
0x105f   :  { %5650 = vmatpush3.bf16.msra.mxu1 %v5649_v32  ;;  %5223 = vmatprep.mubr.msk.f32.mxu1 %vm6039_vm1, %v6040_v21 }
0x1060   :  { %5651 = vmatprep.subr.bf16.mxu1 %v6038_v20 }
0x1063   :  { %5653 = vmatpush3.bf16.msra.mxu1 %v5652_v33  ;;  %v3243_v33 = vld [vmem:[#allocation8 + $0xd8] sm:$0xff] }
0x1064   :  { %5663 = vmatprep.subr.bf16.mxu1 %v5662_v52  ;;  %v5674_v35 = vpack.c.bf16 %v3243_v33, %v3242_v28 }
0x1131   :  { %v5203_v22 = vpop.f32.mrb[34].mxu1 }
0x1132   :  { %5818 = vrcp.f32 %v5203_v22  ;;  %v2803_v19 = vpop.f32.mrb[35].mxu1 }
0x1133   :  { %5820 = vrcp.f32 %v2803_v19 }
0x113c   :  { %v5819_v40 = vpop.eup %5818 }
0x113d   :  { %v5821_v41 = vpop.eup %5820  ;;  %v2815_v42 = vmul.f32 %v5819_v40, %v5817_v26  ;;  %v3240_v26 = vld [vmem:[#allocation8 + $0xc0] sm:$0xff] }
0x113e   :  { %v2814_v36 = vmul.f32 %v5821_v41, %v5815_v25  ;;  %v5682_v25 = vpack.c.bf16 %v3405_v61, %v3404_v8  ;;  %v5670_v32 = vpack.c.bf16 %v3241_v23, %v3240_v26  ;;  %v6924_v41 = vld [vmem:[%s7139_s4] sm:$0xff] }
0x113f   :  { %5224 = vmatmul.mubr.msk.f32.vlgmr.msra.gmra.mrb[36].mxu1 %vm183_vm0, %v2815_v42 }
0x1140   :  { %5213 = vmatmul.mubr.msk.f32.vlgmr.msra.gmra.mrb[36].mxu0 %vm183_vm0, %v2814_v36  ;;  %5245 = vmatprep.mubr.msk.f32.mxu1 %vm183_vm0, %v5846_v45 }
0x1141   :  { %5657 = vmatpush3.bf16.msra.mxu0 %v5654_v37  ;;  %5665 = vmatpush3.bf16.msra.mxu1 %v5662_v52 }
0x1142   :  { %5659 = vmatprep.subr.bf16.mxu0 %v5658_v39  ;;  %5667 = vmatprep.subr.bf16.mxu1 %v5666_v57 }
0x1145   :  { %5661 = vmatpush3.bf16.msra.mxu0 %v5658_v39  ;;  %5669 = vmatpush3.bf16.msra.mxu1 %v5666_v57 }
0x1146   :  { %5679 = vmatprep.subr.bf16.mxu1 %v5678_v60  ;;  %5671 = vmatprep.subr.bf16.mxu0 %v5670_v32 }
0x1148   :  { %5246 = vmatmul.mubr.msk.f32.vlgmr.msra.gmra.mrb[38].mxu1 %vm183_vm0, %v5847_v58 }
0x1149   :  { %5248 = vmatprep.mubr.msk.f32.mxu1 %vm183_vm0, %v5848_v62  ;;  %5681 = vmatpush3.bf16.msra.mxu1 %v5678_v60 }
0x114a   :  { %5683 = vmatprep.subr.bf16.mxu1 %v5682_v25 }
0x114c   :  { %5249 = vmatmul.mubr.msk.f32.gmra.mrb[40].mxu1 %vm183_vm0, %v5849_v1 }
0x114d   :  { %5251 = vmatprep.mubr.msk.f32.mxu1 %vm183_vm0, %v5850_v18  ;;  %5685 = vmatpush3.bf16.msra.mxu1 %v5682_v25 }
0x114e   :  { %5698 = vmatprep.subr.bf16.mxu1 %v6038_v20 }
0x1150   :  { %5252 = vmatmul.mubr.msk.f32.gmra.mrb[42].mxu1 %vm183_vm0, %v5851_v5 }
0x1151   :  { %5254 = vmatprep.mubr.msk.f32.mxu1 %vm183_vm0, %v5852_v3 }
0x1154   :  { %5255 = vmatmul.mubr.msk.f32.gmra.mrb[44].mxu1 %vm183_vm0, %v5853_v9 }
0x1155   :  { %5257 = vmatprep.mubr.msk.f32.mxu1 %vm183_vm0, %v5854_v10 }
0x1158   :  { %5258 = vmatmul.mubr.msk.f32.gmra.mrb[46].mxu1 %vm183_vm0, %v5855_v11 }
0x1159   :  { %5260 = vmatprep.mubr.msk.f32.mxu1 %vm183_vm0, %v5856_v13 }
0x115c   :  { %5261 = vmatmul.mubr.msk.f32.gmra.mrb[48].mxu1 %vm183_vm0, %v5857_v55 }
0x1212   :  { %v2958_v48 = vpop.f32.mrb[36].mxu1 }
0x1213   :  { %v2885_v43 = vpop.f32.mrb[36].mxu0  ;;  %v5225_v44 = vpop.f32.mrb[37].mxu1 }
0x1214   :  { %v5214_v46 = vpop.f32.mrb[37].mxu0  ;;  %5234 = vmatprep.mubr.msk.f32.mxu0 %vm183_vm0, %v2885_v43  ;;  %v6930_v44 = vld [vmem:[%s7139_s4 + $0x18] sm:$0xff] }
0x1215   :  { %5235 = vmatmul.mubr.msk.f32.vlgmr.msra.gmra.mrb[38].mxu0 %vm183_vm0, %v2958_v48 }
0x1216   :  { %5271 = vmatprep.mubr.msk.f32.mxu0 %vm183_vm0, %v5846_v45  ;;  %5673 = vmatpush3.bf16.msra.mxu0 %v5670_v32 }
0x1217   :  { %5675 = vmatprep.subr.bf16.mxu0 %v5674_v35 }
0x121a   :  { %5677 = vmatpush3.bf16.msra.mxu0 %v5674_v35 }
0x121b   :  { %5686 = vmatprep.subr.bf16.mxu0 %v6038_v20  ;;  %v5247_v37 = vpop.f32.mrb[38].mxu1 }
0x121c   :  { %v3186_v22 = vadd.f32 %v5247_v37, %v4491_v27  ;;  %v3180_v19 = vpop.f32.mrb[39].mxu1 }
0x121d   :  { %5272 = vmatmul.mubr.msk.f32.vlgmr.msra.gmra.mrb[40].mxu0 %vm183_vm0, %v5847_v58  ;;  %v3181_v30 = vadd.f32 %v4491_v27, %v3180_v19 }
0x121e   :  { %5274 = vmatprep.mubr.msk.f32.mxu0 %vm183_vm0, %v5848_v62  ;;  %v3378_v40 = vmul.f32 %v6918_v38, %v3186_v22  ;;  %v6945_v62 = vld [vmem:[%s7139_s4 + $0x28] sm:$0xff] }
0x121f   :  { %v3377_v42 = vmul.f32 %v6924_v41, %v3181_v30  ;;  %v5250_v36 = vpop.f32.mrb[40].mxu1 }
0x1220   :  { %v3196_v39 = vadd.f32 %v5250_v36, %v4491_v27  ;;  %v3190_v45 = vpop.f32.mrb[41].mxu1 }
0x1221   :  { %5275 = vmatmul.mubr.msk.f32.gmra.mrb[42].mxu0 %vm183_vm0, %v5849_v1  ;;  %v5687_v48 = vpack.c.bf16 %v3378_v40, %v3377_v42  ;;  %v3191_v43 = vadd.f32 %v4491_v27, %v3190_v45 }
0x1222   :  { %5277 = vmatprep.mubr.msk.f32.mxu0 %vm183_vm0, %v5850_v18  ;;  %v3380_v46 = vmul.f32 %v6930_v44, %v3196_v39  ;;  %v6951_v18 = vld [vmem:[%s7139_s4 + $0x20] sm:$0xff] }
0x1223   :  { %5689 = vmatpush3.bf16.xpose.msk.msra.mxu0 %vm6302_vm2, %v5687_v48  ;;  %v3379_v50 = vmul.f32 %v6938_v47, %v3191_v43  ;;  %v5253_v51 = vpop.f32.mrb[42].mxu1  ;;  %v4489_v48 = vld [vmem:[%s7149_s14 + $0x3] ss:$0 sm:$0xff] }
0x1224   :  { %5690 = vmatprep.subr.bf16.mxu0 %v6038_v20  ;;  %v3206_v52 = vadd.f32 %v5253_v51, %v4491_v27  ;;  %v3200_v54 = vpop.f32.mrb[43].mxu1  ;;  %v4490_v51 = vld [vmem:[%s7150_s15 + $0x3] ss:$0 sm:$0xff] }
0x1225   :  { %5278 = vmatmul.mubr.msk.f32.gmra.mrb[44].mxu0 %vm183_vm0, %v5851_v5  ;;  %v5691_v57 = vpack.c.bf16 %v3380_v46, %v3379_v50  ;;  %v3201_v58 = vadd.f32 %v4491_v27, %v3200_v54 }
0x1226   :  { %5280 = vmatprep.mubr.msk.f32.mxu0 %vm183_vm0, %v5852_v3  ;;  %v3382_v1 = vmul.f32 %v6945_v62, %v3206_v52 }
0x1227   :  { %v3381_v5 = vmul.f32 %v6951_v18, %v3201_v58  ;;  %v5256_v3 = vpop.f32.mrb[44].mxu1 }
0x1229   :  { %5281 = vmatmul.mubr.msk.f32.gmra.mrb[46].mxu0 %vm183_vm0, %v5853_v9  ;;  %v3216_v9 = vadd.f32 %v5256_v3, %v4491_v27 }
0x122a   :  { %5283 = vmatprep.mubr.msk.f32.mxu0 %vm183_vm0, %v5854_v10  ;;  %v3210_v10 = vpop.f32.mrb[45].mxu1 }
0x122b   :  { %5693 = vmatpush3.bf16.xpose.msk.msra.mxu0 %vm6302_vm2, %v5691_v57 }
0x122c   :  { %5694 = vmatprep.subr.bf16.mxu0 %v6038_v20 }
0x122d   :  { %5284 = vmatmul.mubr.msk.f32.gmra.mrb[48].mxu0 %vm183_vm0, %v5855_v11  ;;  %v5695_v11 = vpack.c.bf16 %v3382_v1, %v3381_v5 }
0x122e   :  { %5286 = vmatprep.mubr.msk.f32.mxu0 %vm183_vm0, %v5856_v13  ;;  %v3211_v13 = vadd.f32 %v4491_v27, %v3210_v10 }
0x1231   :  { %5287 = vmatmul.mubr.msk.f32.gmra.mrb[50].mxu0 %vm183_vm0, %v5857_v55  ;;  %v3384_v55 = vmul.f32 %v6918_v38, %v3216_v9 }
0x1232   :  { %5312 = vmatprep.mubr.msk.f32.mxu0 %vm6039_vm1, %v6040_v21 }
0x1233   :  { %5697 = vmatpush3.bf16.xpose.msk.msra.mxu0 %vm6302_vm2, %v5695_v11 }
0x1234   :  { %5711 = vmatprep.subr.bf16.mxu0 %v6600_v49 }
0x12e8   :  { %v5236_v59 = vpop.f32.mrb[38].mxu0 }
0x12e9   :  { %v3046_v14 = vadd.f32 %v5236_v59, %v4484_v24  ;;  %v3040_v15 = vpop.f32.mrb[39].mxu0  ;;  %v5259_v59 = vpop.f32.mrb[46].mxu1 }
0x12ea   :  { %v3041_v16 = vadd.f32 %v4484_v24, %v3040_v15  ;;  %v3383_v24 = vmul.f32 %v6924_v41, %v3211_v13  ;;  %v3220_v15 = vpop.f32.mrb[47].mxu1 }
0x12eb   :  { %v6885_v63 = vadd.f32 %v3046_v14, %v6736_v31  ;;  %v3226_v14 = vadd.f32 %v5259_v59, %v4491_v27 }
0x12ec   :  { %v6888_v0 = vadd.f32 %v3041_v16, %v6734_v29  ;;  %v5699_v16 = vpack.c.bf16 %v3384_v55, %v3383_v24 }
0x12ed   :  { %v3058_v4 = vsel %vm183_vm0, %v6885_v63, 0.0  ;;  %v3064_v2 = vmul.f32 %v6885_v63, %v6885_v63 }
0x12ee   :  { %3059 = vadd.xlane.f32.xlu1 %v3058_v4  ;;  %v3055_v6 = vsel %vm183_vm0, %v6888_v0, 0.0  ;;  %v3063_v7 = vmul.f32 %v6888_v0, %v6888_v0  ;;  %v3221_v4 = vadd.f32 %v4491_v27, %v3220_v15 }
0x12ef   :  { %3056 = vadd.xlane.f32.xlu0 %v3055_v6  ;;  %v3068_v31 = vsel %vm183_vm0, %v3064_v2, 0.0  ;;  %v3386_v2 = vmul.f32 %v6930_v44, %v3226_v14 }
0x12f0   :  { %v3065_v29 = vsel %vm183_vm0, %v3063_v7, 0.0  ;;  %v3385_v6 = vmul.f32 %v6938_v47, %v3221_v4  ;;  %v5262_v7 = vpop.f32.mrb[48].mxu1 }
0x12f2   :  { %3069 = vadd.xlane.f32.xlu1 %v3068_v31  ;;  %v3236_v31 = vadd.f32 %v5262_v7, %v4491_v27  ;;  %v5703_v12 = vpack.c.bf16 %v3386_v2, %v3385_v6 }
0x12f3   :  { %3066 = vadd.xlane.f32.xlu0 %v3065_v29  ;;  %v3230_v29 = vpop.f32.mrb[49].mxu1 }
0x12f4   :  { %v3231_v17 = vadd.f32 %v4491_v27, %v3230_v29  ;;  %v3388_v60 = vmul.f32 %v6945_v62, %v3236_v31 }
0x12f6   :  { %v3387_v8 = vmul.f32 %v6951_v18, %v3231_v17 }
0x12f8   :  { %v5707_v61 = vpack.c.bf16 %v3388_v60, %v3387_v8 }
0x137b   :  { %v3060_v25 = vpop.xlane.xlu1 %3059 }
0x137c   :  { %v3062_v26 = vmul.f32 0.03125, %v3060_v25  ;;  %v3057_v23 = vpop.xlane.xlu0 %3056 }
0x137d   :  { %v3061_v28 = vmul.f32 0.03125, %v3057_v23 }
0x137e   :  { %v3074_v33 = vmul.f32 %v3062_v26, %v3062_v26  ;;  %v3078_v36 = vsub.f32 %v6885_v63, %v3062_v26  ;;  %v4504_v63 = vld [vmem:[#allocation10 + $0x6] ss:$0 sm:$0xff] }
0x137f   :  { %v3070_v32 = vpop.xlane.xlu1 %3069  ;;  %v3073_v22 = vmul.f32 %v3061_v28, %v3061_v28  ;;  %v3077_v45 = vsub.f32 %v6888_v0, %v3061_v28  ;;  %v5273_v0 = vpop.f32.mrb[40].mxu0 }
0x1380   :  { %v3072_v35 = vmul.f32 0.03125, %v3070_v32  ;;  %v3067_v37 = vpop.xlane.xlu0 %3066  ;;  %v3324_v1 = vadd.f32 %v5273_v0, %v4504_v63  ;;  %v3318_v5 = vpop.f32.mrb[41].mxu0 }
0x1381   :  { %v3071_v27 = vmul.f32 0.03125, %v3067_v37  ;;  %v3319_v3 = vadd.f32 %v4504_v63, %v3318_v5  ;;  %v5276_v11 = vpop.f32.mrb[42].mxu0  ;;  %v3410_v5 = vld [vmem:[#allocation8 + $0xe8] sm:$0xff] }
0x1382   :  { %v3076_v19 = vsub.f32 %v3072_v35, %v3074_v33  ;;  %v6994_v9 = vmul.f32 %v6918_v38, %v3324_v1  ;;  %v3334_v13 = vadd.f32 %v5276_v11, %v4504_v63  ;;  %v3328_v55 = vpop.f32.mrb[43].mxu0  ;;  %v3409_v1 = vld [vmem:[#allocation8 + $0xe0] sm:$0xff] }
0x1383   :  { %v3075_v30 = vsub.f32 %v3071_v27, %v3073_v22  ;;  %v6997_v10 = vmul.f32 %v6924_v41, %v3319_v3  ;;  %v3329_v24 = vadd.f32 %v4504_v63, %v3328_v55  ;;  %v5279_v15 = vpop.f32.mrb[44].mxu0  ;;  %v5740_v3 = vpack.c.bf16 %v3410_v5, %v3409_v1  ;;  %v4544_v5 = vld [vmem:[%s7150_s15 + $0x4] ss:$0 sm:$0xff] }
0x1384   :  { %v3080_v40 = vadd.f32 1e-05, %v3076_v19  ;;  %v7002_v59 = vmul.f32 %v6930_v44, %v3334_v13  ;;  %v3338_v4 = vpop.f32.mrb[45].mxu0  ;;  %v3412_v13 = vld [vmem:[#allocation8 + $0xf8] sm:$0xff] }
0x1385   :  { %v3079_v42 = vadd.f32 1e-05, %v3075_v30  ;;  %v5723_v34 = vpack.c.bf16 %v6994_v9, %v6997_v10  ;;  %v7005_v14 = vmul.f32 %v6938_v47, %v3329_v24  ;;  %v3339_v6 = vadd.f32 %v4504_v63, %v3338_v4  ;;  %v5282_v29 = vpop.f32.mrb[46].mxu0  ;;  %v3411_v10 = vld [vmem:[#allocation8 + $0xf0] sm:$0xff]  ;;  %v4538_v4 = vld [vmem:[#allocation10 + $0x7] ss:$0 sm:$0xff] }
0x1386   :  { %5822 = vrsqrt.f32 %v3080_v40  ;;  %v3348_v17 = vpop.f32.mrb[47].mxu0 }
0x1387   :  { %5824 = vrsqrt.f32 %v3079_v42  ;;  %v5726_v2 = vpack.c.bf16 %v7002_v59, %v7005_v14  ;;  %v7013_v31 = vmul.f32 %v6951_v18, %v3339_v6  ;;  %v3349_v8 = vadd.f32 %v4504_v63, %v3348_v17  ;;  %v5285_v26 = vpop.f32.mrb[48].mxu0 }
0x1388   :  { %v3364_v23 = vadd.f32 %v5285_v26, %v4504_v63  ;;  %v3358_v28 = vpop.f32.mrb[49].mxu0 }
0x1389   :  { %v3395_v25 = vmul.f32 %v6924_v41, %v3349_v8  ;;  %v3359_v33 = vadd.f32 %v4504_v63, %v3358_v28  ;;  %v5288_v22 = vpop.f32.mrb[50].mxu0  ;;  %v4517_v41 = vld [vmem:[#allocation10 + $0x4] ss:$0 sm:$0xff] }
0x138a   :  { %v3398_v35 = vmul.f32 %v6930_v44, %v3364_v23  ;;  %v3374_v27 = vadd.f32 %v5288_v22, %v4504_v63  ;;  %v3368_v19 = vpop.f32.mrb[51].mxu0  ;;  %v4547_v23 = vld [vmem:[%s7145_s10 + $0x30] sm:$0xff] }
0x138b   :  { %v3397_v37 = vmul.f32 %v6938_v47, %v3359_v33  ;;  %v3369_v40 = vadd.f32 %v4504_v63, %v3368_v19  ;;  %v4554_v22 = vld [vmem:[%s7147_s12 + $0x50] sm:$0xff]  ;;  %v4555_v19 = vld [vmem:[%s7147_s12 + $0x58] sm:$0xff] }
0x138c   :  { %v3400_v42 = vmul.f32 %v6945_v62, %v3374_v27 }
0x138d   :  { %v5735_v30 = vpack.c.bf16 %v3398_v35, %v3397_v37  ;;  %v4552_v35 = vld [vmem:[%s7147_s12 + $0x40] sm:$0xff]  ;;  %v4553_v37 = vld [vmem:[%s7147_s12 + $0x48] sm:$0xff] }
0x138e   :  { %v5756_v27 = vpack.c.bf16 %v4553_v37, %v4552_v35 }
0x1390   :  { %v5823_v39 = vpop.eup %5822 }
0x1391   :  { %v5825_v43 = vpop.eup %5824  ;;  %v3084_v46 = vmul.f32 %v5823_v39, %v3078_v36 }
0x1392   :  { %v3083_v50 = vmul.f32 %v5825_v43, %v3077_v45 }
0x1393   :  { %v3092_v52 = vmul.f32 %v4489_v48, %v3084_v46 }
0x1394   :  { %v3091_v54 = vmul.f32 %v4489_v48, %v3083_v50 }
0x1395   :  { %v6976_v58 = vadd.f32 %v4490_v51, %v3092_v52 }
0x1396   :  { %v6974_v57 = vadd.f32 %v4490_v51, %v3091_v54 }
0x1398   :  { %5297 = vmatprep.mubr.msk.f32.mxu1 %vm183_vm0, %v6974_v57 }
0x1399   :  { %5298 = vmatmul.mubr.msk.f32.vlgmr.msra.gmra.mrb[50].mxu1 %vm183_vm0, %v6976_v58 }
0x139a   :  { %5701 = vmatpush3.bf16.xpose.msk.msra.mxu1 %vm6302_vm2, %v5699_v16  ;;  %5327 = vmatprep.mubr.msk.f32.mxu1 %vm6039_vm1, %v6040_v21  ;;  %v3344_v16 = vadd.f32 %v5279_v15, %v4504_v63  ;;  %v5744_v15 = vpack.c.bf16 %v3412_v13, %v3411_v10  ;;  %v4558_v13 = vld [vmem:[%s7147_s12 + $0x70] sm:$0xff] }
0x139b   :  { %5702 = vmatprep.subr.bf16.mxu1 %v6038_v20 }
0x139c   :  { %v7010_v7 = vmul.f32 %v6945_v62, %v3344_v16 }
0x139e   :  { %v5729_v60 = vpack.c.bf16 %v7010_v7, %v7013_v31 }
0x13a2   :  { %5705 = vmatpush3.bf16.xpose.msk.msra.mxu1 %vm6302_vm2, %v5703_v12  ;;  %v3354_v12 = vadd.f32 %v5282_v29, %v4504_v63 }
0x13a3   :  { %5706 = vmatprep.subr.bf16.mxu1 %v6038_v20 }
0x13aa   :  { %5709 = vmatpush3.bf16.xpose.msk.msra.mxu1 %vm6302_vm2, %v5707_v61  ;;  %v3396_v61 = vmul.f32 %v6918_v38, %v3354_v12  ;;  %v3399_v38 = vmul.f32 %v6951_v18, %v3369_v40  ;;  %v4556_v40 = vld [vmem:[%s7147_s12 + $0x60] sm:$0xff] }
0x13ab   :  { %5731 = vmatprep.subr.bf16.mxu1 %v6038_v20 }
0x13ac   :  { %v5732_v32 = vpack.c.bf16 %v3396_v61, %v3395_v25  ;;  %v5738_v36 = vpack.c.bf16 %v3400_v42, %v3399_v38  ;;  %v4557_v42 = vld [vmem:[%s7147_s12 + $0x68] sm:$0xff] }
0x13ad   :  { %v5764_v38 = vpack.c.bf16 %v4557_v42, %v4556_v40 }
0x146c   :  { %v5299_v39 = vpop.f32.mrb[50].mxu1 }
0x146d   :  { %v3499_v45 = vadd.f32 %v5299_v39, %v4517_v41  ;;  %v3493_v48 = vpop.f32.mrb[51].mxu1 }
0x146e   :  { %v3494_v43 = vadd.f32 %v4517_v41, %v3493_v48 }
0x146f   :  { %5328 = vmatmul.mubr.msk.f32.vlgmr.msra.gmra.mrb[52].mxu1 %vm183_vm0, %v3499_v45 }
0x1470   :  { %5313 = vmatmul.mubr.msk.f32.vlgmr.msra.gmra.mrb[52].mxu0 %vm183_vm0, %v3494_v43  ;;  %5733 = vmatpush3.bf16.msra.mxu1 %v5732_v32  ;;  %v4548_v32 = vld [vmem:[%s7145_s10 + $0x38] sm:$0xff] }
0x1471   :  { %5734 = vmatprep.subr.bf16.mxu1 %v6038_v20  ;;  %5713 = vmatpush3.bf16.msra.mxu0 %v6600_v49  ;;  %v5752_v33 = vpack.c.bf16 %v4548_v32, %v4547_v23 }
0x1472   :  { %5715 = vmatprep.subr.bf16.mxu0 %v6604_v53  ;;  %5372 = vmatprep.mubr.msk.f32.mxu1 %vm6039_vm1, %v6040_v21 }
0x1474   :  { %5736 = vmatpush3.bf16.msra.mxu1 %v5735_v30  ;;  %v5760_v30 = vpack.c.bf16 %v4555_v19, %v4554_v22 }
0x1475   :  { %5737 = vmatprep.subr.bf16.mxu1 %v6038_v20  ;;  %5717 = vmatpush3.bf16.msra.mxu0 %v6604_v53 }
0x1476   :  { %5719 = vmatprep.subr.bf16.mxu0 %v6606_v56 }
0x1478   :  { %5739 = vmatpush3.bf16.msra.mxu1 %v5738_v36 }
0x1479   :  { %5721 = vmatpush3.bf16.msra.mxu0 %v6606_v56  ;;  %5757 = vmatprep.subr.bf16.mxu1 %v5756_v27 }
0x147a   :  { %5722 = vmatprep.subr.bf16.mxu0 %v6038_v20 }
0x1542   :  { %v3680_v44 = vpop.f32.mrb[52].mxu1 }
0x1543   :  { %v3589_v47 = vpop.f32.mrb[52].mxu0  ;;  %v5329_v49 = vpop.f32.mrb[53].mxu1  ;;  %v3687_v62 = vsel %vm1630_vm3, %v3680_v44, -inf }
0x1544   :  { %3688 = vmax.xlane.f32.xlu1 %v3687_v62  ;;  %v5314_v18 = vpop.f32.mrb[53].mxu0  ;;  %v3684_v46 = vsel %vm1630_vm3, %v3589_v47, -inf }
0x1545   :  { %3685 = vmax.xlane.f32.xlu0 %v3684_v46 }
0x15d1   :  { %v3689_v50 = vpop.xlane.xlu1 %3688 }
0x15d2   :  { %v3691_v51 = vsub.f32 %v3680_v44, %v3689_v50  ;;  %v3686_v53 = vpop.xlane.xlu0 %3685 }
0x15d3   :  { %v3690_v52 = vsub.f32 %v3589_v47, %v3686_v53 }
0x15d4   :  { %v3694_v54 = vmul.f32 1.442695, %v3691_v51 }
0x15d5   :  { %v3692_v63 = vmul.f32 1.442695, %v3690_v52 }
0x15d7   :  { %5826 = vpow2.f32 %v3692_v63  ;;  %v4543_v63 = vld [vmem:[%s7149_s14 + $0x4] ss:$0 sm:$0xff] }
0x15d8   :  { %5828 = vpow2.f32 %v3694_v54 }
0x15e1   :  { %v5827_v56 = vpop.eup %5826 }
0x15e2   :  { %v5829_v0 = vpop.eup %5828  ;;  %5342 = vmatprep.mubr.msk.f32.mxu0 %vm1630_vm3, %v5827_v56 }
0x15e3   :  { %5343 = vmatmul.mubr.msk.f32.vlgmr.msra.gmra.mrb[54].mxu0 %vm1630_vm3, %v5829_v0 }
0x15e4   :  { %5724 = vmatpush3.bf16.msra.mxu0 %v5723_v34  ;;  %5357 = vmatprep.mubr.msk.f32.mxu0 %vm6039_vm1, %v6040_v21 }
0x15e5   :  { %5725 = vmatprep.subr.bf16.mxu0 %v6038_v20 }
0x15e8   :  { %5727 = vmatpush3.bf16.msra.mxu0 %v5726_v2 }
0x15e9   :  { %5728 = vmatprep.subr.bf16.mxu0 %v6038_v20 }
0x15ec   :  { %5730 = vmatpush3.bf16.msra.mxu0 %v5729_v60 }
0x15ed   :  { %5741 = vmatprep.subr.bf16.mxu0 %v5740_v3 }
0x16b6   :  { %v5344_v11 = vpop.f32.mrb[54].mxu0 }
0x16b7   :  { %5830 = vrcp.f32 %v5344_v11  ;;  %v3768_v9 = vpop.f32.mrb[55].mxu0 }
0x16b8   :  { %5832 = vrcp.f32 %v3768_v9 }
0x16c1   :  { %v5831_v21 = vpop.eup %5830 }
0x16c2   :  { %v5833_v55 = vpop.eup %5832  ;;  %v3780_v34 = vmul.f32 %v5831_v21, %v5829_v0  ;;  %v4559_v21 = vld [vmem:[%s7147_s12 + $0x78] sm:$0xff] }
0x16c3   :  { %v3779_v24 = vmul.f32 %v5833_v55, %v5827_v56  ;;  %v5768_v55 = vpack.c.bf16 %v4559_v21, %v4558_v13 }
0x16c4   :  { %5373 = vmatmul.mubr.msk.f32.vlgmr.msra.gmra.mrb[54].mxu1 %vm1630_vm3, %v3780_v34  ;;  %v4549_v34 = vld [vmem:[#allocation11 + $0x1] ss:$0 sm:$0xff] }
0x16c5   :  { %5358 = vmatmul.mubr.msk.f32.vlgmr.msra.gmra.mrb[56].mxu0 %vm1630_vm3, %v3779_v24  ;;  %5759 = vmatpush3.bf16.msra.mxu1 %v5756_v27 }
0x16c6   :  { %5743 = vmatpush3.bf16.msra.mxu0 %v5740_v3  ;;  %5761 = vmatprep.subr.bf16.mxu1 %v5760_v30 }
0x16c7   :  { %5745 = vmatprep.subr.bf16.mxu0 %v5744_v15 }
0x16c9   :  { %5763 = vmatpush3.bf16.msra.mxu1 %v5760_v30 }
0x16ca   :  { %5747 = vmatpush3.bf16.msra.mxu0 %v5744_v15  ;;  %5765 = vmatprep.subr.bf16.mxu1 %v5764_v38 }
0x16cd   :  { %5767 = vmatpush3.bf16.msra.mxu1 %v5764_v38 }
0x16ce   :  { %5769 = vmatprep.subr.bf16.mxu1 %v5768_v55 }
0x16d1   :  { %5771 = vmatpush3.bf16.msra.mxu1 %v5768_v55 }
0x1797   :  { %v3923_v20 = vpop.f32.mrb[54].mxu1 }
0x1798   :  { %v3850_v59 = vpop.f32.mrb[56].mxu0  ;;  %v5374_v14 = vpop.f32.mrb[55].mxu1 }
0x1799   :  { %v5359_v16 = vpop.f32.mrb[57].mxu0  ;;  %5383 = vmatprep.mubr.msk.f32.mxu0 %vm183_vm0, %v3850_v59 }
0x179a   :  { %5384 = vmatmul.mubr.msk.f32.vlgmr.msra.gmra.mrb[58].mxu0 %vm183_vm0, %v3923_v20 }
0x186d   :  { %v5385_v2 = vpop.f32.mrb[58].mxu0 }
0x186e   :  { %v4011_v6 = vadd.f32 %v5385_v2, %v4538_v4  ;;  %v4005_v7 = vpop.f32.mrb[59].mxu0 }
0x186f   :  { %v4006_v31 = vadd.f32 %v4538_v4, %v4005_v7  ;;  %v4561_v4 = vld [vmem:[%s7148_s13 + $0x1] ss:$0 sm:$0xff] }
0x1870   :  { %v4015_v29 = vadd.f32 %v4011_v6, %v6976_v58  ;;  %v4545_v58 = vld [vmem:[%s7145_s10 + $0x20] sm:$0xff] }
0x1871   :  { %v4014_v12 = vadd.f32 %v4006_v31, %v6974_v57  ;;  %v4546_v57 = vld [vmem:[%s7145_s10 + $0x28] sm:$0xff] }
0x1872   :  { %v4023_v17 = vsel %vm183_vm0, %v4015_v29, 0.0  ;;  %v4029_v60 = vmul.f32 %v4015_v29, %v4015_v29  ;;  %v5748_v28 = vpack.c.bf16 %v4546_v57, %v4545_v58 }
0x1873   :  { %4024 = vadd.xlane.f32.xlu1 %v4023_v17  ;;  %v4020_v8 = vsel %vm183_vm0, %v4014_v12, 0.0  ;;  %v4028_v61 = vmul.f32 %v4014_v12, %v4014_v12 }
0x1874   :  { %4021 = vadd.xlane.f32.xlu0 %v4020_v8  ;;  %v4033_v25 = vsel %vm183_vm0, %v4029_v60, 0.0  ;;  %5749 = vmatprep.subr.bf16.mxu0 %v5748_v28 }
0x1875   :  { %v4030_v26 = vsel %vm183_vm0, %v4028_v61, 0.0  ;;  %5751 = vmatpush3.bf16.msra.mxu0 %v5748_v28 }
0x1876   :  { %5753 = vmatprep.subr.bf16.mxu0 %v5752_v33 }
0x1877   :  { %4034 = vadd.xlane.f32.xlu1 %v4033_v25 }
0x1878   :  { %4031 = vadd.xlane.f32.xlu0 %v4030_v26 }
0x1879   :  { %5755 = vmatpush3.bf16.msra.mxu0 %v5752_v33 }
0x1900   :  { %v4025_v36 = vpop.xlane.xlu1 %4024 }
0x1901   :  { %v4027_v41 = vmul.f32 0.03125, %v4025_v36  ;;  %v4022_v39 = vpop.xlane.xlu0 %4021 }
0x1902   :  { %v4026_v45 = vmul.f32 0.03125, %v4022_v39  ;;  %v4566_v39 = vld [vmem:[%s7149_s14 + $0x5] ss:$0 sm:$0xff] }
0x1903   :  { %v4039_v43 = vmul.f32 %v4027_v41, %v4027_v41  ;;  %v4043_v53 = vsub.f32 %v4015_v29, %v4027_v41 }
0x1904   :  { %v4035_v48 = vpop.xlane.xlu1 %4034  ;;  %v4038_v49 = vmul.f32 %v4026_v45, %v4026_v45  ;;  %v4042_v54 = vsub.f32 %v4014_v12, %v4026_v45 }
0x1905   :  { %v4037_v44 = vmul.f32 0.03125, %v4035_v48  ;;  %v4032_v47 = vpop.xlane.xlu0 %4031 }
0x1906   :  { %v4036_v62 = vmul.f32 0.03125, %v4032_v47 }
0x1907   :  { %v4041_v18 = vsub.f32 %v4037_v44, %v4039_v43  ;;  %v4567_v43 = vld [vmem:[%s7150_s15 + $0x5] ss:$0 sm:$0xff] }
0x1908   :  { %v4040_v46 = vsub.f32 %v4036_v62, %v4038_v49 }
0x1909   :  { %v4045_v50 = vadd.f32 1e-05, %v4041_v18 }
0x190a   :  { %v4044_v51 = vadd.f32 1e-05, %v4040_v46 }
0x190b   :  { %5834 = vrsqrt.f32 %v4045_v50 }
0x190c   :  { %5836 = vrsqrt.f32 %v4044_v51 }
0x1915   :  { %v5835_v52 = vpop.eup %5834 }
0x1916   :  { %v5837_v56 = vpop.eup %5836  ;;  %v4049_v0 = vmul.f32 %v5835_v52, %v4043_v53 }
0x1917   :  { %v4048_v1 = vmul.f32 %v5837_v56, %v4042_v54 }
0x1918   :  { %v4057_v3 = vmul.f32 %v4543_v63, %v4049_v0 }
0x1919   :  { %v4056_v11 = vmul.f32 %v4543_v63, %v4048_v1 }
0x191a   :  { %v4065_v10 = vadd.f32 %v4544_v5, %v4057_v3 }
0x191b   :  { %v4064_v9 = vadd.f32 %v4544_v5, %v4056_v11 }
0x191d   :  { %5394 = vmatprep.mubr.msk.f32.mxu0 %vm183_vm0, %v4064_v9 }
0x191e   :  { %5395 = vmatmul.mubr.msk.f32.vlgmr.msra.gmra.mrb[60].mxu0 %vm183_vm0, %v4065_v10 }
0x19f1   :  { %v5396_v24 = vpop.f32.mrb[60].mxu0 }
0x19f2   :  { %v4157_v15 = vadd.f32 %v5396_v24, %v4549_v34  ;;  %v4151_v20 = vpop.f32.mrb[61].mxu0 }
0x19f3   :  { %v4152_v59 = vadd.f32 %v4549_v34, %v4151_v20 }
0x19f4   :  { %v4161_v16 = vmax.f32 %v4157_v15, 0.0 }
0x19f5   :  { %v4160_v14 = vmax.f32 %v4152_v59, 0.0 }
0x19f7   :  { %5413 = vmatprep.mubr.msk.f32.mxu1 %vm2122_vm4, %v4160_v14 }
0x19f8   :  { %5414 = vmatmul.mubr.msk.f32.vlgmr.msra.gmra.mrb[56].mxu1 %vm2122_vm4, %v4161_v16 }
0x1acb   :  { %v5415_v2 = vpop.f32.mrb[56].mxu1 }
0x1acc   :  { %v4257_v6 = vadd.f32 %v5415_v2, %v4561_v4  ;;  %v4251_v7 = vpop.f32.mrb[57].mxu1 }
0x1acd   :  { %v4252_v31 = vadd.f32 %v4561_v4, %v4251_v7 }
0x1ace   :  { %v4261_v29 = vadd.f32 %v4257_v6, %v4065_v10 }
0x1acf   :  { %v4260_v12 = vadd.f32 %v4252_v31, %v4064_v9 }
0x1ad0   :  { %v4269_v17 = vsel %vm183_vm0, %v4261_v29, 0.0  ;;  %v4275_v60 = vmul.f32 %v4261_v29, %v4261_v29 }
0x1ad1   :  { %4270 = vadd.xlane.f32.xlu1 %v4269_v17  ;;  %v4266_v8 = vsel %vm183_vm0, %v4260_v12, 0.0  ;;  %v4274_v61 = vmul.f32 %v4260_v12, %v4260_v12 }
0x1ad2   :  { %4267 = vadd.xlane.f32.xlu0 %v4266_v8  ;;  %v4279_v25 = vsel %vm183_vm0, %v4275_v60, 0.0 }
0x1ad3   :  { %v4276_v26 = vsel %vm183_vm0, %v4274_v61, 0.0 }
0x1ad5   :  { %4280 = vadd.xlane.f32.xlu1 %v4279_v25 }
0x1ad6   :  { %4277 = vadd.xlane.f32.xlu0 %v4276_v26 }
0x1b5e   :  { %v4271_v58 = vpop.xlane.xlu1 %4270 }
0x1b5f   :  { %v4273_v57 = vmul.f32 0.03125, %v4271_v58  ;;  %v4268_v23 = vpop.xlane.xlu0 %4267 }
0x1b60   :  { %v4272_v28 = vmul.f32 0.03125, %v4268_v23 }
0x1b61   :  { %v4285_v33 = vmul.f32 %v4273_v57, %v4273_v57  ;;  %v4289_v38 = vsub.f32 %v4261_v29, %v4273_v57 }
0x1b62   :  { %v4281_v32 = vpop.xlane.xlu1 %4280  ;;  %v4284_v22 = vmul.f32 %v4272_v28, %v4272_v28  ;;  %v4288_v41 = vsub.f32 %v4260_v12, %v4272_v28 }
0x1b63   :  { %v4283_v35 = vmul.f32 0.03125, %v4281_v32  ;;  %v4278_v37 = vpop.xlane.xlu0 %4277 }
0x1b64   :  { %v4282_v27 = vmul.f32 0.03125, %v4278_v37 }
0x1b65   :  { %v4287_v19 = vsub.f32 %v4283_v35, %v4285_v33 }
0x1b66   :  { %v4286_v30 = vsub.f32 %v4282_v27, %v4284_v22 }
0x1b67   :  { %v4291_v40 = vadd.f32 1e-05, %v4287_v19 }
0x1b68   :  { %v4290_v42 = vadd.f32 1e-05, %v4286_v30 }
0x1b69   :  { %5838 = vrsqrt.f32 %v4291_v40 }
0x1b6a   :  { %5840 = vrsqrt.f32 %v4290_v42 }
0x1b73   :  { %v5839_v36 = vpop.eup %5838 }
0x1b74   :  { %v5841_v45 = vpop.eup %5840  ;;  %v4295_v48 = vmul.f32 %v5839_v36, %v4289_v38 }
0x1b75   :  { %v4294_v44 = vmul.f32 %v5841_v45, %v4288_v41 }
0x1b76   :  { %v4303_v47 = vmul.f32 %v4566_v39, %v4295_v48 }
0x1b77   :  { %v4302_v49 = vmul.f32 %v4566_v39, %v4294_v44 }
0x1b78   :  { %v4311_v62 = vadd.f32 %v4567_v43, %v4303_v47 }
0x1b79   :  { %v4310_v18 = vadd.f32 %v4567_v43, %v4302_v49 }
0x1b7a   :  { %4313 = vst.msk [vmem:[#allocation13 + $0x8] sm:$0xff] %vm183_vm0, %v4311_v62 }
0x1b7b   :  { %4312 = vst.msk [vmem:[#allocation13] sm:$0xff] %vm183_vm0, %v4310_v18 }
0x1b7c   :  { %6007 = shalt.err (!%p6004_p10)
}
0x1b7d   :  { %s7159_s21 = sld [smem:[#allocation20_spill]] }
0x1b83   :  { %s6008_s25 = scalar_lea.hbm %s7159_s21, 256 }
0x1b84   :  { %p6009_p11 = scmp.ne.s32.totalorder %s7159_s21, %s6008_s25  ;;  %p6012_p12 = scmp.lt.u32.totalorder %s6008_s25, %s7159_s21 }
0x1b86   :  { %p6014_p13 = pnand %p6012_p12, %p6009_p11 }
0x1b88   :  { %6017 = shalt.err (!%p6014_p13)
}
0x1b89   :  { %4325 = dma.vmem_to_hbm [thread:$0]  %s4320_s1, 256, %s7159_s21, [#allocation4], %s6030_s18, %s6030_s18, %s6031_s19  }
0x1b8a   :  { %6026 = dma.done.wait [#allocation4], 256  }
0x1b8b   :  { %6027 = vsyncadd [#allocation4], 4294967040 }
0x1b8c   :  { %4329 = vsyncpa [#allocation3], 1 }
0x1b8d   :  { %4330 = vsyncpa [#allocation6], 1 }
0x1b8e   :  { %4331 = vsyncpa [#allocation9], 1 }
0x1b8f   :  { %4332 = vsyncpa [#allocation12], 1 }
0x1b90   :  { %4333 = vsyncpa [#allocation4], 1 }

</bundles_post_ra>
